<compile_context>
chip_gen: v7x
topology: tpu7x:2x2x1
jax: 0.10.0
libtpu: 0.0.40
codegen_flags: <defaults>
</compile_context>

<pallas_src>
import math
from functools import partial

import jax
import jax.numpy as jnp
import numpy as np
from jax.experimental import pallas as pl
from jax.experimental.pallas import tpu as pltpu

LANE = 128
INV_SQRT2 = 0.7071067811865476
SQRT_2_OVER_PI = 0.7978845608028654


# --------------------------------------------------------------------------------- kernel
def _mlp_kernel(x_main_ref, x_top_ref, x_bot_ref, w1_ref, b1_ref, wdw_ref, bdw_ref,
                w2_ref, b2_ref, out_ref, h_ref, *, approximate_gelu):
    # x_main_ref: (1, R, W, Cp) bf16   x_top_ref / x_bot_ref: (1, 1, W, Cp) bf16
    # h_ref (scratch): (L, Kp) f32 with L = (R + 2) * W       out_ref: (1, R*W, Cop)
    R, W = x_main_ref.shape[1], x_main_ref.shape[2]
    RW = R * W
    L, Kp = h_ref.shape

    blk = pl.program_id(1)
    nblk = pl.num_programs(1)

    w1 = w1_ref[...]                                   # (Cp, Kp) bf16
    b1 = b1_ref[...]                                   # (1, Kp)  f32

    # ---- fc1 on the R output rows (MXU, bf16 operands, f32 accumulation) ----------------
    x_main = x_main_ref[0].reshape(RW, -1)             # (RW, Cp) bf16
    h_ref[pl.ds(W, RW), :] = jnp.dot(x_main, w1, preferred_element_type=jnp.float32) + b1

    # One recomputed fc1 row above / below the block.  Halo rows outside the image must be
    # zero for the conv (fc1 of a zero-padded row is b1, not 0), so edge blocks overwrite
    # their halo with zeros (tiny (W, Kp) selects with a scalar predicate).
    ht = jnp.dot(x_top_ref[0, 0], w1, preferred_element_type=jnp.float32) + b1   # (W, Kp)
    hb = jnp.dot(x_bot_ref[0, 0], w1, preferred_element_type=jnp.float32) + b1   # (W, Kp)
    h_ref[pl.ds(0, W), :] = jnp.where(blk == 0, 0.0, ht)
    h_ref[pl.ds(L - W, W), :] = jnp.where(blk == nblk - 1, 0.0, hb)

    # ---- depthwise 3x3 conv (zero padding), computed only on the RW output rows ---------
    h = h_ref[...]                                     # (L, Kp) f32
    col = jax.lax.broadcasted_iota(jnp.int32, (L, 1), 0) % W
    h_m1 = jnp.where(col == W - 1, 0.0, h)             # source for dx = -1 taps
    h_p1 = jnp.where(col == 0, 0.0, h)                 # source for dx = +1 taps

    wdw = wdw_ref[...]                                 # (9, Kp) f32, row t = (dy+1)*3 + (dx+1)

    def w_at(t):
        return wdw[t:t + 1, :]                         # (1, Kp), broadcasts over rows

    # Output token i needs source row i + W + dy*W + dx.  All taps are static RW-row windows
    # except the two corner taps, whose +-1 overflow wraps (via an RW-row roll) onto a
    # pre-zeroed column of h_m1 / h_p1 — exactly matching the zero padding.
    acc = pltpu.roll(h_m1[0:RW], 1, axis=0) * w_at(0)                           # dy=-1, dx=-1
    acc = acc + h[0:RW] * w_at(1)                                               # dy=-1, dx= 0
    acc = acc + h_p1[1:1 + RW] * w_at(2)                                        # dy=-1, dx=+1
    acc = acc + h_m1[W - 1:W - 1 + RW] * w_at(3)                                # dy= 0, dx=-1
    acc = acc + h[W:W + RW] * w_at(4)                                           # dy= 0, dx= 0
    acc = acc + h_p1[W + 1:W + 1 + RW] * w_at(5)                                # dy= 0, dx=+1
    acc = acc + h_m1[2 * W - 1:2 * W - 1 + RW] * w_at(6)                        # dy=+1, dx=-1
    acc = acc + h[2 * W:2 * W + RW] * w_at(7)                                   # dy=+1, dx= 0
    acc = acc + pltpu.roll(h_p1[2 * W:2 * W + RW], RW - 1, axis=0) * w_at(8)    # dy=+1, dx=+1
    conv = acc + bdw_ref[...]                                                   # (RW, Kp) f32

    # ---- GELU ----------------------------------------------------------------------------
    if approximate_gelu:
        # tanh approximation -> EUP transcendental (per review); tiny documented deviation
        # from nn.GELU()'s exact erf.
        inner = SQRT_2_OVER_PI * (conv + 0.044715 * conv * conv * conv)
        act = 0.5 * conv * (1.0 + jnp.tanh(inner))
    else:
        act = 0.5 * conv * (1.0 + jax.lax.erf(conv * INV_SQRT2))

    # ---- fc2 (MXU, bf16 operands, f32 accumulation) ---------------------------------------
    out = jnp.dot(act.astype(jnp.bfloat16), w2_ref[...],
                  preferred_element_type=jnp.float32) + b2_ref[...]
    out_ref[0] = out.astype(out_ref.dtype)


# --------------------------------------------------------------------------------- wrapper
def _pad_axis(a, axis, mult):
    pad = (-a.shape[axis]) % mult
    if pad == 0:
        return a
    widths = [(0, 0)] * a.ndim
    widths[axis] = (0, pad)
    return jnp.pad(a, widths)


def _estimate_vmem(R, W, Cp, Kp, Cop):
    L = (R + 2) * W
    RW = R * W
    x_bytes = 2 * (RW * Cp + 2 * W * Cp) * 2            # double-buffered bf16 x blocks
    out_bytes = 2 * RW * Cop * 4                         # double-buffered f32 output block
    w_bytes = 2 * ((Cp * Kp + Kp * Cop) * 2 + 11 * Kp * 4 + Cop * 4)
    h_bytes = L * Kp * 4                                 # fc1 scratch
    work_bytes = 6 * L * Kp * 4                          # h_m1/h_p1/taps/acc/gelu live tiles
    return x_bytes + out_bytes + w_bytes + h_bytes + work_bytes


def _pick_rows_per_block(H, W, Cp, Kp, Cop, max_tokens=1024, budget_bytes=40 * 2**20):
    """Largest R dividing H with R*W sublane-aligned that fits the VMEM budget."""
    cands = [r for r in range(1, H + 1) if H % r == 0 and ((r * W) % 8 == 0 or r == H)]
    if not cands:
        return H
    cands.sort(reverse=True)
    for r in cands:
        if r * W <= max_tokens and _estimate_vmem(r, W, Cp, Kp, Cop) <= budget_bytes:
            return r
    return cands[-1]


def mlp_pallas(x, params, H, W, rows_per_block=None, approximate_gelu=True, out_dtype=None):
    """x: (B, N, C_in) with N = H*W (row-major tokens). Returns (B, N, C_out)."""
    w1, b1, wdw, bdw, w2, b2 = params
    B, N, C_in = x.shape
    assert N == H * W, "token count must equal H*W"
    K = w1.shape[1]
    C_out = w2.shape[1]
    out_dtype = out_dtype or x.dtype

    b1 = jnp.asarray(b1).reshape(1, K)
    bdw = jnp.asarray(bdw).reshape(1, K)
    b2 = jnp.asarray(b2).reshape(1, C_out)

    # ---- lane-dense padding of channel dims; bf16 activations / matmul weights -------------
    x_p = _pad_axis(x, 2, LANE).astype(jnp.bfloat16)                 # (B, N, Cp) bf16
    Cp = x_p.shape[2]
    w1_p = _pad_axis(_pad_axis(w1, 0, LANE), 1, LANE).astype(jnp.bfloat16)   # (Cp, Kp)
    Kp = w1_p.shape[1]
    b1_p = _pad_axis(b1, 1, LANE)                                    # (1, Kp) f32
    wdw_p = _pad_axis(wdw.reshape(9, K), 1, LANE)                    # (9, Kp) f32
    bdw_p = _pad_axis(bdw, 1, LANE)                                  # (1, Kp) f32
    w2_p = _pad_axis(_pad_axis(w2, 0, LANE), 1, LANE).astype(jnp.bfloat16)   # (Kp, Cop)
    Cop = w2_p.shape[1]
    b2_p = _pad_axis(b2, 1, LANE)                                    # (1, Cop) f32

    R = rows_per_block or _pick_rows_per_block(H, W, Cp, Kp, Cop)
    assert H % R == 0
    nb = H // R
    RW = R * W
    L = (R + 2) * W
    assert RW % 8 == 0 or nb == 1, "row block must be sublane aligned"

    x_img = x_p.reshape(B, H, W, Cp)                                 # view, no extra HBM copy

    est = _estimate_vmem(R, W, Cp, Kp, Cop)
    vmem_limit = int(min(est * 3 // 2, 56 * 2**20)) if est > 30 * 2**20 else None

    kernel = partial(_mlp_kernel, approximate_gelu=approximate_gelu)

    out_p = pl.pallas_call(
        kernel,
        out_shape=jax.ShapeDtypeStruct((B, N, Cop), out_dtype),
        grid_spec=pltpu.PrefetchScalarGridSpec(
            num_scalar_prefetch=0,
            grid=(B, nb),
            in_specs=[
                # x: R main rows + two single-row halos read straight from the image;
                # halo indices are clamped at the border (those rows are zeroed in-kernel).
                pl.BlockSpec((1, R, W, Cp), lambda b, i: (b, i, 0, 0)),
                pl.BlockSpec((1, 1, W, Cp), lambda b, i: (b, jnp.maximum(i * R - 1, 0), 0, 0)),
                pl.BlockSpec((1, 1, W, Cp), lambda b, i: (b, jnp.minimum(i * R + R, H - 1), 0, 0)),
                # grid-invariant params (DMA'd once by the pipeline).
                # TODO(synk): mark single-buffered via pipeline_mode=pl.Buffered(1) once stable.
                pl.BlockSpec((Cp, Kp), lambda b, i: (0, 0)),          # fc1 weight (bf16)
                pl.BlockSpec((1, Kp), lambda b, i: (0, 0)),           # fc1 bias
                pl.BlockSpec((9, Kp), lambda b, i: (0, 0)),           # dwconv weight (9, K)
                pl.BlockSpec((1, Kp), lambda b, i: (0, 0)),           # dwconv bias
                pl.BlockSpec((Kp, Cop), lambda b, i: (0, 0)),         # fc2 weight (bf16)
                pl.BlockSpec((1, Cop), lambda b, i: (0, 0)),          # fc2 bias
            ],
            out_specs=pl.BlockSpec((1, RW, Cop), lambda b, i: (b, i, 0)),
            scratch_shapes=[pltpu.VMEM((L, Kp), jnp.float32)],        # fc1 block + halo rows
        ),
        compiler_params=pltpu.CompilerParams(
            dimension_semantics=("parallel", "parallel"),
            vmem_limit_bytes=vmem_limit),
    )(x_img, x_img, x_img, w1_p, b1_p, wdw_p, bdw_p, w2_p, b2_p)

    return out_p[..., :C_out]


# --------------------------------------------------------------------------------- reference
def mlp_reference(x, params, H, W):
    """Pure-JAX f32 reference matching the PyTorch forward (exact-erf GELU)."""
    w1, b1, wdw, bdw, w2, b2 = params
    B, N, C = x.shape
    K = w1.shape[1]
    h = x @ w1 + b1.reshape(1, -1)
    img = h.reshape(B, H, W, K)
    conv = jax.lax.conv_general_dilated(
        img, wdw.reshape(3, 3, 1, K), window_strides=(1, 1), padding="SAME",
        dimension_numbers=("NHWC", "HWIO", "NHWC"), feature_group_count=K,
    ) + bdw.reshape(1, 1, 1, -1)
    a = 0.5 * conv * (1.0 + jax.lax.erf(conv * INV_SQRT2))
    a = a.reshape(B, N, K)
    return a @ w2 + b2.reshape(1, -1)


def init_params(key, in_features, hidden_features, out_features):
    # Weight scales follow the module's init; biases are made small-but-nonzero here so the
    # conv halo / zero-padding handling is actually exercised by the test.
    k1, k2, k3, k4, k5, k6 = jax.random.split(key, 6)
    w1 = jax.random.normal(k1, (in_features, hidden_features), jnp.float32) * 0.02
    b1 = jax.random.normal(k4, (1, hidden_features), jnp.float32) * 0.02
    wdw = jax.random.normal(k2, (3, 3, hidden_features), jnp.float32) * math.sqrt(2.0 / 9.0)
    bdw = jax.random.normal(k5, (1, hidden_features), jnp.float32) * 0.02
    w2 = jax.random.normal(k3, (hidden_features, out_features), jnp.float32) * 0.02
    b2 = jax.random.normal(k6, (1, out_features), jnp.float32) * 0.02
    return (w1, b1, wdw, bdw, w2, b2)


if __name__ == "__main__":
    B, C, H, W = 2, 4, 16, 16
    hidden = 32
    N = H * W

    key = jax.random.PRNGKey(0)
    kx, kp = jax.random.split(key)
    x = jax.random.normal(kx, (B, N, C), jnp.float32)
    params = init_params(kp, in_features=C, hidden_features=hidden, out_features=C)

    ref = jax.block_until_ready(mlp_reference(x, params, H, W))

    # default: auto row-block size (single block here).
    out = jax.block_until_ready(mlp_pallas(x, params, H, W))
    np.testing.assert_allclose(np.asarray(out), np.asarray(ref), rtol=2e-2, atol=3e-3)

    # multi-block path: exercises the clamped halo BlockSpecs / cross-block halo recompute.
    out_blk = jax.block_until_ready(mlp_pallas(x, params, H, W, rows_per_block=4))
    np.testing.assert_allclose(np.asarray(out_blk), np.asarray(ref), rtol=2e-2, atol=3e-3)

    print("KERNEL_OK")
</pallas_src>

<mosaic_0001>
module attributes {stable_mosaic.version = 11 : i64} {
  func.func @_mlp_kernel(%arg0: i32, %arg1: i32, %arg2: memref<1x16x16x128xbf16, #tpu.memory_space<vmem>>, %arg3: memref<1x1x16x128xbf16, #tpu.memory_space<vmem>>, %arg4: memref<1x1x16x128xbf16, #tpu.memory_space<vmem>>, %arg5: memref<128x128xbf16, #tpu.memory_space<vmem>>, %arg6: memref<1x128xf32, #tpu.memory_space<vmem>>, %arg7: memref<9x128xf32, #tpu.memory_space<vmem>>, %arg8: memref<1x128xf32, #tpu.memory_space<vmem>>, %arg9: memref<128x128xbf16, #tpu.memory_space<vmem>>, %arg10: memref<1x128xf32, #tpu.memory_space<vmem>>, %arg11: memref<1x256x128xf32, #tpu.memory_space<vmem>>, %arg12: memref<288x128xf32, #tpu.memory_space<vmem>>) attributes {dimension_semantics = [#tpu.dimension_semantics<parallel>, #tpu.dimension_semantics<parallel>], iteration_bounds = array<i64: 2, 1>, scalar_prefetch = 0 : i64, scratch_operands = 1 : i64, tpu.core_type = #tpu.core_type<tc>, window_params = [{transform_indices = @transform_0, window_bounds = array<i64: 1, 16, 16, 128>}, {transform_indices = @transform_1, window_bounds = array<i64: 1, 1, 16, 128>}, {transform_indices = @transform_2, window_bounds = array<i64: 1, 1, 16, 128>}, {pipeline_mode = #tpu.pipeline_mode<synchronous>, transform_indices = @transform_3, window_bounds = array<i64: 128, 128>}, {pipeline_mode = #tpu.pipeline_mode<synchronous>, transform_indices = @transform_4, window_bounds = array<i64: 1, 128>}, {pipeline_mode = #tpu.pipeline_mode<synchronous>, transform_indices = @transform_5, window_bounds = array<i64: 9, 128>}, {pipeline_mode = #tpu.pipeline_mode<synchronous>, transform_indices = @transform_6, window_bounds = array<i64: 1, 128>}, {pipeline_mode = #tpu.pipeline_mode<synchronous>, transform_indices = @transform_7, window_bounds = array<i64: 128, 128>}, {pipeline_mode = #tpu.pipeline_mode<synchronous>, transform_indices = @transform_8, window_bounds = array<i64: 1, 128>}, {transform_indices = @transform_9, window_bounds = array<i64: 1, 256, 128>}]} {
    %c0 = arith.constant 0 : index
    %c0_0 = arith.constant 0 : index
    %0 = vector.load %arg5[%c0, %c0_0] : memref<128x128xbf16, #tpu.memory_space<vmem>>, vector<128x128xbf16>
    %c0_1 = arith.constant 0 : index
    %c0_2 = arith.constant 0 : index
    %1 = vector.load %arg6[%c0_1, %c0_2] : memref<1x128xf32, #tpu.memory_space<vmem>>, vector<1x128xf32>
    %c0_3 = arith.constant 0 : index
    %c0_4 = arith.constant 0 : index
    %c0_5 = arith.constant 0 : index
    %c0_6 = arith.constant 0 : index
    %2 = vector.load %arg2[%c0_3, %c0_4, %c0_5, %c0_6] : memref<1x16x16x128xbf16, #tpu.memory_space<vmem>>, vector<1x16x16x128xbf16>
    %3 = vector.shape_cast %2 : vector<1x16x16x128xbf16> to vector<16x16x128xbf16>
    %4 = vector.shape_cast %3 : vector<16x16x128xbf16> to vector<256x128xbf16>
    %cst = arith.constant dense<0.000000e+00> : vector<256x128xf32>
    %5 = tpu.matmul %4, %0, %cst {dimension_numbers = #tpu.dot_dimension_numbers<[1], [0], [0], [1], [0, 0, 1, 1], [], []>} : vector<256x128xbf16>, vector<128x128xbf16>, vector<256x128xf32> -> vector<256x128xf32>
    %6 = vector.broadcast %1 : vector<1x128xf32> to vector<256x128xf32>
    %7 = arith.addf %5, %6 : vector<256x128xf32>
    %c16 = arith.constant 16 : index
    %c0_7 = arith.constant 0 : index
    %8 = vector.load %arg12[%c16, %c0_7] : memref<288x128xf32, #tpu.memory_space<vmem>>, vector<256x128xf32>
    tpu.vector_store %arg12[%c16, %c0_7], %7 {strides = array<i32>} : memref<288x128xf32, #tpu.memory_space<vmem>>, vector<256x128xf32>,
    %c0_8 = arith.constant 0 : index
    %c0_9 = arith.constant 0 : index
    %c0_10 = arith.constant 0 : index
    %c0_11 = arith.constant 0 : index
    %9 = vector.load %arg3[%c0_8, %c0_9, %c0_10, %c0_11] : memref<1x1x16x128xbf16, #tpu.memory_space<vmem>>, vector<1x1x16x128xbf16>
    %10 = vector.shape_cast %9 : vector<1x1x16x128xbf16> to vector<16x128xbf16>
    %cst_12 = arith.constant dense<0.000000e+00> : vector<16x128xf32>
    %11 = tpu.matmul %10, %0, %cst_12 {dimension_numbers = #tpu.dot_dimension_numbers<[1], [0], [0], [1], [0, 0, 1, 1], [], []>} : vector<16x128xbf16>, vector<128x128xbf16>, vector<16x128xf32> -> vector<16x128xf32>
    %12 = vector.broadcast %1 : vector<1x128xf32> to vector<16x128xf32>
    %13 = arith.addf %11, %12 : vector<16x128xf32>
    %c0_13 = arith.constant 0 : index
    %c0_14 = arith.constant 0 : index
    %c0_15 = arith.constant 0 : index
    %c0_16 = arith.constant 0 : index
    %14 = vector.load %arg4[%c0_13, %c0_14, %c0_15, %c0_16] : memref<1x1x16x128xbf16, #tpu.memory_space<vmem>>, vector<1x1x16x128xbf16>
    %15 = vector.shape_cast %14 : vector<1x1x16x128xbf16> to vector<16x128xbf16>
    %cst_17 = arith.constant dense<0.000000e+00> : vector<16x128xf32>
    %16 = tpu.matmul %15, %0, %cst_17 {dimension_numbers = #tpu.dot_dimension_numbers<[1], [0], [0], [1], [0, 0, 1, 1], [], []>} : vector<16x128xbf16>, vector<128x128xbf16>, vector<16x128xf32> -> vector<16x128xf32>
    %17 = vector.broadcast %1 : vector<1x128xf32> to vector<16x128xf32>
    %18 = arith.addf %16, %17 : vector<16x128xf32>
    %c0_i32 = arith.constant 0 : i32
    %19 = arith.cmpi eq, %arg1, %c0_i32 : i32
    %cst_18 = arith.constant 0.000000e+00 : f32
    %20 = vector.broadcast %cst_18 : f32 to vector<16x128xf32>
    %21 = arith.select %19, %20, %13 : vector<16x128xf32>
    %c0_19 = arith.constant 0 : index
    %c0_20 = arith.constant 0 : index
    %22 = vector.load %arg12[%c0_19, %c0_20] : memref<288x128xf32, #tpu.memory_space<vmem>>, vector<16x128xf32>
    tpu.vector_store %arg12[%c0_19, %c0_20], %21 {strides = array<i32>} : memref<288x128xf32, #tpu.memory_space<vmem>>, vector<16x128xf32>,
    %c0_i32_21 = arith.constant 0 : i32
    %23 = arith.cmpi eq, %arg1, %c0_i32_21 : i32
    %cst_22 = arith.constant 0.000000e+00 : f32
    %24 = vector.broadcast %cst_22 : f32 to vector<16x128xf32>
    %25 = arith.select %23, %24, %18 : vector<16x128xf32>
    %c272 = arith.constant 272 : index
    %c0_23 = arith.constant 0 : index
    %26 = vector.load %arg12[%c272, %c0_23] : memref<288x128xf32, #tpu.memory_space<vmem>>, vector<16x128xf32>
    tpu.vector_store %arg12[%c272, %c0_23], %25 {strides = array<i32>} : memref<288x128xf32, #tpu.memory_space<vmem>>, vector<16x128xf32>,
    %c0_24 = arith.constant 0 : index
    %c0_25 = arith.constant 0 : index
    %27 = vector.load %arg12[%c0_24, %c0_25] : memref<288x128xf32, #tpu.memory_space<vmem>>, vector<288x128xf32>
    %28 = tpu.iota {dimensions = array<i32: 0>} : vector<288x1xi32>
    %c16_i32 = arith.constant 16 : i32
    %c0_i32_26 = arith.constant 0 : i32
    %29 = arith.cmpi eq, %c16_i32, %c0_i32_26 : i32
    %c1_i32 = arith.constant 1 : i32
    %30 = arith.select %29, %c1_i32, %c16_i32 : i32
    %31 = vector.broadcast %30 : i32 to vector<288x1xi32>
    %32 = arith.remsi %28, %31 : vector<288x1xi32>
    %c0_i32_27 = arith.constant 0 : i32
    %33 = vector.broadcast %c0_i32_27 : i32 to vector<288x1xi32>
    %34 = arith.cmpi ne, %32, %33 : vector<288x1xi32>
    %c0_i32_28 = arith.constant 0 : i32
    %35 = vector.broadcast %c0_i32_28 : i32 to vector<288x1xi32>
    %36 = arith.cmpi slt, %32, %35 : vector<288x1xi32>
    %c0_i32_29 = arith.constant 0 : i32
    %37 = arith.cmpi slt, %30, %c0_i32_29 : i32
    %38 = vector.broadcast %37 : i1 to vector<288x1xi1>
    %39 = vector.broadcast %38 : vector<288x1xi1> to vector<288x1xi1>
    %40 = arith.xori %36, %39 : vector<288x1xi1>
    %41 = arith.andi %40, %34 : vector<288x1xi1>
    %42 = vector.broadcast %30 : i32 to vector<288x1xi32>
    %43 = arith.addi %32, %42 : vector<288x1xi32>
    %44 = arith.select %41, %43, %32 : vector<288x1xi1>, vector<288x1xi32>
    %c15_i32 = arith.constant 15 : i32
    %45 = vector.broadcast %c15_i32 : i32 to vector<288x1xi32>
    %46 = arith.cmpi eq, %44, %45 : vector<288x1xi32>
    %cst_30 = arith.constant 0.000000e+00 : f32
    %47 = vector.shape_cast %46 : vector<288x1xi1> to vector<288x1xi1>
    %48 = vector.broadcast %47 : vector<288x1xi1> to vector<288x128xi1>
    %49 = vector.broadcast %cst_30 : f32 to vector<288x128xf32>
    %50 = arith.select %48, %49, %27 : vector<288x128xi1>, vector<288x128xf32>
    %c0_i32_31 = arith.constant 0 : i32
    %51 = vector.broadcast %c0_i32_31 : i32 to vector<288x1xi32>
    %52 = arith.cmpi eq, %44, %51 : vector<288x1xi32>
    %cst_32 = arith.constant 0.000000e+00 : f32
    %53 = vector.shape_cast %52 : vector<288x1xi1> to vector<288x1xi1>
    %54 = vector.broadcast %53 : vector<288x1xi1> to vector<288x128xi1>
    %55 = vector.broadcast %cst_32 : f32 to vector<288x128xf32>
    %56 = arith.select %54, %55, %27 : vector<288x128xi1>, vector<288x128xf32>
    %c0_33 = arith.constant 0 : index
    %c0_34 = arith.constant 0 : index
    %57 = vector.load %arg7[%c0_33, %c0_34] : memref<9x128xf32, #tpu.memory_space<vmem>>, vector<9x128xf32>
    %58 = vector.extract_strided_slice %50 {offsets = [0, 0], sizes = [256, 128], strides = [1, 1]} : vector<288x128xf32> to vector<256x128xf32>
    %c1_i32_35 = arith.constant 1 : i32
    %59 = tpu.dynamic_rotate %58 by %c1_i32_35 dim 0 : vector<256x128xf32>, i32 -> vector<256x128xf32>
    %60 = vector.extract_strided_slice %57 {offsets = [0, 0], sizes = [1, 128], strides = [1, 1]} : vector<9x128xf32> to vector<1x128xf32>
    %61 = vector.broadcast %60 : vector<1x128xf32> to vector<256x128xf32>
    %62 = arith.mulf %59, %61 : vector<256x128xf32>
    %63 = vector.extract_strided_slice %27 {offsets = [0, 0], sizes = [256, 128], strides = [1, 1]} : vector<288x128xf32> to vector<256x128xf32>
    %64 = vector.extract_strided_slice %57 {offsets = [1, 0], sizes = [1, 128], strides = [1, 1]} : vector<9x128xf32> to vector<1x128xf32>
    %65 = vector.broadcast %64 : vector<1x128xf32> to vector<256x128xf32>
    %66 = arith.mulf %63, %65 : vector<256x128xf32>
    %67 = arith.addf %62, %66 : vector<256x128xf32>
    %68 = vector.extract_strided_slice %56 {offsets = [1, 0], sizes = [256, 128], strides = [1, 1]} : vector<288x128xf32> to vector<256x128xf32>
    %69 = vector.extract_strided_slice %57 {offsets = [2, 0], sizes = [1, 128], strides = [1, 1]} : vector<9x128xf32> to vector<1x128xf32>
    %70 = vector.broadcast %69 : vector<1x128xf32> to vector<256x128xf32>
    %71 = arith.mulf %68, %70 : vector<256x128xf32>
    %72 = arith.addf %67, %71 : vector<256x128xf32>
    %73 = vector.extract_strided_slice %50 {offsets = [15, 0], sizes = [256, 128], strides = [1, 1]} : vector<288x128xf32> to vector<256x128xf32>
    %74 = vector.extract_strided_slice %57 {offsets = [3, 0], sizes = [1, 128], strides = [1, 1]} : vector<9x128xf32> to vector<1x128xf32>
    %75 = vector.broadcast %74 : vector<1x128xf32> to vector<256x128xf32>
    %76 = arith.mulf %73, %75 : vector<256x128xf32>
    %77 = arith.addf %72, %76 : vector<256x128xf32>
    %78 = vector.extract_strided_slice %27 {offsets = [16, 0], sizes = [256, 128], strides = [1, 1]} : vector<288x128xf32> to vector<256x128xf32>
    %79 = vector.extract_strided_slice %57 {offsets = [4, 0], sizes = [1, 128], strides = [1, 1]} : vector<9x128xf32> to vector<1x128xf32>
    %80 = vector.broadcast %79 : vector<1x128xf32> to vector<256x128xf32>
    %81 = arith.mulf %78, %80 : vector<256x128xf32>
    %82 = arith.addf %77, %81 : vector<256x128xf32>
    %83 = vector.extract_strided_slice %56 {offsets = [17, 0], sizes = [256, 128], strides = [1, 1]} : vector<288x128xf32> to vector<256x128xf32>
    %84 = vector.extract_strided_slice %57 {offsets = [5, 0], sizes = [1, 128], strides = [1, 1]} : vector<9x128xf32> to vector<1x128xf32>
    %85 = vector.broadcast %84 : vector<1x128xf32> to vector<256x128xf32>
    %86 = arith.mulf %83, %85 : vector<256x128xf32>
    %87 = arith.addf %82, %86 : vector<256x128xf32>
    %88 = vector.extract_strided_slice %50 {offsets = [31, 0], sizes = [256, 128], strides = [1, 1]} : vector<288x128xf32> to vector<256x128xf32>
    %89 = vector.extract_strided_slice %57 {offsets = [6, 0], sizes = [1, 128], strides = [1, 1]} : vector<9x128xf32> to vector<1x128xf32>
    %90 = vector.broadcast %89 : vector<1x128xf32> to vector<256x128xf32>
    %91 = arith.mulf %88, %90 : vector<256x128xf32>
    %92 = arith.addf %87, %91 : vector<256x128xf32>
    %93 = vector.extract_strided_slice %27 {offsets = [32, 0], sizes = [256, 128], strides = [1, 1]} : vector<288x128xf32> to vector<256x128xf32>
    %94 = vector.extract_strided_slice %57 {offsets = [7, 0], sizes = [1, 128], strides = [1, 1]} : vector<9x128xf32> to vector<1x128xf32>
    %95 = vector.broadcast %94 : vector<1x128xf32> to vector<256x128xf32>
    %96 = arith.mulf %93, %95 : vector<256x128xf32>
    %97 = arith.addf %92, %96 : vector<256x128xf32>
    %98 = vector.extract_strided_slice %56 {offsets = [32, 0], sizes = [256, 128], strides = [1, 1]} : vector<288x128xf32> to vector<256x128xf32>
    %c255_i32 = arith.constant 255 : i32
    %99 = tpu.dynamic_rotate %98 by %c255_i32 dim 0 : vector<256x128xf32>, i32 -> vector<256x128xf32>
    %100 = vector.extract_strided_slice %57 {offsets = [8, 0], sizes = [1, 128], strides = [1, 1]} : vector<9x128xf32> to vector<1x128xf32>
    %101 = vector.broadcast %100 : vector<1x128xf32> to vector<256x128xf32>
    %102 = arith.mulf %99, %101 : vector<256x128xf32>
    %103 = arith.addf %97, %102 : vector<256x128xf32>
    %c0_36 = arith.constant 0 : index
    %c0_37 = arith.constant 0 : index
    %104 = vector.load %arg8[%c0_36, %c0_37] : memref<1x128xf32, #tpu.memory_space<vmem>>, vector<1x128xf32>
    %105 = vector.broadcast %104 : vector<1x128xf32> to vector<256x128xf32>
    %106 = arith.addf %103, %105 : vector<256x128xf32>
    %cst_38 = arith.constant 4.471500e-02 : f32
    %107 = vector.broadcast %cst_38 : f32 to vector<256x128xf32>
    %108 = arith.mulf %107, %106 : vector<256x128xf32>
    %109 = arith.mulf %108, %106 : vector<256x128xf32>
    %110 = arith.mulf %109, %106 : vector<256x128xf32>
    %111 = arith.addf %106, %110 : vector<256x128xf32>
    %cst_39 = arith.constant 0.797884583 : f32
    %112 = vector.broadcast %cst_39 : f32 to vector<256x128xf32>
    %113 = arith.mulf %112, %111 : vector<256x128xf32>
    %cst_40 = arith.constant 5.000000e-01 : f32
    %114 = vector.broadcast %cst_40 : f32 to vector<256x128xf32>
    %115 = arith.mulf %114, %106 : vector<256x128xf32>
    %116 = math.tanh %113 : vector<256x128xf32>
    %cst_41 = arith.constant 1.000000e+00 : f32
    %117 = vector.broadcast %cst_41 : f32 to vector<256x128xf32>
    %118 = arith.addf %117, %116 : vector<256x128xf32>
    %119 = arith.mulf %115, %118 : vector<256x128xf32>
    %120 = arith.truncf %119 : vector<256x128xf32> to vector<256x128xbf16>
    %c0_42 = arith.constant 0 : index
    %c0_43 = arith.constant 0 : index
    %121 = vector.load %arg9[%c0_42, %c0_43] : memref<128x128xbf16, #tpu.memory_space<vmem>>, vector<128x128xbf16>
    %cst_44 = arith.constant dense<0.000000e+00> : vector<256x128xf32>
    %122 = tpu.matmul %120, %121, %cst_44 {dimension_numbers = #tpu.dot_dimension_numbers<[1], [0], [0], [1], [0, 0, 1, 1], [], []>} : vector<256x128xbf16>, vector<128x128xbf16>, vector<256x128xf32> -> vector<256x128xf32>
    %c0_45 = arith.constant 0 : index
    %c0_46 = arith.constant 0 : index
    %123 = vector.load %arg10[%c0_45, %c0_46] : memref<1x128xf32, #tpu.memory_space<vmem>>, vector<1x128xf32>
    %124 = vector.broadcast %123 : vector<1x128xf32> to vector<256x128xf32>
    %125 = arith.addf %122, %124 : vector<256x128xf32>
    %c0_47 = arith.constant 0 : index
    %c0_48 = arith.constant 0 : index
    %c0_49 = arith.constant 0 : index
    %126 = vector.load %arg11[%c0_47, %c0_48, %c0_49] : memref<1x256x128xf32, #tpu.memory_space<vmem>>, vector<1x256x128xf32>
    %127 = vector.shape_cast %126 : vector<1x256x128xf32> to vector<256x128xf32>
    %128 = vector.shape_cast %125 : vector<256x128xf32> to vector<1x256x128xf32>
    tpu.vector_store %arg11[%c0_47, %c0_48, %c0_49], %128 {strides = array<i32>} : memref<1x256x128xf32, #tpu.memory_space<vmem>>, vector<1x256x128xf32>,
    return
  }
  func.func @transform_0(%arg0: i32, %arg1: i32) -> (i32, i32, i32, i32) {
    %c0_i32 = arith.constant 0 : i32
    %c0_i32_0 = arith.constant 0 : i32
    %c0_i32_1 = arith.constant 0 : i32
    return %arg0, %arg1, %c0_i32, %c0_i32_0 : i32, i32, i32, i32
  }
  func.func @transform_1(%arg0: i32, %arg1: i32) -> (i32, i32, i32, i32) {
    %c16_i32 = arith.constant 16 : i32
    %0 = arith.muli %arg1, %c16_i32 : i32
    %c1_i32 = arith.constant 1 : i32
    %1 = arith.subi %0, %c1_i32 : i32
    %c0_i32 = arith.constant 0 : i32
    %2 = arith.maxsi %1, %c0_i32 : i32
    %c0_i32_0 = arith.constant 0 : i32
    %c0_i32_1 = arith.constant 0 : i32
    %c0_i32_2 = arith.constant 0 : i32
    return %arg0, %2, %c0_i32_0, %c0_i32_1 : i32, i32, i32, i32
  }
  func.func @transform_2(%arg0: i32, %arg1: i32) -> (i32, i32, i32, i32) {
    %c16_i32 = arith.constant 16 : i32
    %0 = arith.muli %arg1, %c16_i32 : i32
    %c16_i32_0 = arith.constant 16 : i32
    %1 = arith.addi %0, %c16_i32_0 : i32
    %c15_i32 = arith.constant 15 : i32
    %2 = arith.minsi %1, %c15_i32 : i32
    %c0_i32 = arith.constant 0 : i32
    %c0_i32_1 = arith.constant 0 : i32
    %c0_i32_2 = arith.constant 0 : i32
    return %arg0, %2, %c0_i32, %c0_i32_1 : i32, i32, i32, i32
  }
  func.func @transform_3(%arg0: i32, %arg1: i32) -> (i32, i32) {
    %c0_i32 = arith.constant 0 : i32
    %c0_i32_0 = arith.constant 0 : i32
    %c0_i32_1 = arith.constant 0 : i32
    return %c0_i32, %c0_i32_0 : i32, i32
  }
  func.func @transform_4(%arg0: i32, %arg1: i32) -> (i32, i32) {
    %c0_i32 = arith.constant 0 : i32
    %c0_i32_0 = arith.constant 0 : i32
    %c0_i32_1 = arith.constant 0 : i32
    return %c0_i32, %c0_i32_0 : i32, i32
  }
  func.func @transform_5(%arg0: i32, %arg1: i32) -> (i32, i32) {
    %c0_i32 = arith.constant 0 : i32
    %c0_i32_0 = arith.constant 0 : i32
    %c0_i32_1 = arith.constant 0 : i32
    return %c0_i32, %c0_i32_0 : i32, i32
  }
  func.func @transform_6(%arg0: i32, %arg1: i32) -> (i32, i32) {
    %c0_i32 = arith.constant 0 : i32
    %c0_i32_0 = arith.constant 0 : i32
    %c0_i32_1 = arith.constant 0 : i32
    return %c0_i32, %c0_i32_0 : i32, i32
  }
  func.func @transform_7(%arg0: i32, %arg1: i32) -> (i32, i32) {
    %c0_i32 = arith.constant 0 : i32
    %c0_i32_0 = arith.constant 0 : i32
    %c0_i32_1 = arith.constant 0 : i32
    return %c0_i32, %c0_i32_0 : i32, i32
  }
  func.func @transform_8(%arg0: i32, %arg1: i32) -> (i32, i32) {
    %c0_i32 = arith.constant 0 : i32
    %c0_i32_0 = arith.constant 0 : i32
    %c0_i32_1 = arith.constant 0 : i32
    return %c0_i32, %c0_i32_0 : i32, i32
  }
  func.func @transform_9(%arg0: i32, %arg1: i32) -> (i32, i32, i32) {
    %c0_i32 = arith.constant 0 : i32
    %c0_i32_0 = arith.constant 0 : i32
    return %arg0, %arg1, %c0_i32 : i32, i32, i32
  }
}

</mosaic_0001>

<bundles_post_ra>
// kernel: tpu_custom_call.1
= control target key start
LH: loop header
LB: loop body
LE: loop exit
PB: predicated region body
PF: predicated region fallthrough
CT: control target
= control target key end

     0   :  { %s7974_s0 = inlined_call_operand.hbm [shape: bf16[2,16,16,128], index: 0, kind: input, shape index: {}]   ;;  %s7975_s1 = inlined_call_operand.hbm [shape: bf16[2,16,16,128], index: 1, kind: input, shape index: {}]   ;;  %s7976_s2 = inlined_call_operand.hbm [shape: bf16[2,16,16,128], index: 2, kind: input, shape index: {}]   ;;  %s7977_s3 = inlined_call_operand.hbm [shape: bf16[128,128], index: 3, kind: input, shape index: {}]   ;;  %s7978_s4 = inlined_call_operand.vmem [shape: f32[1,128], index: 4, kind: input, shape index: {}]   ;;  %s7979_s5 = inlined_call_operand.vmem [shape: f32[9,128], index: 5, kind: input, shape index: {}]   ;;  %s7980_s6 = inlined_call_operand.vmem [shape: f32[1,128], index: 6, kind: input, shape index: {}]   ;;  %s7981_s7 = inlined_call_operand.hbm [shape: bf16[128,128], index: 7, kind: input, shape index: {}]   ;;  %s7982_s8 = inlined_call_operand.vmem [shape: f32[1,128], index: 8, kind: input, shape index: {}]   ;;  %s7983_s9 = inlined_call_operand.hbm [shape: f32[2,256,128], index: 9, kind: output, shape index: {}]  }
   0x1   :  { %8181 = sst [smem:[#allocation179_spill]] %s7975_s1 }
   0x2   :  { %8182 = sst [smem:[#allocation180_spill]] %s7977_s3 }
   0x3   :  { %8183 = sst [smem:[#allocation181_spill]] %s7981_s7 }
   0x4   :  { %8184 = sst [smem:[#allocation182_spill]] %s7983_s9 }
   0x5   :  { %14 = vsyncpa [#allocation4], 0 }
   0x6   :  { %16 = vsyncpa [#allocation4 + $0x1], 0 }
   0x7   :  { %17 = vsyncpa [#allocation7], 0 }
   0x8   :  { %19 = vsyncpa [#allocation7 + $0x1], 0 }
   0x9   :  { %20 = vsyncpa [#allocation10], 0 }
   0xa   :  { %21 = vsyncpa [#allocation5], 0 }
   0xb   :  { %23 = vsyncpa [#allocation5 + $0x1], 0  ;;  %s4628_s30 = smov 0   ;;  %s4630_s10 = smov 0  }
   0xc   :  { %s4632_s11 = smov 0   ;;  %s4634_s12 = smov 0  }
   0xd   :  { %s4636_s13 = smov 0   ;;  %s4638_s14 = smov 0  }
   0xe LB: > { %8185 = sst [smem:[#allocation17_spill]] %s4544_s30  ;;  %s4659_s15 = sadd.s32 4294967295, %s4564_s14   ;;  %s4564_s14 = sphi %s4638_s14, %s29_s14   ;;  %s4560_s13 = sphi %s4636_s13, %s8968_s13   ;;  %s4556_s12 = sphi %s4634_s12, %s8967_s12   ;;  %s4552_s11 = sphi %s4632_s11, %s8966_s11   ;;  %s4548_s10 = sphi %s4630_s10, %s8970_s10   ;;  %s4544_s30 = sphi %s4628_s30, %s8969_s30  }
   0xf   : > { %8186 = sst [smem:[#allocation18_spill]] %s4552_s11  ;;  %s3831_s16 = sadd.s32 4294967294, %s4564_s14  }
  0x10   : > { %8187 = sst [smem:[#allocation19_spill]] %s4556_s12  ;;  %p57_p0 = scmp.ne.s32.totalorder %s4552_s11, %s4548_s10 }
  0x11   : > { %8188 = sst [smem:[#allocation20_spill]] %s4560_s13  ;;  %p58_p1 = scmp.eq.s32.totalorder %s4564_s14, 0 }
  0x12   : > { %8189 = sst [smem:[#allocation21_spill]] %s4564_s14  ;;  %p63_p2 = scmp.ne.s32.totalorder %s4548_s10, %s4544_s30 }
  0x13   : > { %p7986_p3 = scmp.eq.s32.totalorder %s4659_s15, 0  ;;  %p4668_p4 = por %p58_p1, %p57_p0 }
  0x14   : > { %p287_p5 = scmp.eq.s32.totalorder %s4659_s15, 1  ;;  %p293_p7 = scmp.eq.s32.totalorder %s3831_s16, 1 }
  0x15   : > { %p4675_p6 = por %p7986_p3, %p63_p2  ;;  %p3832_p9 = scmp.ge.s32.totalorder %s4564_s14, 1 }
  0x16   : > { %p4679_p8 = por %p287_p5, %p57_p0  ;;  %p4684_p10 = por %p293_p7, %p63_p2 }
  0x17   : > { %s8191_s18 = scalar_select %p4675_p6, 1, 0 }
  0x18   : > { %s8192_s19 = scalar_select %p4679_p8, 1, 0 }
  0x19   : > { %s8194_s20 = scalar_select %p4684_p10, 1, 0 }
  0x1a   : > { %8193 = sst [smem:[#allocation22_spill]] %s8192_s19  ;;  %p300_p11 = scmp.lt.s32.totalorder %s4564_s14, 3 }
  0x1b   : > { %8195 = sst [smem:[#allocation23_spill]] %s8194_s20  ;;  %s4566_s22 = smov [#allocation9]  }
  0x1c   : > { %p4689_p12 = pnand %p3832_p9, %p300_p11  ;;  %s312_s23 = sshll.u32 %s4566_s22, 4  ;;  %s4693_s23 = int_to_ptr.vmem [resolvable:$true] %s312_s23 }
  0x1d   : > { %s41_s25 = sadd.s32 1, %s4560_s13  ;;  %s8199_s3 = sld [smem:[#allocation180_spill]] }
  0x1e   : > { %s8196_s21 = scalar_select %p4689_p12, 1, 0 }
  0x1f   : > { %p4135_p13 = pneg %p4689_p12  ;;  %p4706_p2 = scmp.ge.s32.totalorder %s41_s25, 2 }
  0x21   : > { %p4700_p1 = pnand %p4135_p13, %p7986_p3 }
  0x23   : > { %s8197_s24 = scalar_select %p4700_p1, 1, 0 }
  0x24   : > { %s4328_s16 = scalar_lea.hbm %s8199_s3, 1024  ;;  %p8000_p7 = pneg %p4700_p1 }
  0x25   : > { %p4329_p5 = scmp.ne.s32.totalorder %s8199_s3, %s4328_s16  ;;  %p4335_p13 = scmp.lt.u32.totalorder %s4328_s16, %s8199_s3 }
  0x27   : > { %p4331_p9 = pnand %p8000_p7, %p4329_p5 }
  0x29   : > { %p4332_p11 = pneg %p4331_p9 }
  0x2b   : > { %p4337_p0 = pnand %p4335_p13, %p4332_p11 }
  0x2d   : > { %4340 = shalt.err (!%p4337_p0)
}
  0x2e   : > { %s4341_s28 = scalar_lea.vmem %s4693_s23, 1024  ;;  %p4349_p6 = scmp.lt.s32.totalorder %s4693_s23, %s4693_s23 }
  0x2f   : > { %p4342_p3 = scmp.ne.s32.totalorder %s4693_s23, %s4341_s28  ;;  %p4350_p5 = scmp.lt.s32.totalorder %s4341_s28, %s4341_s28 }
  0x31   : > { %p4344_p10 = pnand %p4342_p3, %p8000_p7  ;;  %p4351_p9 = por %p4350_p5, %p4349_p6 }
  0x33   : > { %p4345_p8 = pneg %p4344_p10 }
  0x35   : > { %p4352_p12 = pnand %p4351_p9, %p4345_p8 }
  0x37   : > { %4355 = shalt.err (!%p4352_p12)
}
  0x38   : > { %s7991_s30 = smov 64   ;;  %s7993_s20 = smov 4  }
  0x39   : > { %4138 = dma.hbm_to_vmem [thread:$0]  (!%p4700_p1), %s8199_s3, 1024, %s4693_s23, [#allocation10], %s7991_s30, %s7991_s30, %s7993_s20  }
  0x3a   : > { %s8972_s25 = smov (%p4706_p2, %s41_s25), 0  ;;  %p4158_p3 = scmp.lt.s32.totalorder %s4564_s14, 2 }
  0x3b   : > { %8200 = sst [smem:[#allocation24_spill]] %s8972_s25  ;;  %s4746_s16 = sand.u32 1, %s4552_s11  }
  0x3c   : > { %s45_s22 = ssub.s32 %s4560_s13, %s8972_s25  ;;  %s4751_s28 = sshll.u32 %s4560_s13, 11 }
  0x3d   : > { %p48_p6 = scmp.eq.s32.totalorder %s45_s22, 0  ;;  %p4755_p8 = pnand %p4158_p3, %p4668_p4 }
  0x3e   : > { %s375_s23 = sand.u32 1, %s4564_s14   ;;  %s3839_s27 = sshll.u32 %s4746_s16, 3 }
  0x3f   : > { %s8201_s9 = scalar_select %p4755_p8, 1, 0 }
  0x40   : > { %s8202_s26 = sadd.s32 1, %s4552_s11  ;;  %s8204_s1 = sld [smem:[#allocation179_spill]] }
  0x41   : > { %s4764_s29 = scalar_select %p48_p6, %s4552_s11, %s8202_s26  }
  0x42   : > { %s379_s17 = scalar_lea.vmem [#allocation6], %s3839_s27  ;;  %s4774_s25 = scalar_lea.vmem [#allocation8], %s3839_s27 }
  0x43   : > { %8203 = sst [smem:[#allocation25_spill]] %s4764_s29  ;;  %s392_s22 = sshll.u32 %s379_s17, 4  ;;  %s4772_s22 = int_to_ptr.vmem [resolvable:$true] %s392_s22 }
  0x44   : > { %s419_s13 = sshll.u32 %s4774_s25, 4  ;;  %s4777_s14 = scalar_lea.sflag [#allocation7], %s375_s23  ;;  %s4812_s13 = int_to_ptr.vmem [resolvable:$true] %s419_s13 }
  0x45   : > { %p4783_p10 = pneg %p4755_p8 }
  0x46   : > { %s4770_s3 = scalar_lea.hbm %s8204_s1, %s4751_s28  ;;  %s4361_s27 = scalar_lea.hbm %s8204_s1, 4096 }
  0x47   : > { %s4356_s26 = scalar_lea.hbm %s4770_s3, 128  ;;  %p4362_p2 = scmp.lt.u32.totalorder %s4770_s3, %s8204_s1 }
  0x48   : > { %p4357_p4 = scmp.ne.s32.totalorder %s4770_s3, %s4356_s26  ;;  %p4363_p11 = scmp.lt.u32.totalorder %s4361_s27, %s4356_s26 }
  0x49   : > { %s8205_s30 = scalar_select %p4783_p10, 1, 0 }
  0x4a   : > { %p4359_p12 = pnand %p4783_p10, %p4357_p4  ;;  %p4364_p13 = por %p4363_p11, %p4362_p2 }
  0x4b   : > { %p4365_p5 = scmp.lt.u32.totalorder %s4356_s26, %s4770_s3 }
  0x4c   : > { %p4360_p0 = pneg %p4359_p12 }
  0x4d   : > { %p4366_p9 = por %p4365_p5, %p4364_p13 }
  0x4f   : > { %p4367_p3 = pnand %p4366_p9, %p4360_p0 }
  0x51   : > { %4370 = shalt.err (!%p4367_p3)
}
  0x52   : > { %s4371_s23 = scalar_lea.vmem %s4772_s22, 128  ;;  %s4569_s20 = smov [#allocation6]  }
  0x53   : > { %p4372_p6 = scmp.ne.s32.totalorder %s4772_s22, %s4371_s23  ;;  %s4376_s17 = sshll.u32 %s4569_s20, 4  ;;  %s4377_s17 = int_to_ptr.vmem [resolvable:$false] %s4376_s17 }
  0x54   : > { %s4378_s11 = scalar_lea.vmem %s4377_s17, 256  ;;  %p4379_p7 = scmp.lt.s32.totalorder %s4772_s22, %s4377_s17 }
  0x55   : > { %p4374_p4 = pnand %p4372_p6, %p4783_p10  ;;  %p4380_p1 = scmp.lt.s32.totalorder %s4378_s11, %s4371_s23 }
  0x57   : > { %p4375_p12 = pneg %p4374_p4  ;;  %p4381_p2 = por %p4380_p1, %p4379_p7 }
  0x59   : > { %p4382_p11 = pnand %p4381_p2, %p4375_p12 }
  0x5b   : > { %4385 = shalt.err (!%p4382_p11)
}
  0x5c   : > { %s8206_s29 = smov 4   ;;  %s8207_s26 = smov 64  }
  0x5d   : > { %4148 = dma.hbm_to_vmem [thread:$0]  (!%p4755_p8), %s4770_s3, 128, %s4772_s22, %s4777_s14, %s8207_s26, %s8207_s26, %s8206_s29  }
  0x5e   : > { %s4570_s27 = smov [#allocation11]   ;;  %s3836_s20 = sshll.u32 %s4746_s16, 7 }
  0x5f   : > { %s334_s23 = sshll.u32 %s4570_s27, 4  ;;  %s8208_s7 = sld [smem:[#allocation181_spill]]  ;;  %s335_s23 = int_to_ptr.vmem [resolvable:$true] %s334_s23 }
  0x60   : > { %p8209_p7 = scmp.ne.s32.totalorder %s8197_s24, 0 }
  0x62   : > { %p8210_p0 = pneg %p8209_p7 }
  0x65   : > { %s4386_s1 = scalar_lea.hbm %s8208_s7, 1024 }
  0x66   : > { %p4387_p1 = scmp.ne.s32.totalorder %s8208_s7, %s4386_s1  ;;  %p4393_p9 = scmp.lt.u32.totalorder %s4386_s1, %s8208_s7 }
  0x68   : > { %p4389_p13 = pnand %p4387_p1, %p8210_p0 }
  0x6a   : > { %p4390_p5 = pneg %p4389_p13 }
  0x6c   : > { %p4395_p3 = pnand %p4393_p9, %p4390_p5 }
  0x6e   : > { %4398 = shalt.err (!%p4395_p3)
}
  0x6f   : > { %s4399_s22 = scalar_lea.vmem %s335_s23, 1024  ;;  %p8211_p4 = pmov %p8210_p0 }
  0x70   : > { %p4400_p6 = scmp.ne.s32.totalorder %s335_s23, %s4399_s22  ;;  %p4407_p11 = scmp.lt.s32.totalorder %s335_s23, %s335_s23 }
  0x71   : > { %p4408_p8 = scmp.lt.s32.totalorder %s4399_s22, %s4399_s22 }
  0x72   : > { %p4402_p12 = pnand %p4400_p6, %p8211_p4 }
  0x73   : > { %p4409_p10 = por %p4408_p8, %p4407_p11 }
  0x74   : > { %p4403_p2 = pneg %p4402_p12 }
  0x76   : > { %p4410_p0 = pnand %p4409_p10, %p4403_p2 }
  0x78   : > { %4413 = shalt.err (!%p4410_p0)
}
  0x79   : > { %4141 = dma.hbm_to_vmem [thread:$0]  (!%p8209_p7), %s8208_s7, 1024, %s335_s23, [#allocation10], %s8207_s26, %s8207_s26, %s8206_s29  }
  0x7a   : > { %s4842_s17 = scalar_lea.hbm %s7974_s0, %s4751_s28  ;;  %s355_s24 = scalar_lea.vmem [#allocation3], %s3836_s20 }
  0x7b   : > { %s365_s11 = sshll.u32 %s355_s24, 4  ;;  %s3898_s3 = sadd.s32 1920, %s4751_s28  ;;  %s4845_s11 = int_to_ptr.vmem [resolvable:$true] %s365_s11 }
  0x7c   : > { %s4850_s1 = scalar_lea.hbm %s7976_s2, %s3898_s3  ;;  %s352_s23 = scalar_lea.sflag [#allocation4], %s4746_s16 }
  0x7d   : > { %s4414_s12 = scalar_lea.hbm %s4842_s17, 2048  ;;  %p8212_p10 = scmp.ne.s32.totalorder %s8205_s30, 0 }
  0x7e   : > { %p4415_p8 = scmp.ne.s32.totalorder %s4842_s17, %s4414_s12  ;;  %s4419_s7 = scalar_lea.hbm %s7974_s0, 4096 }
  0x7f   : > { %p4420_p13 = scmp.lt.u32.totalorder %s4842_s17, %s7974_s0  ;;  %p4421_p5 = scmp.lt.u32.totalorder %s4419_s7, %s4414_s12 }
  0x80   : > { %p4417_p1 = pnand %p4415_p8, %p8212_p10  ;;  %p4423_p3 = scmp.lt.u32.totalorder %s4414_s12, %s4842_s17 }
  0x81   : > { %p4422_p9 = por %p4421_p5, %p4420_p13 }
  0x82   : > { %p4418_p7 = pneg %p4417_p1 }
  0x83   : > { %p4424_p6 = por %p4423_p3, %p4422_p9 }
  0x85   : > { %p4425_p4 = pnand %p4424_p6, %p4418_p7 }
  0x87   : > { %4428 = shalt.err (!%p4425_p4)
}
  0x88   : > { %s4429_s28 = scalar_lea.vmem %s4845_s11, 2048  ;;  %s4571_s3 = smov [#allocation3]  }
  0x89   : > { %p4430_p12 = scmp.ne.s32.totalorder %s4845_s11, %s4429_s28  ;;  %s4434_s25 = sshll.u32 %s4571_s3, 4  ;;  %s4435_s25 = int_to_ptr.vmem [resolvable:$false] %s4434_s25 }
  0x8a   : > { %s4436_s22 = scalar_lea.vmem %s4435_s25, 4096  ;;  %p4437_p0 = scmp.lt.s32.totalorder %s4845_s11, %s4435_s25 }
  0x8b   : > { %p4432_p2 = pnand %p4430_p12, %p8212_p10  ;;  %p4438_p8 = scmp.lt.s32.totalorder %s4436_s22, %s4429_s28 }
  0x8d   : > { %p4433_p11 = pneg %p4432_p2  ;;  %p4439_p1 = por %p4438_p8, %p4437_p0 }
  0x8f   : > { %p4440_p13 = pnand %p4439_p1, %p4433_p11 }
  0x91   : > { %4443 = shalt.err (!%p4440_p13)
}
  0x92   : > { %p8213_p7 = scmp.ne.s32.totalorder %s8201_s9, 0  ;;  %s4444_s7 = scalar_lea.hbm %s4850_s1, 128 }
  0x93   : > { %p4445_p5 = scmp.ne.s32.totalorder %s4850_s1, %s4444_s7  ;;  %s4449_s27 = scalar_lea.hbm %s7976_s2, 4096 }
  0x94   : > { %4145 = dma.hbm_to_vmem [thread:$0]  (!%p8213_p7), %s4842_s17, 2048, %s4845_s11, %s352_s23, %s8207_s26, %s8207_s26, %s8206_s29  }
  0x95   : > { %p4447_p9 = pnand %p4445_p5, %p8212_p10  ;;  %p4450_p6 = scmp.lt.u32.totalorder %s4850_s1, %s7976_s2 }
  0x96   : > { %p4451_p4 = scmp.lt.u32.totalorder %s4449_s27, %s4444_s7  ;;  %p4453_p2 = scmp.lt.u32.totalorder %s4444_s7, %s4850_s1 }
  0x97   : > { %p4448_p3 = pneg %p4447_p9 }
  0x98   : > { %p4452_p12 = por %p4451_p4, %p4450_p6 }
  0x9a   : > { %p4454_p11 = por %p4453_p2, %p4452_p12 }
  0x9c   : > { %p4455_p0 = pnand %p4454_p11, %p4448_p3 }
  0x9e   : > { %4458 = shalt.err (!%p4455_p0)
}
  0x9f   : > { %s4459_s16 = scalar_lea.vmem %s4812_s13, 128  ;;  %s4572_s17 = smov [#allocation8]  }
  0xa0   : > { %p4460_p8 = scmp.ne.s32.totalorder %s4812_s13, %s4459_s16  ;;  %s4464_s11 = sshll.u32 %s4572_s17, 4  ;;  %s4465_s11 = int_to_ptr.vmem [resolvable:$false] %s4464_s11 }
  0xa1   : > { %s4466_s23 = scalar_lea.vmem %s4465_s11, 256  ;;  %p4467_p5 = scmp.lt.s32.totalorder %s4812_s13, %s4465_s11 }
  0xa2   : > { %p4462_p1 = pnand %p4460_p8, %p8212_p10  ;;  %p4468_p9 = scmp.lt.s32.totalorder %s4466_s23, %s4459_s16 }
  0xa4   : > { %p4463_p13 = pneg %p4462_p1  ;;  %p4469_p6 = por %p4468_p9, %p4467_p5 }
  0xa6   : > { %p4470_p4 = pnand %p4469_p6, %p4463_p13 }
  0xa8   : > { %4473 = shalt.err (!%p4470_p4)
}
  0xa9   : > { %4151 = dma.hbm_to_vmem [thread:$0]  (!%p8213_p7), %s4850_s1, 128, %s4812_s13, %s4777_s14, %s8207_s26, %s8207_s26, %s8206_s29  }
  0xaa   : > { %p8214_p10 = scmp.ne.s32.totalorder %s8196_s21, 0 }
  0xac   : > { %431 = sbr.rel (%p8214_p10) target bundleno = 1074 (0x432), region = 56 }
  0xb3   : > { %s4907_s30 = sand.u32 1, %s4548_s10   ;;  %p8215_p3 = scmp.ne.s32.totalorder %s8191_s18, 0 }
  0xb4   : > { %s3846_s28 = sshll.u32 %s4907_s30, 7  ;;  %s434_s3 = scalar_lea.sflag [#allocation4], %s4907_s30 }
  0xb5   : > { %s4911_s25 = scalar_lea.vmem [#allocation3], %s3846_s28 }
  0xb6   : > { %4527 = dma.done.wait (%p8215_p3), %s434_s3, 2048  }
  0xb7   : > { %4529 = vsyncadd (%p8215_p3), %s434_s3, 4294965248  ;;  %s442_s9 = sand.u32 1, %s4659_s15   ;;  %s3847_s13 = sshll.u32 %s4907_s30, 3 }
  0xb8   : > { %s443_s14 = scalar_lea.sflag [#allocation7], %s442_s9  ;;  %s4919_s21 = scalar_lea.vmem [#allocation6], %s3847_s13 }
  0xb9   : > { %4531 = dma.done.wait (%p8215_p3), %s443_s14, 256  }
  0xba   : > { %4533 = vsyncadd (%p8215_p3), %s443_s14, 4294967040  ;;  %s4925_s29 = scalar_lea.vmem [#allocation8], %s3847_s13  ;;  %p8216_p7 = scmp.eq.s32.totalorder %s4659_s15, 0 }
  0xbc   : > { %4535 = dma.done.wait (%p8216_p7), [#allocation10], 2048   ;;  %p8217_p12 = pmov %p8216_p7 }
  0xbd   : > { %v4931_v0 = vld [vmem:[#allocation9] sm:$0xff]   ;;  %v4933_v1 = vld [vmem:[#allocation9 + $0x8] sm:$0xff]   ;;  %v4941_v2 = vld [vmem:[#allocation9 + $0x10] sm:$0xff]   ;;  %v8009_v24 = vmov 0.0   ;;  %v1057_v25 = vlaneseq  ;;  %vm2055_vm5 = vcmask 1046528   ;;  %vm2255_vm6 = vcmask 1040384  }
  0xbe   : > { %4537 = vsyncadd (%p8217_p12), [#allocation10], 4294965248  ;;  %3967 = vmatprep.subr.bf16.mxu0 %v4931_v0  ;;  %4103 = vmatprep.subr.bf16.mxu1 %v4931_v0  ;;  %v4945_v3 = vld [vmem:[#allocation9 + $0x18] sm:$0xff]   ;;  %v4226_v4 = vld [vmem:[%s4911_s25] sm:$0xff]   ;;  %v5001_v39 = vrot.slane %v8009_v24, 7  ;;  %s3851_s3 = sshll.u32 %s4907_s30, 8 }
  0xbf   : > { %3968 = vmatpush3.bf16.msra.mxu0 %v4931_v0  ;;  %4111 = vmatpush3.bf16.msra.mxu1 %v4931_v0  ;;  %v4227_v5 = vld [vmem:[%s4911_s25 + $0x40] sm:$0xff]   ;;  %v4223_v7 = vld [vmem:[#allocation9 + $0x28] sm:$0xff]   ;;  %v4224_v8 = vld [vmem:[#allocation9 + $0x30] sm:$0xff]   ;;  %v4984_v26 = vshrl.u32 %v1057_v25, 7  ;;  %s7854_s13 = scalar_lea.vmem [#allocation12], %s3851_s3  ;;  %s8956_s14 = sld [smem:[#allocation19_spill]] }
  0xc0   : > { %3969 = vmatprep.subr.bf16.mxu0 %v4933_v1  ;;  %4104 = vmatprep.subr.bf16.mxu1 %v4933_v1  ;;  %v4222_v6 = vld [vmem:[#allocation9 + $0x20] sm:$0xff]   ;;  %v4225_v9 = vld [vmem:[#allocation9 + $0x38] sm:$0xff]   ;;  %v4228_v10 = vld [vmem:[%s4911_s25 + $0x8] sm:$0xff]   ;;  %8218 = vst [vmem:[#allocation26_spill] sm:$0xff] %v5001_v39  ;;  %s8957_s15 = sld [smem:[#allocation22_spill]]  ;;  %s3660_s7 = scalar_lea.sflag [#allocation5], %s4907_s30 }
  0xc1   : > { %3983 = vmatprep.mubr.bf16.mxu0 %v4226_v4  ;;  %3999 = vmatprep.mubr.bf16.mxu1 %v4227_v5  ;;  %v4229_v11 = vld [vmem:[%s4911_s25 + $0x48] sm:$0xff]   ;;  %v4230_v12 = vld [vmem:[%s4911_s25 + $0x10] sm:$0xff]   ;;  %v4232_v14 = vld [vmem:[%s4911_s25 + $0x18] sm:$0xff]   ;;  %v1987_v27 = vsub.s32 2, %v4984_v26  ;;  %v1078_v29 = vadd.s32 160, %v4984_v26  ;;  %v1883_v30 = vsub.s32 0, %v4984_v26 }
  0xc2   : > { %v4231_v13 = vld [vmem:[%s4911_s25 + $0x50] sm:$0xff]   ;;  %v4233_v15 = vld [vmem:[%s4911_s25 + $0x58] sm:$0xff]   ;;  %v4234_v16 = vld [vmem:[%s4911_s25 + $0x20] sm:$0xff]   ;;  %v2853_v31 = vsub.s32 7, %v4984_v26  ;;  %v2187_v32 = vsub.s32 3, %v4984_v26  ;;  %v1062_v33 = vadd.s32 32, %v4984_v26 }
  0xc3   : > { %3970 = vmatpush3.bf16.msra.mxu0 %v4933_v1  ;;  %4112 = vmatpush3.bf16.msra.mxu1 %v4933_v1  ;;  %v4235_v17 = vld [vmem:[%s4911_s25 + $0x60] sm:$0xff]   ;;  %v4236_v18 = vld [vmem:[%s4911_s25 + $0x28] sm:$0xff]   ;;  %v4238_v20 = vld [vmem:[%s4911_s25 + $0x30] sm:$0xff]   ;;  %v1919_v34 = vsub.s32 1, %v4984_v26  ;;  %v1060_v36 = vadd.s32 16, %v4984_v26  ;;  %v1238_v37 = vand.u32 15, %v1078_v29 }
  0xc4   : > { %3971 = vmatprep.subr.bf16.mxu0 %v4941_v2  ;;  %4105 = vmatprep.subr.bf16.mxu1 %v4941_v2  ;;  %v4237_v19 = vld [vmem:[%s4911_s25 + $0x68] sm:$0xff]   ;;  %v4239_v21 = vld [vmem:[%s4911_s25 + $0x70] sm:$0xff]   ;;  %v4240_v22 = vld [vmem:[%s4911_s25 + $0x38] sm:$0xff]   ;;  %v2387_v38 = vsub.s32 4, %v4984_v26  ;;  %v2455_v43 = vsub.s32 5, %v4984_v26  ;;  %v2654_v44 = vsub.s32 6, %v4984_v26 }
  0xc5   : > { %v4241_v23 = vld [vmem:[%s4911_s25 + $0x78] sm:$0xff]   ;;  %v1814_v28 = vld [vmem:[%s7979_s5] sm:$0xff]  ;;  %v1126_v45 = vand.u32 15, %v1062_v33  ;;  %v1076_v48 = vadd.s32 144, %v4984_v26  ;;  %v1112_v49 = vand.u32 15, %v1060_v36  ;;  %v5021_v51 = vadd.s32 40, %v4984_v26 }
  0xc6   : > { %v4996_v35 = vrot.slane %v1814_v28, %v1987_v27  ;;  %v5003_v40 = vrot.slane %v1814_v28, %v1883_v30  ;;  %v5005_v41 = vrot.slane %v1814_v28, %v2853_v31  ;;  %v5007_v42 = vrot.slane %v1814_v28, %v2187_v32  ;;  %s8958_s1 = sld [smem:[#allocation182_spill]]  ;;  %p8959_p11 = scmp.ne.s32.totalorder %s8957_s15, 0 }
  0xc7   : > { %3972 = vmatpush3.bf16.msra.mxu0 %v4941_v2  ;;  %4113 = vmatpush3.bf16.msra.mxu1 %v4941_v2  ;;  %v5011_v46 = vrot.slane %v1814_v28, %v1919_v34  ;;  %v5024_v52 = vadd.s32 168, %v4984_v26  ;;  %v5027_v53 = vadd.s32 24, %v4984_v26  ;;  %v5035_v56 = vadd.s32 152, %v4984_v26  ;;  %s4575_s19 = smov [#allocation12]  }
  0xc8   : > { %3973 = vmatprep.subr.bf16.mxu0 %v4945_v3  ;;  %4106 = vmatprep.subr.bf16.mxu1 %v4945_v3  ;;  %8219 = vst [vmem:[#allocation27_spill] sm:$0xff] %v5005_v41  ;;  %v5014_v47 = vmul.f32 0.0, %v4996_v35  ;;  %v5018_v50 = vmul.f32 0.0, %v5007_v42  ;;  %v1886_v54 = vmul.f32 %v5003_v40, %v5001_v39  ;;  %vm5037_vm0 = vcmp.eq.s32.totalorder %v1238_v37, 0  ;;  %s4478_s27 = sshll.u32 %s4575_s19, 4  ;;  %s4479_s27 = int_to_ptr.vmem [resolvable:$false] %s4478_s27 }
  0xc9   : > { %v5032_v55 = vmul.f32 0.0, %v5011_v46  ;;  %v5041_v58 = vrot.slane %v1814_v28, %v2387_v38  ;;  %v5043_v59 = vrot.slane %v1814_v28, %v2455_v43  ;;  %v5045_v60 = vrot.slane %v1814_v28, %v2654_v44  ;;  %s4480_s20 = scalar_lea.vmem %s4479_s27, 8192 }
  0xca   : > { %8220 = vst [vmem:[#allocation28_spill] sm:$0xff] %v5014_v47  ;;  %vm5047_vm1 = vcmp.eq.s32.totalorder %v1126_v45, 0  ;;  %v1224_v63 = vand.u32 15, %v1076_v48  ;;  %v1245_v4 = vand.u32 15, %v5024_v52  ;;  %v5062_v5 = vadd.s32 64, %v4984_v26 }
  0xcb   : > { %3974 = vmatpush3.bf16.msra.mxu0 %v4945_v3  ;;  %4114 = vmatpush3.bf16.msra.mxu1 %v4945_v3  ;;  %8221 = vst [vmem:[#allocation29_spill] sm:$0xff] %v5032_v55  ;;  %vm5064_vm2 = vcmp.eq.s32.totalorder %v1112_v49, 0  ;;  %vm1848_vm3 = vcmp.lt.s32.totalorder %v4984_v26, 1  ;;  %v5114_v25 = vadd.s32 232, %v4984_v26  ;;  %v5118_v28 = vadd.s32 104, %v4984_v26 }
  0xcc   : > { %3975 = vmatprep.subr.bf16.mxu0 %v4222_v6  ;;  %4107 = vmatprep.subr.bf16.mxu1 %v4222_v6  ;;  %vm5102_vm4 = vcmp.eq.s32.totalorder %v1224_v63, 0  ;;  %v5121_v29 = vadd.s32 88, %v4984_v26  ;;  %v5124_v30 = vadd.s32 216, %v4984_v26  ;;  %vm5207_vm8 = vcmp.eq.s32.totalorder %v1245_v4, 15 }
  0xcd   : > { %8237 = vst [vmem:[#allocation37_spill] sm:$0xff] %v5114_v25  ;;  %8238 = vst [vmem:[#allocation38_spill] sm:$0xff] %v5118_v28 }
  0xce   : > { %8239 = vst [vmem:[#allocation39_spill] sm:$0xff] %v5121_v29  ;;  %8240 = vst [vmem:[#allocation40_spill] sm:$0xff] %v5124_v30  ;;  %v8271_v29 = vrot.slane %v5018_v50, 7 }
  0xcf   : > { %3976 = vmatpush3.bf16.msra.mxu0 %v4222_v6  ;;  %4115 = vmatpush3.bf16.msra.mxu1 %v4222_v6 }
  0xd0   : > { %3977 = vmatprep.subr.bf16.mxu0 %v4223_v7  ;;  %4108 = vmatprep.subr.bf16.mxu1 %v4223_v7 }
  0xd3   : > { %3978 = vmatpush3.bf16.msra.mxu0 %v4223_v7  ;;  %4116 = vmatpush3.bf16.msra.mxu1 %v4223_v7 }
  0xd4   : > { %3979 = vmatprep.subr.bf16.mxu0 %v4224_v8  ;;  %4109 = vmatprep.subr.bf16.mxu1 %v4224_v8 }
  0xd7   : > { %3980 = vmatpush3.bf16.msra.mxu0 %v4224_v8  ;;  %4117 = vmatpush3.bf16.msra.mxu1 %v4224_v8 }
  0xd8   : > { %3981 = vmatprep.subr.bf16.mxu0 %v4225_v9  ;;  %4110 = vmatprep.subr.bf16.mxu1 %v4225_v9 }
  0xdb   : > { %3982 = vmatpush3.bf16.msra.mxu0 %v4225_v9  ;;  %4118 = vmatpush3.bf16.msra.mxu1 %v4225_v9 }
  0xdc   : > { %4015 = vmatprep.subr.bf16.mxu1 %v8009_v24 }
  0xde   : > { %3984 = vmatmul.mubr.bf16.vlgmr.msra.gmra.mrb[0].mxu0 %v4228_v10  ;;  %4000 = vmatmul.mubr.bf16.vlgmr.msra.gmra.mrb[0].mxu1 %v4229_v11  ;;  %v5074_v10 = vadd.s32 176, %v4984_v26  ;;  %v5077_v11 = vadd.s32 72, %v4984_v26 }
  0xdf   : > { %3987 = vmatprep.mubr.bf16.mxu0 %v4230_v12  ;;  %4003 = vmatprep.mubr.bf16.mxu1 %v4231_v13  ;;  %v5080_v12 = vadd.s32 200, %v4984_v26  ;;  %v5083_v13 = vadd.s32 56, %v4984_v26 }
  0xe0   : > { %4016 = vmatpush3.bf16.msra.mxu1 %v4931_v0  ;;  %v5053_v0 = vadd.s32 192, %v4984_v26 }
  0xe1   : > { %4017 = vmatprep.subr.bf16.mxu1 %v8009_v24  ;;  %8228 = vst [vmem:[#allocation30_spill] sm:$0xff] %v5080_v12  ;;  %8229 = vst [vmem:[#allocation31_spill] sm:$0xff] %v5083_v13 }
  0xe4   : > { %4018 = vmatpush3.bf16.msra.mxu1 %v4933_v1  ;;  %v5056_v1 = vadd.s32 48, %v4984_v26 }
  0xe5   : > { %4019 = vmatprep.subr.bf16.mxu1 %v8009_v24 }
  0xe6   : > { %3988 = vmatmul.mubr.bf16.gmra.mrb[4].mxu0 %v4232_v14  ;;  %4004 = vmatmul.mubr.bf16.gmra.mrb[4].mxu1 %v4233_v15  ;;  %v5086_v14 = vadd.s32 184, %v4984_v26 }
  0xe7   : > { %3991 = vmatprep.mubr.bf16.mxu0 %v4234_v16  ;;  %4007 = vmatprep.mubr.bf16.mxu1 %v4235_v17  ;;  %v5091_v17 = vadd.s32 96, %v4984_v26 }
  0xe8   : > { %4020 = vmatpush3.bf16.msra.mxu1 %v4941_v2  ;;  %8230 = vst [vmem:[#allocation32_spill] sm:$0xff] %v5086_v14 }
  0xe9   : > { %4021 = vmatprep.subr.bf16.mxu1 %v8009_v24  ;;  %8231 = vst [vmem:[#allocation33_spill] sm:$0xff] %v5091_v17 }
  0xec   : > { %4022 = vmatpush3.bf16.msra.mxu1 %v4945_v3  ;;  %v1133_v3 = vand.u32 15, %v5021_v51 }
  0xed   : > { %4023 = vmatprep.subr.bf16.mxu1 %v8009_v24 }
  0xee   : > { %3992 = vmatmul.mubr.bf16.gmra.mrb[8].mxu0 %v4236_v18  ;;  %4008 = vmatmul.mubr.bf16.gmra.mrb[8].mxu1 %v4237_v19  ;;  %v5094_v18 = vadd.s32 224, %v4984_v26  ;;  %v5099_v19 = vld [vmem:[%s7978_s4] ss:$0 sm:$0xff]  ;;  %vm5186_vm7 = vcmp.eq.s32.totalorder %v1133_v3, 15 }
  0xef   : > { %3995 = vmatprep.mubr.bf16.mxu0 %v4238_v20  ;;  %4011 = vmatprep.mubr.bf16.mxu1 %v4239_v21 }
  0xf0   : > { %4024 = vmatpush3.bf16.msra.mxu1 %v4222_v6  ;;  %8232 = vst [vmem:[#allocation34_spill] sm:$0xff] %v5094_v18 }
  0xf1   : > { %4025 = vmatprep.subr.bf16.mxu1 %v8009_v24 }
  0xf4   : > { %4026 = vmatpush3.bf16.msra.mxu1 %v4223_v7 }
  0xf5   : > { %4027 = vmatprep.subr.bf16.mxu1 %v8009_v24 }
  0xf6   : > { %3996 = vmatmul.mubr.bf16.gmra.mrb[12].mxu0 %v4240_v22  ;;  %4012 = vmatmul.mubr.bf16.gmra.mrb[12].mxu1 %v4241_v23  ;;  %v5108_v22 = vadd.s32 80, %v4984_v26  ;;  %v5111_v23 = vadd.s32 208, %v4984_v26 }
  0xf8   : > { %4028 = vmatpush3.bf16.msra.mxu1 %v4224_v8  ;;  %v5070_v8 = vadd.f32 %v5032_v55, %v1886_v54  ;;  %8235 = vst [vmem:[#allocation35_spill] sm:$0xff] %v5108_v22  ;;  %8236 = vst [vmem:[#allocation36_spill] sm:$0xff] %v5111_v23  ;;  %v8269_v23 = vrot.slane %v5014_v47, 1 }
  0xf9   : > { %4029 = vmatprep.subr.bf16.mxu1 %v8009_v24 }
  0xfc   : > { %4030 = vmatpush3.bf16.msra.mxu1 %v4225_v9 }
  0xfd   : > { %4035 = vmatprep.subr.bf16.mxu1 %v8009_v24 }
 0x1b1   : > { %v3985_v31 = vpop.f32.mrb[0].mxu0  ;;  %v4001_v32 = vpop.f32.mrb[0].mxu1 }
 0x1b2   : > { %v5131_v38 = vadd.f32 %v3985_v31, %v5099_v19  ;;  %v5134_v43 = vadd.f32 %v4001_v32, %v5099_v19  ;;  %v752_v44 = vpop.f32.mrb[1].mxu0  ;;  %v816_v45 = vpop.f32.mrb[1].mxu1 }
 0x1b3   : > { %v5139_v51 = vadd.f32 %v5099_v19, %v752_v44  ;;  %v5141_v54 = vpop.f32.mrb[2].mxu0  ;;  %v5143_v63 = vpop.f32.mrb[2].mxu1  ;;  %v5174_v37 = vadd.f32 %v5099_v19, %v816_v45 }
 0x1b4   : > { %v5151_v48 = vsel %vm5037_vm0, 0.0, %v5134_v43  ;;  %v5153_v49 = vpop.f32.mrb[3].mxu0  ;;  %v5155_v44 = vpop.f32.mrb[3].mxu1  ;;  %v5163_v24 = vsel %vm5047_vm1, 0.0, %v5131_v38  ;;  %v5171_v32 = vmul.f32 %v5007_v42, %v5134_v43  ;;  %v5178_v34 = vmul.f32 %v5005_v41, %v5131_v38 }
 0x1b5   : > { %8241 = vst [vmem:[#allocation41_spill] sm:$0xff] %v5151_v48  ;;  %8242 = vst [vmem:[#allocation42_spill] sm:$0xff] %v5163_v24  ;;  %v5167_v57 = vmul.f32 %v4996_v35, %v5151_v48  ;;  %v5184_v31 = vmul.f32 %v5043_v59, %v5151_v48  ;;  %v5192_v45 = vmul.f32 %v5011_v46, %v5134_v43  ;;  %v1780_v16 = vsel %vm5064_vm2, 0.0, %v5139_v51 }
 0x1b6   : > { %8243 = vst [vmem:[#allocation43_spill] sm:$0xff] %v5174_v37  ;;  %8244 = vst [vmem:[#allocation44_spill] sm:$0xff] %v5178_v34  ;;  %v5196_v27 = vmul.f32 %v5041_v58, %v5134_v43  ;;  %v5200_v61 = vmul.f32 %v5045_v60, %v5134_v43  ;;  %v5215_v9 = vmul.f32 %v5005_v41, %v5134_v43  ;;  %v8015_v36 = vrot.slane %v5139_v51, 7 }
 0x1b7   : > { %8245 = vst [vmem:[#allocation45_spill] sm:$0xff] %v5184_v31  ;;  %8248 = vst [vmem:[#allocation46_spill] sm:$0xff] %v5192_v45  ;;  %v5220_v6 = vmul.f32 %v4996_v35, %v1780_v16  ;;  %v5224_v52 = vmul.f32 %v5007_v42, %v5139_v51  ;;  %v5227_v4 = vmul.f32 %v5043_v59, %v1780_v16  ;;  %v5244_v16 = vsel %vm5102_vm4, 0.0, %v5174_v37 }
 0x1b8   : > { %8249 = vst [vmem:[#allocation47_spill] sm:$0xff] %v5196_v27  ;;  %8250 = vst [vmem:[#allocation48_spill] sm:$0xff] %v5200_v61  ;;  %v1878_v2 = vsel %vm1848_vm3, %v5001_v39, %v8015_v36  ;;  %v1923_v7 = vmul.f32 %v5011_v46, %v5139_v51  ;;  %v5255_v36 = vmul.f32 %v5041_v58, %v5139_v51  ;;  %v8261_v48 = vand.u32 15, %v5027_v53 }
 0x1b9   : > { %8253 = vst [vmem:[#allocation49_spill] sm:$0xff] %v5215_v9  ;;  %v5229_v15 = vpop.f32.mrb[4].mxu0  ;;  %v5231_v21 = vpop.f32.mrb[4].mxu1  ;;  %8254 = vst [vmem:[#allocation50_spill] sm:$0xff] %v5244_v16  ;;  %v1887_v31 = vmul.f32 %v5003_v40, %v1878_v2  ;;  %v5264_v39 = vmul.f32 %v4996_v35, %v5244_v16  ;;  %v5268_v62 = vmul.f32 %v5007_v42, %v5174_v37  ;;  %v8270_v30 = vrot.slane %v5224_v52, 7 }
 0x1ba   : > { %v5246_v27 = vpop.f32.mrb[5].mxu0  ;;  %v5248_v9 = vpop.f32.mrb[5].mxu1  ;;  %8255 = vst [vmem:[#allocation51_spill] sm:$0xff] %v5255_v36  ;;  %v5272_v2 = vmul.f32 %v5043_v59, %v5244_v16  ;;  %vm5276_vm9 = vcmp.eq.s32.totalorder %v8261_v48, 15  ;;  %v5288_v25 = vmul.f32 %v5011_v46, %v5174_v37  ;;  %v5292_v28 = vmul.f32 %v5045_v60, %v5174_v37 }
 0x1bb   : > { %v5257_v34 = vpop.f32.mrb[6].mxu0  ;;  %v5259_v55 = vpop.f32.mrb[6].mxu1  ;;  %8258 = vst [vmem:[#allocation54_spill] sm:$0xff] %v5264_v39  ;;  %8259 = vst [vmem:[#allocation55_spill] sm:$0xff] %v5268_v62  ;;  %v5294_v53 = vadd.f32 %v1923_v7, %v1887_v31  ;;  %v8268_v48 = vrot.slane %v5220_v6, 1  ;;  %v5306_v18 = vsel %vm2255_vm6, %v8271_v29, %v8270_v30  ;;  %v5316_v47 = vadd.f32 %v5141_v54, %v5099_v19 }
 0x1bc   : > { %8256 = vst [vmem:[#allocation52_spill] sm:$0xff] %v5257_v34  ;;  %8257 = vst [vmem:[#allocation53_spill] sm:$0xff] %v5259_v55  ;;  %v5280_v36 = vpop.f32.mrb[7].mxu0  ;;  %v5282_v20 = vpop.f32.mrb[7].mxu1  ;;  %v5326_v30 = vmul.f32 %v5005_v41, %v5174_v37  ;;  %v5344_v29 = vadd.f32 %v5099_v19, %v5153_v49  ;;  %v1820_v7 = vrot.slane %v5131_v38, 7  ;;  %vm2951_vm4 = vcmp.lt.s32.totalorder %v4984_v26, 7 }
 0x1bd   : > { %8260 = vst [vmem:[#allocation56_spill] sm:$0xff] %v5272_v2  ;;  %8264 = vst [vmem:[#allocation57_spill] sm:$0xff] %v5280_v36  ;;  %v2060_v22 = vsel %vm2055_vm5, %v8269_v23, %v8268_v48  ;;  %v5320_v23 = vadd.f32 %v5143_v63, %v5099_v19  ;;  %v5332_v31 = vsel %vm5186_vm7, 0.0, %v5316_v47  ;;  %v5336_v54 = vmul.f32 %v4996_v35, %v5316_v47 }
 0x1be   : > { %8265 = vst [vmem:[#allocation58_spill] sm:$0xff] %v5282_v20  ;;  %8266 = vst [vmem:[#allocation59_spill] sm:$0xff] %v5288_v25  ;;  %v5310_v25 = vmul.f32 %v5041_v58, %v5174_v37  ;;  %v5340_v63 = vmul.f32 %v5043_v59, %v5316_v47  ;;  %v1926_v16 = vmul.f32 %v5011_v46, %v5316_v47 }
 0x1bf   : > { %8267 = vst [vmem:[#allocation60_spill] sm:$0xff] %v5292_v28  ;;  %8272 = vst [vmem:[#allocation61_spill] sm:$0xff] %v5306_v18  ;;  %v5353_v33 = vsel %vm5207_vm8, 0.0, %v5320_v23  ;;  %v5370_v18 = vmul.f32 %v4996_v35, %v5320_v23  ;;  %v1942_v2 = vmul.f32 %v5011_v46, %v5320_v23  ;;  %v5398_v14 = vmul.f32 %v5041_v58, %v5320_v23 }
 0x1c0   : > { %8273 = vst [vmem:[#allocation62_spill] sm:$0xff] %v5310_v25  ;;  %8274 = vst [vmem:[#allocation63_spill] sm:$0xff] %v5316_v47  ;;  %v1925_v25 = vmul.f32 %v5011_v46, %v5131_v38  ;;  %v5404_v17 = vmul.f32 %v5043_v59, %v5320_v23  ;;  %v1924_v55 = vmul.f32 %v5011_v46, %v5344_v29 }
 0x1c1   : > { %8275 = vst [vmem:[#allocation64_spill] sm:$0xff] %v5320_v23  ;;  %8276 = vst [vmem:[#allocation65_spill] sm:$0xff] %v5326_v30  ;;  %v5346_v50 = vpop.f32.mrb[8].mxu0  ;;  %v5348_v48 = vpop.f32.mrb[8].mxu1  ;;  %v1993_v30 = vmul.f32 %v4996_v35, %v5163_v24  ;;  %v2154_v61 = vadd.f32 %v2060_v22, %v5070_v8 }
 0x1c2   : > { %8277 = vst [vmem:[#allocation66_spill] sm:$0xff] %v5346_v50  ;;  %8278 = vst [vmem:[#allocation67_spill] sm:$0xff] %v5348_v48  ;;  %v5360_v28 = vpop.f32.mrb[9].mxu0  ;;  %v5362_v49 = vpop.f32.mrb[9].mxu1  ;;  %v8040_v50 = vrot.slane %v5370_v18, 1 }
 0x1c3   : > { %8279 = vst [vmem:[#allocation68_spill] sm:$0xff] %v5353_v33  ;;  %8280 = vst [vmem:[#allocation69_spill] sm:$0xff] %v5360_v28  ;;  %v5372_v62 = vpop.f32.mrb[10].mxu0  ;;  %v5374_v48 = vpop.f32.mrb[10].mxu1 }
 0x1c4   : > { %8281 = vst [vmem:[#allocation70_spill] sm:$0xff] %v5362_v49  ;;  %8282 = vst [vmem:[#allocation71_spill] sm:$0xff] %v5370_v18  ;;  %v5382_v49 = vmul.f32 %v5007_v42, %v5353_v33  ;;  %v5384_v3 = vpop.f32.mrb[11].mxu0  ;;  %v5386_v20 = vpop.f32.mrb[11].mxu1 }
 0x1c5   : > { %8283 = vst [vmem:[#allocation72_spill] sm:$0xff] %v5372_v62  ;;  %8284 = vst [vmem:[#allocation73_spill] sm:$0xff] %v5374_v48  ;;  %v8287_v62 = vrot.slane %v5353_v33, 7  ;;  %v8288_v48 = vrot.slane %v5134_v43, 7 }
 0x1c6   : > { %8285 = vst [vmem:[#allocation74_spill] sm:$0xff] %v5384_v3  ;;  %8286 = vst [vmem:[#allocation75_spill] sm:$0xff] %v5386_v20  ;;  %v5408_v20 = vmul.f32 %v5045_v60, %v5353_v33  ;;  %v8294_v3 = vrot.slane %v5332_v31, 7  ;;  %v2192_v33 = vmul.f32 %v5007_v42, %v5131_v38 }
 0x1c7   : > { %v1859_v28 = vsel %vm1848_vm3, %v8288_v48, %v8287_v62  ;;  %8289 = vst [vmem:[#allocation76_spill] sm:$0xff] %v5398_v14  ;;  %8290 = vst [vmem:[#allocation77_spill] sm:$0xff] %v5404_v17  ;;  %v8292_v62 = vrot.slane %v5167_v57, 1 }
 0x1c8   : > { %v1906_v36 = vmul.f32 %v5003_v40, %v1859_v28  ;;  %8291 = vst [vmem:[#allocation78_spill] sm:$0xff] %v5408_v20  ;;  %v1637_v28 = vsel %vm5276_vm9, 0.0, %v5344_v29  ;;  %v1875_v14 = vsel %vm1848_vm3, %v1820_v7, %v8294_v3 }
 0x1c9   : > { %v5415_v48 = vsel %vm2055_vm5, %v8292_v62, %v8040_v50  ;;  %v1819_v18 = vrot.slane %v1637_v28, 7  ;;  %v1890_v13 = vmul.f32 %v5003_v40, %v1875_v14  ;;  %v1992_v62 = vmul.f32 %v4996_v35, %v5344_v29  ;;  %v5435_v3 = vpop.f32.mrb[12].mxu0  ;;  %v5437_v45 = vpop.f32.mrb[12].mxu1 }
 0x1ca   : > { %8293 = vst [vmem:[#allocation79_spill] sm:$0xff] %v5415_v48  ;;  %v5426_v34 = vadd.f32 %v1942_v2, %v1906_v36  ;;  %v2063_v50 = vrot.slane %v1993_v30, 1  ;;  %v2191_v48 = vmul.f32 %v5007_v42, %v1637_v28  ;;  %8296 = vst [vmem:[#allocation81_spill] sm:$0xff] %v5435_v3  ;;  %v8298_v14 = vrot.slane %v5139_v51, 7  ;;  %v5447_v22 = vpop.f32.mrb[13].mxu0 }
 0x1cb   : > { %8297 = vst [vmem:[#allocation82_spill] sm:$0xff] %v5437_v45  ;;  %v1876_v36 = vsel %vm1848_vm3, %v1819_v18, %v1820_v7  ;;  %v5445_v30 = vadd.f32 %v1926_v16, %v1890_v13  ;;  %v2061_v8 = vrot.slane %v1992_v62, 1  ;;  %8300 = vst [vmem:[#allocation84_spill] sm:$0xff] %v5447_v22  ;;  %v8302_v45 = vrot.slane %v5336_v54, 1 }
 0x1cc   : > { %8295 = vst [vmem:[#allocation80_spill] sm:$0xff] %v5426_v34  ;;  %v1877_v2 = vsel %vm1848_vm3, %v8298_v14, %v1819_v18  ;;  %v5449_v34 = vpop.f32.mrb[13].mxu1  ;;  %v1889_v3 = vmul.f32 %v5003_v40, %v1876_v36  ;;  %v5458_v51 = vmul.f32 %v5007_v42, %v5332_v31  ;;  %v5460_v18 = vpop.f32.mrb[14].mxu0  ;;  %v8304_v13 = vrot.slane %v5220_v6, 1 }
 0x1cd   : > { %8299 = vst [vmem:[#allocation83_spill] sm:$0xff] %v5445_v30  ;;  %8301 = vst [vmem:[#allocation85_spill] sm:$0xff] %v5449_v34  ;;  %v1888_v12 = vmul.f32 %v5003_v40, %v1877_v2  ;;  %v2066_v7 = vsel %vm2055_vm5, %v2063_v50, %v8302_v45  ;;  %v2064_v62 = vsel %vm2055_vm5, %v2061_v8, %v2063_v50  ;;  %v2259_v14 = vrot.slane %v2191_v48, 7 }
 0x1ce   : > { %8303 = vst [vmem:[#allocation86_spill] sm:$0xff] %v5460_v18  ;;  %v2062_v16 = vsel %vm2055_vm5, %v8304_v13, %v2061_v8  ;;  %v2261_v2 = vrot.slane %v2192_v33, 7  ;;  %v8305_v36 = vand.u32 15, %v5035_v56  ;;  %v1957_v22 = vadd.f32 %v1925_v25, %v1889_v3 }
 0x1cf   : > { %v1956_v45 = vadd.f32 %v1924_v55, %v1888_v12  ;;  %v2155_v30 = vadd.f32 %v2062_v16, %v5294_v53  ;;  %v8045_v18 = vrot.slane %v5458_v51, 7  ;;  %v8308_v6 = vrot.slane %v5224_v52, 7 }
 0x1d0   : > { %vm5468_vm10 = vcmp.eq.s32.totalorder %v8305_v36, 15  ;;  %v2262_v50 = vsel %vm2255_vm6, %v2259_v14, %v2261_v2  ;;  %v2390_v33 = vmul.f32 %v5041_v58, %v5344_v29  ;;  %v2391_v56 = vmul.f32 %v5041_v58, %v5131_v38 }
 0x1d1   : > { %v2260_v13 = vsel %vm2255_vm6, %v8308_v6, %v2259_v14  ;;  %v2156_v48 = vadd.f32 %v2064_v62, %v1956_v45  ;;  %v5482_v8 = vadd.f32 %v2066_v7, %v1957_v22  ;;  %v2264_v55 = vsel %vm2255_vm6, %v2261_v2, %v8045_v18 }
 0x1d2   : > { %v2354_v12 = vadd.f32 %v2260_v13, %v2154_v61  ;;  %v2355_v25 = vadd.f32 %v2262_v50, %v2155_v30  ;;  %v2392_v52 = vmul.f32 %v5041_v58, %v5316_v47  ;;  %v2458_v53 = vmul.f32 %v5043_v59, %v5344_v29 }
 0x1d3   : > { %v2459_v3 = vmul.f32 %v5043_v59, %v5163_v24  ;;  %v2356_v16 = vadd.f32 %v2264_v55, %v2156_v48  ;;  %v2656_v22 = vmul.f32 %v5045_v60, %v1637_v28  ;;  %v2657_v7 = vmul.f32 %v5045_v60, %v5131_v38 }
 0x1d4   : > { %v2422_v14 = vadd.f32 %v2390_v33, %v2354_v12  ;;  %v8309_v62 = vand.u32 15, %v5062_v5  ;;  %v2423_v30 = vadd.f32 %v2391_v56, %v2355_v25  ;;  %v2524_v2 = vrot.slane %v2458_v53, 1 }
 0x1d5   : > { %v2526_v36 = vrot.slane %v2459_v3, 1  ;;  %v5504_v29 = vmul.f32 %v5045_v60, %v5332_v31  ;;  %v5506_v45 = vadd.f32 %v2392_v52, %v2356_v16  ;;  %v2722_v6 = vrot.slane %v2656_v22, 7 }
 0x1d6   : > { %vm5498_vm11 = vcmp.eq.s32.totalorder %v8309_v62, 0  ;;  %v2723_v28 = vrot.slane %v2657_v7, 7  ;;  %v2856_v38 = vmul.f32 %v5005_v41, %v5316_v47  ;;  %v8312_v5 = vrot.slane %v5227_v4, 1 }
 0x1d7   : > { %v2527_v50 = vsel %vm2055_vm5, %v2524_v2, %v2526_v36  ;;  %v8314_v33 = vrot.slane %v5340_v63, 1  ;;  %v8044_v48 = vrot.slane %v5504_v29, 7  ;;  %v5527_v4 = vadd.f32 %v5099_v19, %v5155_v44 }
 0x1d8   : > { %v5513_v13 = vsel %vm2055_vm5, %v8312_v5, %v2524_v2  ;;  %v2621_v55 = vadd.f32 %v2527_v50, %v2422_v14  ;;  %v5523_v25 = vsel %vm2255_vm6, %v2722_v6, %v2723_v28  ;;  %v8317_v52 = vand.u32 15, %v5053_v0 }
 0x1d9   : > { %8313 = vst [vmem:[#allocation87_spill] sm:$0xff] %v5513_v13  ;;  %v2529_v56 = vsel %vm2055_vm5, %v2526_v36, %v8314_v33  ;;  %8315 = vst [vmem:[#allocation88_spill] sm:$0xff] %v5523_v25  ;;  %v5537_v3 = vmul.f32 %v5005_v41, %v5320_v23  ;;  %v2726_v14 = vsel %vm2255_vm6, %v2723_v28, %v8044_v48  ;;  %v8321_v22 = vrot.slane %v5382_v49, 7 }
 0x1da   : > { %v5520_v12 = vadd.f32 %v2529_v56, %v2423_v30  ;;  %8316 = vst [vmem:[#allocation89_spill] sm:$0xff] %v5527_v4  ;;  %vm5531_vm12 = vcmp.eq.s32.totalorder %v8317_v52, 0  ;;  %v8322_v44 = vrot.slane %v5171_v32, 7  ;;  %v2820_v62 = vadd.f32 %v2726_v14, %v2621_v55 }
 0x1db   : > { %8320 = vst [vmem:[#allocation90_spill] sm:$0xff] %v5537_v3  ;;  %v1653_v30 = vsel %vm5468_vm10, 0.0, %v5527_v4  ;;  %v2008_v2 = vmul.f32 %v4996_v35, %v5527_v4  ;;  %v5560_v5 = vadd.f32 %v5229_v15, %v5099_v19  ;;  %v5566_v34 = vmul.f32 %v5043_v59, %v5527_v4 }
 0x1dc   : > { %v2296_v0 = vsel %vm2255_vm6, %v8322_v44, %v8321_v22  ;;  %v1835_v6 = vrot.slane %v1653_v30, 7  ;;  %v5556_v28 = vmul.f32 %v5007_v42, %v1653_v30  ;;  %v5562_v50 = vadd.f32 %v2856_v38, %v2820_v62 }
 0x1dd   : > { %v2093_v33 = vrot.slane %v2008_v2, 1  ;;  %8325 = vst [vmem:[#allocation93_spill] sm:$0xff] %v5566_v34  ;;  %v5570_v56 = vadd.f32 %v5231_v21, %v5099_v19  ;;  %v8326_v55 = vrot.slane %v5134_v43, 7  ;;  %v8327_v14 = vrot.slane %v5174_v37, 7 }
 0x1de   : > { %8323 = vst [vmem:[#allocation91_spill] sm:$0xff] %v5556_v28  ;;  %8324 = vst [vmem:[#allocation92_spill] sm:$0xff] %v5562_v50  ;;  %v8043_v38 = vrot.slane %v5556_v28, 7  ;;  %v5582_v22 = vmul.f32 %v5045_v60, %v1653_v30  ;;  %v8329_v44 = vand.u32 15, %v5056_v1  ;;  %v1940_v62 = vmul.f32 %v5011_v46, %v5527_v4 }
 0x1df   : > { %v1860_v52 = vsel %vm1848_vm3, %v1835_v6, %v8326_v55  ;;  %v1861_v15 = vsel %vm1848_vm3, %v8327_v14, %v1835_v6  ;;  %v8332_v2 = vrot.slane %v5264_v39, 1  ;;  %v8334_v55 = vrot.slane %v5167_v57, 1  ;;  %v5601_v14 = vpop.f32.mrb[14].mxu1 }
 0x1e0   : > { %8328 = vst [vmem:[#allocation94_spill] sm:$0xff] %v5582_v22  ;;  %vm5586_vm13 = vcmp.eq.s32.totalorder %v8329_v44, 0  ;;  %v1904_v43 = vmul.f32 %v5003_v40, %v1861_v15  ;;  %8335 = vst [vmem:[#allocation96_spill] sm:$0xff] %v5601_v14  ;;  %v8336_v1 = vrot.slane %v5171_v32, 7  ;;  %v5612_v44 = vmul.f32 %v5041_v58, %v5527_v4 }
 0x1e1   : > { %v5596_v6 = vsel %vm2055_vm5, %v8332_v2, %v2093_v33  ;;  %v2096_v30 = vsel %vm2055_vm5, %v2093_v33, %v8334_v55  ;;  %v5616_v2 = vmul.f32 %v5005_v41, %v5527_v4  ;;  %v5621_v57 = vsel %vm5498_vm11, 0.0, %v5560_v5  ;;  %v5623_v33 = vpop.f32.mrb[15].mxu0 }
 0x1e2   : > { %8333 = vst [vmem:[#allocation95_spill] sm:$0xff] %v5596_v6  ;;  %v5608_v15 = vsel %vm2255_vm6, %v8043_v38, %v8336_v1  ;;  %8338 = vst [vmem:[#allocation98_spill] sm:$0xff] %v5612_v44  ;;  %v1905_v32 = vmul.f32 %v5003_v40, %v1860_v52  ;;  %v1972_v55 = vadd.f32 %v1940_v62, %v1904_v43  ;;  %v8344_v43 = vand.u32 15, %v5074_v10  ;;  %v5650_v1 = vpop.f32.mrb[15].mxu1 }
 0x1e3   : > { %8337 = vst [vmem:[#allocation97_spill] sm:$0xff] %v5608_v15  ;;  %8339 = vst [vmem:[#allocation99_spill] sm:$0xff] %v5616_v2  ;;  %v5629_v7 = vmul.f32 %v4996_v35, %v5621_v57  ;;  %v5634_v36 = vmul.f32 %v5007_v42, %v5560_v5  ;;  %v5638_v61 = vmul.f32 %v5043_v59, %v5621_v57  ;;  %v8360_v34 = vrot.slane %v5332_v31, 7 }
 0x1e4   : > { %8340 = vst [vmem:[#allocation100_spill] sm:$0xff] %v5621_v57  ;;  %8341 = vst [vmem:[#allocation101_spill] sm:$0xff] %v5623_v33  ;;  %v5642_v52 = vmul.f32 %v5045_v60, %v5560_v5  ;;  %vm5646_vm14 = vcmp.eq.s32.totalorder %v8344_v43, 0  ;;  %v2172_v16 = vadd.f32 %v2096_v30, %v1972_v55  ;;  %v5656_v18 = vmul.f32 %v5011_v46, %v5560_v5 }
 0x1e5   : > { %8342 = vst [vmem:[#allocation102_spill] sm:$0xff] %v5638_v61  ;;  %8347 = vst [vmem:[#allocation104_spill] sm:$0xff] %v5650_v1  ;;  %v5661_v10 = vmul.f32 %v5041_v58, %v5560_v5  ;;  %v5665_v43 = vmul.f32 %v5005_v41, %v5560_v5  ;;  %v5670_v30 = vsel %vm5531_vm12, 0.0, %v5570_v56  ;;  %v5685_v53 = vmul.f32 %v5007_v42, %v5570_v56 }
 0x1e6   : > { %8343 = vst [vmem:[#allocation103_spill] sm:$0xff] %v5642_v52  ;;  %8350 = vst [vmem:[#allocation107_spill] sm:$0xff] %v5670_v30  ;;  %v5672_v55 = vadd.f32 %v2296_v0, %v2172_v16  ;;  %v5678_v15 = vmul.f32 %v4996_v35, %v5670_v30  ;;  %v5689_v16 = vmul.f32 %v5011_v46, %v5570_v56  ;;  %v8413_v37 = vrot.slane %v5634_v36, 7 }
 0x1e7   : > { %8348 = vst [vmem:[#allocation105_spill] sm:$0xff] %v5661_v10  ;;  %8349 = vst [vmem:[#allocation106_spill] sm:$0xff] %v5665_v43  ;;  %v5693_v0 = vmul.f32 %v5041_v58, %v5570_v56  ;;  %v5697_v48 = vmul.f32 %v5043_v59, %v5670_v30  ;;  %v5701_v6 = vadd.f32 %v5099_v19, %v5246_v27  ;;  %v8364_v10 = vld [vmem:[#allocation30_spill] sm:$0xff]  ;;  %v8415_v14 = vrot.slane %v5560_v5, 7 }
 0x1e8   : > { %8351 = vst [vmem:[#allocation108_spill] sm:$0xff] %v5672_v55  ;;  %v5706_v38 = vmul.f32 %v5045_v60, %v5570_v56  ;;  %v5710_v3 = vmul.f32 %v5005_v41, %v5570_v56  ;;  %v5725_v23 = vadd.f32 %v5099_v19, %v5248_v9  ;;  %v8365_v9 = vand.u32 15, %v8364_v10 }
 0x1e9   : > { %8352 = vst [vmem:[#allocation109_spill] sm:$0xff] %v5693_v0  ;;  %8353 = vst [vmem:[#allocation110_spill] sm:$0xff] %v5697_v48  ;;  %v5716_v55 = vsel %vm5586_vm13, 0.0, %v5701_v6  ;;  %v5721_v17 = vmul.f32 %v5007_v42, %v5701_v6  ;;  %v1927_v0 = vmul.f32 %v5011_v46, %v5701_v6  ;;  %v5736_v27 = vmul.f32 %v5045_v60, %v5701_v6 }
 0x1ea   : > { %8354 = vst [vmem:[#allocation111_spill] sm:$0xff] %v5706_v38  ;;  %8355 = vst [vmem:[#allocation112_spill] sm:$0xff] %v5710_v3  ;;  %v5732_v21 = vmul.f32 %v4996_v35, %v5716_v55  ;;  %v8356_v3 = vand.u32 15, %v5077_v11  ;;  %v8359_v20 = vrot.slane %v5701_v6, 7  ;;  %v2393_v4 = vmul.f32 %v5041_v58, %v5701_v6  ;;  %v4242_v38 = vld [vmem:[#allocation11] sm:$0xff]  }
 0x1eb   : > { %v8062_v2 = vrot.slane %v5721_v17, 7  ;;  %v2857_v48 = vmul.f32 %v5005_v41, %v5701_v6  ;;  %vm5776_vm0 = vcmp.eq.s32.totalorder %v8365_v9, 15  ;;  %v8371_v10 = vrot.slane %v5725_v23, 7  ;;  %v8372_v9 = vld [vmem:[#allocation68_spill] sm:$0xff]  ;;  %4055 = vmatprep.subr.bf16.mxu0 %v4242_v38 }
 0x1ec   : > { %vm5740_vm15 = vcmp.eq.s32.totalorder %v8356_v3, 15  ;;  %v1874_v44 = vsel %vm1848_vm3, %v8360_v34, %v8359_v20  ;;  %v5757_v3 = vmul.f32 %v5043_v59, %v5716_v55  ;;  %v8362_v20 = vrot.slane %v5458_v51, 7  ;;  %4056 = vmatpush3.bf16.msra.mxu0 %v4242_v38  ;;  %v4244_v38 = vld [vmem:[#allocation11 + $0x10] sm:$0xff]  }
 0x1ed   : > { %v1891_v11 = vmul.f32 %v5003_v40, %v1874_v44  ;;  %v5771_v44 = vsel %vm5646_vm14, 0.0, %v5725_v23  ;;  %v8368_v51 = vrot.slane %v5736_v27, 7  ;;  %v8373_v52 = vrot.slane %v8372_v9, 7 }
 0x1ee   : > { %8361 = vst [vmem:[#allocation113_spill] sm:$0xff] %v5757_v3  ;;  %v2266_v34 = vsel %vm2255_vm6, %v8362_v20, %v8062_v2  ;;  %8363 = vst [vmem:[#allocation114_spill] sm:$0xff] %v5771_v44  ;;  %v8369_v20 = vrot.slane %v5504_v29, 7  ;;  %v8370_v2 = vld [vmem:[#allocation46_spill] sm:$0xff]  ;;  %v5802_v29 = vmul.f32 %v5007_v42, %v5725_v23  ;;  %v5824_v9 = vmul.f32 %v5045_v60, %v5725_v23 }
 0x1ef   : > { %v5780_v31 = vadd.f32 %v1927_v0, %v1891_v11  ;;  %v2357_v25 = vadd.f32 %v2266_v34, %v5482_v8  ;;  %v1973_v13 = vadd.f32 %v8370_v2, %v1905_v32  ;;  %v1858_v0 = vsel %vm1848_vm3, %v8373_v52, %v8371_v10  ;;  %v8375_v32 = vld [vmem:[#allocation79_spill] sm:$0xff] }
 0x1f0   : > { %v2728_v62 = vsel %vm2255_vm6, %v8369_v20, %v8368_v51  ;;  %v5798_v8 = vmul.f32 %v4996_v35, %v5771_v44  ;;  %v1907_v2 = vmul.f32 %v5003_v40, %v1858_v0  ;;  %v8065_v20 = vrot.slane %v5802_v29, 7  ;;  %8378 = vst [vmem:[#allocation79_spill] sm:$0xff] %v5824_v9  ;;  %v8396_v9 = vld [vmem:[#allocation57_spill] sm:$0xff] }
 0x1f1   : > { %v2821_v22 = vadd.f32 %v2728_v62, %v5520_v12  ;;  %v5804_v11 = vadd.f32 %v2393_v4, %v2357_v25  ;;  %v1943_v12 = vmul.f32 %v5011_v46, %v5725_v23  ;;  %v2173_v34 = vadd.f32 %v8375_v32, %v1973_v13  ;;  %v8379_v13 = vld [vmem:[#allocation31_spill] sm:$0xff] }
 0x1f2   : > { %v5816_v62 = vmul.f32 %v5043_v59, %v5771_v44  ;;  %v8380_v0 = vand.u32 15, %v8379_v13  ;;  %v8383_v32 = vrot.slane %v5382_v49, 7  ;;  %v8389_v49 = vrot.slane %v5732_v21, 1 }
 0x1f3   : > { %8374 = vst [vmem:[#allocation30_spill] sm:$0xff] %v5804_v11  ;;  %v5811_v52 = vadd.f32 %v2857_v48, %v2821_v22  ;;  %v5820_v10 = vadd.f32 %v1943_v12, %v1907_v2  ;;  %v2409_v2 = vmul.f32 %v5041_v58, %v5725_v23  ;;  %v8384_v12 = vld [vmem:[#allocation52_spill] sm:$0xff]  ;;  %v8387_v22 = vld [vmem:[#allocation53_spill] sm:$0xff]  ;;  %v4243_v11 = vld [vmem:[#allocation11 + $0x8] sm:$0xff]  }
 0x1f4   : > { %8377 = vst [vmem:[#allocation68_spill] sm:$0xff] %v5816_v62  ;;  %vm5828_vm1 = vcmp.eq.s32.totalorder %v8380_v0, 15  ;;  %v2298_v51 = vsel %vm2255_vm6, %v8383_v32, %v8065_v20  ;;  %v5842_v4 = vadd.f32 %v8384_v12, %v5099_v19  ;;  %v5846_v0 = vmul.f32 %v5005_v41, %v5725_v23  ;;  %4057 = vmatprep.subr.bf16.mxu0 %v4243_v11 }
 0x1f5   : > { %8376 = vst [vmem:[#allocation46_spill] sm:$0xff] %v5811_v52  ;;  %v2373_v13 = vadd.f32 %v2298_v51, %v2173_v34  ;;  %v5850_v25 = vadd.f32 %v8387_v22, %v5099_v19  ;;  %v8390_v32 = vrot.slane %v5336_v54, 1  ;;  %v5904_v62 = vadd.f32 %v5099_v19, %v8396_v9  ;;  %4058 = vmatpush3.bf16.msra.mxu0 %v4243_v11 }
 0x1f6   : > { %8385 = vst [vmem:[#allocation31_spill] sm:$0xff] %v5842_v4  ;;  %8386 = vst [vmem:[#allocation52_spill] sm:$0xff] %v5846_v0  ;;  %v5862_v51 = vsel %vm5740_vm15, 0.0, %v5842_v4  ;;  %v5866_v22 = vmul.f32 %v4996_v35, %v5842_v4  ;;  %v1930_v30 = vmul.f32 %v5011_v46, %v5842_v4  ;;  %v5881_v34 = vmul.f32 %v5043_v59, %v5842_v4 }
 0x1f7   : > { %8388 = vst [vmem:[#allocation53_spill] sm:$0xff] %v5850_v25  ;;  %v2068_v20 = vsel %vm2055_vm5, %v8390_v32, %v8389_v49  ;;  %v5868_v0 = vadd.f32 %v2409_v2, %v2373_v13  ;;  %v8076_v49 = vrot.slane %v5862_v51, 7  ;;  %v5874_v32 = vmul.f32 %v5007_v42, %v5862_v51  ;;  %4059 = vmatprep.subr.bf16.mxu0 %v4244_v38 }
 0x1f8   : > { %8392 = vst [vmem:[#allocation116_spill] sm:$0xff] %v5881_v34  ;;  %v5885_v2 = vmul.f32 %v5045_v60, %v5862_v51  ;;  %v8394_v13 = vrot.slane %v5560_v5, 7  ;;  %v5900_v12 = vsel %vm5776_vm0, 0.0, %v5850_v25  ;;  %v8397_v61 = vrot.slane %v5866_v22, 1 }
 0x1f9   : > { %8391 = vst [vmem:[#allocation115_spill] sm:$0xff] %v5868_v0  ;;  %v5895_v0 = vmul.f32 %v5041_v58, %v5842_v4  ;;  %v5916_v43 = vmul.f32 %v5005_v41, %v5842_v4  ;;  %v5927_v52 = vmul.f32 %v5007_v42, %v5900_v12  ;;  %v8400_v9 = vrot.slane %v5570_v56, 7  ;;  %4060 = vmatpush3.bf16.msra.mxu0 %v4244_v38 }
 0x1fa   : > { %8393 = vst [vmem:[#allocation117_spill] sm:$0xff] %v5885_v2  ;;  %v1871_v54 = vsel %vm1848_vm3, %v8394_v13, %v8076_v49  ;;  %v8398_v13 = vrot.slane %v5629_v7, 1  ;;  %v1946_v24 = vmul.f32 %v5011_v46, %v5850_v25  ;;  %v5950_v34 = vmul.f32 %v5041_v58, %v5850_v25 }
 0x1fb   : > { %8395 = vst [vmem:[#allocation118_spill] sm:$0xff] %v5895_v0  ;;  %v1894_v44 = vmul.f32 %v5003_v40, %v1871_v54  ;;  %8399 = vst [vmem:[#allocation57_spill] sm:$0xff] %v5916_v43  ;;  %v8083_v0 = vrot.slane %v5900_v12, 7  ;;  %v5923_v54 = vmul.f32 %v4996_v35, %v5850_v25  ;;  %v1641_v11 = vsel %vm5828_vm1, 0.0, %v5904_v62 }
 0x1fc   : > { %v5912_v49 = vsel %vm2055_vm5, %v8398_v13, %v8397_v61  ;;  %v4245_v13 = vld [vmem:[#allocation11 + $0x18] sm:$0xff]   ;;  %8402 = vst [vmem:[#allocation120_spill] sm:$0xff] %v5950_v34  ;;  %v8410_v34 = vrot.slane %v5678_v15, 1  ;;  %v1823_v1 = vrot.slane %v1641_v11, 7  ;;  %v1928_v48 = vmul.f32 %v5011_v46, %v5904_v62 }
 0x1fd   : > { %v5929_v61 = vadd.f32 %v1930_v30, %v1894_v44  ;;  %v1855_v50 = vsel %vm1848_vm3, %v8400_v9, %v8083_v0  ;;  %v5945_v30 = vmul.f32 %v5043_v59, %v5850_v25  ;;  %v8404_v9 = vld [vmem:[#allocation32_spill] sm:$0xff]  ;;  %v8409_v43 = vrot.slane %v5923_v54, 1  ;;  %4061 = vmatprep.subr.bf16.mxu0 %v4245_v13 }
 0x1fe   : > { %v1910_v4 = vmul.f32 %v5003_v40, %v1855_v50  ;;  %v5954_v50 = vmul.f32 %v5045_v60, %v5900_v12  ;;  %v8405_v0 = vand.u32 15, %v8404_v9  ;;  %v8411_v9 = vld [vmem:[#allocation83_spill] sm:$0xff]  ;;  %v5989_v39 = vmul.f32 %v5005_v41, %v5850_v25  ;;  %4062 = vmatpush3.bf16.msra.mxu0 %v4245_v13 }
 0x1ff   : > { %8401 = vst [vmem:[#allocation119_spill] sm:$0xff] %v5945_v30  ;;  %v5972_v47 = vsel %vm2055_vm5, %v8410_v34, %v8409_v43  ;;  %v2158_v33 = vadd.f32 %v2068_v20, %v8411_v9  ;;  %v1872_v20 = vsel %vm1848_vm3, %v1823_v1, %v8415_v14  ;;  %v8416_v9 = vrot.slane %v5701_v6, 7 }
 0x200   : > { %8403 = vst [vmem:[#allocation121_spill] sm:$0xff] %v5954_v50  ;;  %vm5961_vm2 = vcmp.eq.s32.totalorder %v8405_v0, 15  ;;  %v5965_v2 = vadd.f32 %v1946_v24, %v1910_v4  ;;  %v1996_v0 = vmul.f32 %v4996_v35, %v5904_v62  ;;  %v2195_v24 = vmul.f32 %v5007_v42, %v1641_v11  ;;  %8414 = vst [vmem:[#allocation83_spill] sm:$0xff] %v5989_v39 }
 0x201   : > { %v8412_v4 = vrot.slane %v5874_v32, 7  ;;  %v1873_v28 = vsel %vm1848_vm3, %v8416_v9, %v1823_v1  ;;  %v2394_v5 = vmul.f32 %v5041_v58, %v5904_v62  ;;  %v8417_v14 = vrot.slane %v5757_v3, 1 }
 0x202   : > { %8408 = vst [vmem:[#allocation32_spill] sm:$0xff] %v5965_v2  ;;  %v4246_v2 = vld [vmem:[#allocation11 + $0x20] sm:$0xff]   ;;  %v1892_v38 = vmul.f32 %v5003_v40, %v1873_v28  ;;  %v2267_v43 = vrot.slane %v2195_v24, 7  ;;  %v8418_v6 = vrot.slane %v5340_v63, 1  ;;  %v6010_v1 = vmul.f32 %v5045_v60, %v1641_v11 }
 0x203   : > { %v2272_v34 = vsel %vm2255_vm6, %v8413_v37, %v8412_v4  ;;  %v2069_v4 = vrot.slane %v1996_v0, 1  ;;  %v8420_v37 = vrot.slane %v5732_v21, 1  ;;  %v8421_v0 = vrot.slane %v5629_v7, 1  ;;  %4063 = vmatprep.subr.bf16.mxu0 %v4246_v2 }
 0x204   : > { %v2531_v39 = vsel %vm2055_vm5, %v8418_v6, %v8417_v14  ;;  %8419 = vst [vmem:[#allocation122_spill] sm:$0xff] %v6010_v1  ;;  %v1960_v9 = vadd.f32 %v1928_v48, %v1892_v38  ;;  %v8422_v30 = vrot.slane %v5721_v17, 7  ;;  %v8424_v11 = vrot.slane %v5634_v36, 7  ;;  %v8426_v38 = vld [vmem:[#allocation33_spill] sm:$0xff]  ;;  %v4247_v17 = vld [vmem:[#allocation11 + $0x28] sm:$0xff]   ;;  %v8430_v36 = vld [vmem:[#allocation58_spill] sm:$0xff]  ;;  %4064 = vmatpush3.bf16.msra.mxu0 %v4246_v2 }
 0x205   : > { %v2070_v28 = vsel %vm2055_vm5, %v8420_v37, %v2069_v4  ;;  %v2072_v24 = vsel %vm2055_vm5, %v2069_v4, %v8421_v0  ;;  %v2623_v37 = vadd.f32 %v2531_v39, %v5506_v45  ;;  %v8427_v7 = vand.u32 15, %v8426_v38  ;;  %4065 = vmatprep.subr.bf16.mxu0 %v4247_v17  ;;  %v8442_v2 = vld [vmem:[#allocation80_spill] sm:$0xff] }
 0x206   : > { %v2268_v25 = vsel %vm2255_vm6, %v8422_v30, %v2267_v43  ;;  %v6022_v63 = vadd.f32 %v2070_v28, %v5780_v31  ;;  %v6027_v48 = vsel %vm2255_vm6, %v2267_v43, %v8424_v11  ;;  %v2160_v13 = vadd.f32 %v2072_v24, %v1960_v9 }
 0x207   : > { %8425 = vst [vmem:[#allocation124_spill] sm:$0xff] %v6027_v48  ;;  %v2358_v21 = vadd.f32 %v2268_v25, %v2158_v33  ;;  %vm6032_vm7 = vcmp.eq.s32.totalorder %v8427_v7, 0  ;;  %v8095_v31 = vrot.slane %v6010_v1, 7  ;;  %v2922_v30 = vrot.slane %v5904_v62, 1  ;;  %v8434_v25 = vld [vmem:[#allocation71_spill] sm:$0xff] }
 0x208   : > { %8423 = vst [vmem:[#allocation123_spill] sm:$0xff] %v6022_v63  ;;  %v6040_v43 = vadd.f32 %v5099_v19, %v8430_v36  ;;  %v2858_v39 = vmul.f32 %v5005_v41, %v5904_v62  ;;  %v8433_v45 = vrot.slane %v5798_v8, 1  ;;  %v8435_v14 = vrot.slane %v8434_v25, 1  ;;  %4066 = vmatpush3.bf16.msra.mxu0 %v4247_v17 }
 0x209   : > { %v6042_v33 = vadd.f32 %v2394_v5, %v2358_v21  ;;  %v8436_v9 = vrot.slane %v5927_v52, 7  ;;  %v8437_v28 = vrot.slane %v5685_v53, 7  ;;  %v6059_v5 = vld [vmem:[%s7979_s5 + $0x8] ss:$0 sm:$0xff]  ;;  %v6061_v24 = vadd.f32 %v2272_v34, %v2160_v13 }
 0x20a   : > { %8431 = vst [vmem:[#allocation33_spill] sm:$0xff] %v6040_v43  ;;  %v2100_v6 = vsel %vm2055_vm5, %v8435_v14, %v8433_v45  ;;  %v8439_v11 = vrot.slane %v5736_v27, 7  ;;  %v8440_v38 = vrot.slane %v5621_v57, 1  ;;  %v8441_v36 = vrot.slane %v5716_v55, 1  ;;  %v4248_v14 = vld [vmem:[#allocation11 + $0x30] sm:$0xff]  }
 0x20b   : > { %8432 = vst [vmem:[#allocation58_spill] sm:$0xff] %v6042_v33  ;;  %v2304_v0 = vsel %vm2255_vm6, %v8437_v28, %v8436_v9  ;;  %8438 = vst [vmem:[#allocation71_spill] sm:$0xff] %v6061_v24  ;;  %v6078_v34 = vmul.f32 %v5043_v59, %v5904_v62  ;;  %v1657_v25 = vsel %vm5961_vm2, 0.0, %v6040_v43  ;;  %v1893_v9 = vmul.f32 %v5003_v40, %v1872_v20 }
 0x20c   : > { %v2730_v21 = vsel %vm2255_vm6, %v8439_v11, %v8095_v31  ;;  %v2979_v7 = vsel %vm2951_vm4, %v2922_v30, %v8440_v38  ;;  %v2980_v45 = vsel %vm2951_vm4, %v8441_v36, %v2922_v30  ;;  %v1839_v28 = vrot.slane %v1657_v25, 7  ;;  %4067 = vmatprep.subr.bf16.mxu0 %v4248_v14 }
 0x20d   : > { %v2822_v13 = vadd.f32 %v2730_v21, %v2623_v37  ;;  %v2991_v27 = vmul.f32 %v6059_v5, %v2979_v7  ;;  %v2012_v30 = vmul.f32 %v4996_v35, %v6040_v43  ;;  %v2174_v11 = vadd.f32 %v2100_v6, %v8442_v2  ;;  %v8443_v21 = vld [vmem:[#allocation66_spill] sm:$0xff]  ;;  %4068 = vmatpush3.bf16.msra.mxu0 %v4248_v14 }
 0x20e   : > { %v1944_v62 = vmul.f32 %v5011_v46, %v6040_v43  ;;  %v2211_v37 = vmul.f32 %v5007_v42, %v1657_v25  ;;  %v6093_v44 = vadd.f32 %v8443_v21, %v5099_v19  ;;  %v8444_v7 = vld [vmem:[#allocation34_spill] sm:$0xff]  ;;  %v8448_v31 = vrot.slane %v5570_v56, 7 }
 0x20f   : > { %v2890_v38 = vadd.f32 %v2858_v39, %v2822_v13  ;;  %v8445_v36 = vand.u32 15, %v8444_v7  ;;  %v8449_v6 = vrot.slane %v5725_v23, 7  ;;  %v2101_v2 = vrot.slane %v2012_v30, 1 }
 0x210   : > { %v1856_v39 = vsel %vm1848_vm3, %v1839_v28, %v8448_v31  ;;  %v6111_v21 = vmul.f32 %v5043_v59, %v6040_v43  ;;  %v2299_v50 = vrot.slane %v2211_v37, 7  ;;  %v6117_v56 = vmul.f32 %v5045_v60, %v1657_v25  ;;  %v8452_v31 = vld [vmem:[#allocation35_spill] sm:$0xff] }
 0x211   : > { %vm6097_vm8 = vcmp.eq.s32.totalorder %v8445_v36, 0  ;;  %v1857_v13 = vsel %vm1848_vm3, %v8449_v6, %v1839_v28  ;;  %v6113_v7 = vadd.f32 %v2991_v27, %v2890_v38  ;;  %v8453_v24 = vand.u32 15, %v8452_v31  ;;  %v4249_v28 = vld [vmem:[#allocation11 + $0x38] sm:$0xff]  }
 0x212   : > { %8450 = vst [vmem:[#allocation80_spill] sm:$0xff] %v6111_v21  ;;  %v1908_v36 = vmul.f32 %v5003_v40, %v1857_v13  ;;  %8451 = vst [vmem:[#allocation66_spill] sm:$0xff] %v6117_v56  ;;  %v6127_v17 = vmul.f32 %v6059_v5, %v2980_v45  ;;  %v8456_v27 = vrot.slane %v5798_v8, 1  ;;  %v8457_v25 = vrot.slane %v5678_v15, 1  ;;  %4069 = vmatprep.subr.bf16.mxu0 %v4249_v28 }
 0x213   : > { %vm6121_vm9 = vcmp.eq.s32.totalorder %v8453_v24, 0  ;;  %v8459_v13 = vrot.slane %v5802_v29, 7  ;;  %v8460_v30 = vrot.slane %v5685_v53, 7  ;;  %v6147_v8 = vmul.f32 %v5003_v40, %v1856_v39  ;;  %4070 = vmatpush3.bf16.msra.mxu0 %v4249_v28 }
 0x214   : > { %v2102_v38 = vsel %vm2055_vm5, %v8456_v27, %v2101_v2  ;;  %v2104_v37 = vsel %vm2055_vm5, %v2101_v2, %v8457_v25  ;;  %v1976_v6 = vadd.f32 %v1944_v62, %v1908_v36  ;;  %v2410_v15 = vmul.f32 %v5041_v58, %v6040_v43  ;;  %v8466_v2 = vld [vmem:[#allocation36_spill] sm:$0xff] }
 0x215   : > { %v6136_v24 = vadd.f32 %v2102_v38, %v5820_v10  ;;  %v2300_v31 = vsel %vm2255_vm6, %v8459_v13, %v2299_v50  ;;  %v6144_v45 = vsel %vm2255_vm6, %v2299_v50, %v8460_v30  ;;  %v6154_v10 = vsel %vm6032_vm7, 0.0, %v6093_v44 }
 0x216   : > { %8461 = vst [vmem:[#allocation35_spill] sm:$0xff] %v6144_v45  ;;  %v2374_v27 = vadd.f32 %v2300_v31, %v2174_v11  ;;  %8462 = vst [vmem:[#allocation125_spill] sm:$0xff] %v6154_v10  ;;  %v2176_v29 = vadd.f32 %v2104_v37, %v1976_v6  ;;  %v6160_v50 = vmul.f32 %v4996_v35, %v6154_v10  ;;  %v8467_v36 = vand.u32 15, %v8466_v2 }
 0x217   : > { %8458 = vst [vmem:[#allocation34_spill] sm:$0xff] %v6136_v24  ;;  %v6166_v39 = vmul.f32 %v5005_v41, %v6040_v43  ;;  %v6170_v4 = vmul.f32 %v5007_v42, %v6093_v44  ;;  %v6174_v14 = vmul.f32 %v5043_v59, %v6154_v10  ;;  %v6188_v6 = vmul.f32 %v5045_v60, %v6093_v44 }
 0x218   : > { %v6162_v11 = vadd.f32 %v2410_v15, %v2374_v27  ;;  %vm6178_vm10 = vcmp.eq.s32.totalorder %v8467_v36, 0  ;;  %v6182_v38 = vadd.f32 %v2304_v0, %v2176_v29  ;;  %v6192_v13 = vmul.f32 %v5011_v46, %v6093_v44  ;;  %v8473_v0 = vld [vmem:[#allocation67_spill] sm:$0xff]  ;;  %v8475_v36 = vld [vmem:[#allocation69_spill] sm:$0xff] }
 0x219   : > { %8464 = vst [vmem:[#allocation127_spill] sm:$0xff] %v6166_v39  ;;  %8465 = vst [vmem:[#allocation128_spill] sm:$0xff] %v6174_v14  ;;  %v6197_v27 = vmul.f32 %v5041_v58, %v6093_v44  ;;  %v6201_v15 = vadd.f32 %v8473_v0, %v5099_v19  ;;  %v6206_v2 = vmul.f32 %v5005_v41, %v6093_v44  ;;  %v8524_v10 = vrot.slane %v6160_v50, 1 }
 0x21a   : > { %8463 = vst [vmem:[#allocation126_spill] sm:$0xff] %v6162_v11  ;;  %8470 = vst [vmem:[#allocation36_spill] sm:$0xff] %v6182_v38  ;;  %v6210_v62 = vadd.f32 %v5099_v19, %v8475_v36  ;;  %v1961_v25 = vadd.f32 %v5656_v18, %v1893_v9  ;;  %v8478_v9 = vld [vmem:[#allocation70_spill] sm:$0xff] }
 0x21b   : > { %8471 = vst [vmem:[#allocation129_spill] sm:$0xff] %v6188_v6  ;;  %8472 = vst [vmem:[#allocation130_spill] sm:$0xff] %v6197_v27  ;;  %v6218_v28 = vsel %vm6097_vm8, 0.0, %v6201_v15  ;;  %v6222_v0 = vmul.f32 %v5007_v42, %v6201_v15  ;;  %v6235_v53 = vadd.f32 %v5099_v19, %v8478_v9  ;;  %v6240_v31 = vmul.f32 %v5011_v46, %v6201_v15  ;;  %v8504_v27 = vld [vmem:[#allocation39_spill] sm:$0xff] }
 0x21c   : > { %8474 = vst [vmem:[#allocation67_spill] sm:$0xff] %v6206_v2  ;;  %8476 = vst [vmem:[#allocation69_spill] sm:$0xff] %v6218_v28  ;;  %v6227_v36 = vmul.f32 %v4996_v35, %v6218_v28  ;;  %v6231_v18 = vmul.f32 %v5043_v59, %v6218_v28  ;;  %v6244_v29 = vmul.f32 %v5045_v60, %v6201_v15  ;;  %v6249_v37 = vsel %vm6121_vm9, 0.0, %v6210_v62 }
 0x21d   : > { %8480 = vst [vmem:[#allocation132_spill] sm:$0xff] %v6249_v37  ;;  %v6254_v19 = vmul.f32 %v5041_v58, %v6201_v15  ;;  %v6258_v9 = vmul.f32 %v5005_v41, %v6201_v15  ;;  %v1931_v45 = vmul.f32 %v5011_v46, %v6210_v62  ;;  %v6265_v23 = vmul.f32 %v4996_v35, %v6249_v37 }
 0x21e   : > { %8477 = vst [vmem:[#allocation131_spill] sm:$0xff] %v6231_v18  ;;  %8479 = vst [vmem:[#allocation70_spill] sm:$0xff] %v6244_v29  ;;  %v2161_v24 = vadd.f32 %v5912_v49, %v1961_v25  ;;  %v6270_v38 = vmul.f32 %v5007_v42, %v6210_v62  ;;  %v8487_v43 = vrot.slane %v6210_v62, 7  ;;  %v8488_v49 = vrot.slane %v5862_v51, 7  ;;  %v8494_v18 = vld [vmem:[#allocation37_spill] sm:$0xff] }
 0x21f   : > { %8481 = vst [vmem:[#allocation133_spill] sm:$0xff] %v6254_v19  ;;  %8482 = vst [vmem:[#allocation134_spill] sm:$0xff] %v6258_v9  ;;  %v8483_v19 = vld [vmem:[#allocation38_spill] sm:$0xff]  ;;  %v6292_v20 = vmul.f32 %v5043_v59, %v6249_v37  ;;  %v2397_v39 = vmul.f32 %v5041_v58, %v6210_v62  ;;  %v6299_v51 = vmul.f32 %v5045_v60, %v6210_v62  ;;  %v8111_v29 = vrot.slane %v6235_v53, 7 }
 0x220   : > { %v8484_v11 = vand.u32 15, %v8483_v19  ;;  %v1870_v25 = vsel %vm1848_vm3, %v8488_v49, %v8487_v43  ;;  %v8110_v19 = vrot.slane %v6270_v38, 7  ;;  %v6304_v43 = vsel %vm6178_vm10, 0.0, %v6235_v53 }
 0x221   : > { %8489 = vst [vmem:[#allocation38_spill] sm:$0xff] %v6292_v20  ;;  %8490 = vst [vmem:[#allocation135_spill] sm:$0xff] %v6299_v51  ;;  %v6315_v9 = vmul.f32 %v5005_v41, %v6210_v62  ;;  %v8495_v28 = vand.u32 15, %v8494_v18  ;;  %v2413_v2 = vmul.f32 %v5041_v58, %v6235_v53  ;;  %v8531_v63 = vrot.slane %v6201_v15, 7 }
 0x222   : > { %vm6274_vm11 = vcmp.eq.s32.totalorder %v8484_v11, 15  ;;  %v1895_v11 = vmul.f32 %v5003_v40, %v1870_v25  ;;  %8491 = vst [vmem:[#allocation136_spill] sm:$0xff] %v6304_v43  ;;  %v8492_v25 = vrot.slane %v5874_v32, 7  ;;  %v6328_v32 = vmul.f32 %v4996_v35, %v6304_v43 }
 0x223   : > { %8493 = vst [vmem:[#allocation137_spill] sm:$0xff] %v6315_v9  ;;  %vm6320_vm12 = vcmp.eq.s32.totalorder %v8495_v28, 15  ;;  %v8498_v28 = vrot.slane %v5900_v12, 7  ;;  %v8541_v3 = vrot.slane %v6265_v23, 1 }
 0x224   : > { %v6306_v49 = vadd.f32 %v1931_v45, %v1895_v11  ;;  %v2274_v56 = vsel %vm2255_vm6, %v8492_v25, %v8110_v19  ;;  %v1977_v11 = vadd.f32 %v5689_v16, %v6147_v8  ;;  %v6332_v25 = vmul.f32 %v5007_v42, %v6235_v53 }
 0x225   : > { %v2361_v45 = vadd.f32 %v2274_v56, %v2161_v24  ;;  %v1854_v56 = vsel %vm1848_vm3, %v8498_v28, %v8111_v29  ;;  %v6343_v16 = vmul.f32 %v5043_v59, %v6304_v43  ;;  %v6347_v24 = vmul.f32 %v5045_v60, %v6235_v53 }
 0x226   : > { %v1911_v18 = vmul.f32 %v5003_v40, %v1854_v56  ;;  %v1947_v19 = vmul.f32 %v5011_v46, %v6235_v53  ;;  %v2177_v12 = vadd.f32 %v5972_v47, %v1977_v11  ;;  %v6367_v56 = vld [vmem:[%s7978_s4] ss:$0 sm:$0xff]  ;;  %v8502_v47 = vld [vmem:[#allocation72_spill] sm:$0xff]  ;;  %v8505_v28 = vand.u32 15, %v8504_v27 }
 0x227   : > { %8499 = vst [vmem:[#allocation37_spill] sm:$0xff] %v6343_v16  ;;  %8500 = vst [vmem:[#allocation138_spill] sm:$0xff] %v6347_v24  ;;  %v6349_v8 = vadd.f32 %v2397_v39, %v2361_v45  ;;  %v6371_v11 = vadd.f32 %v6367_v56, %v8502_v47  ;;  %v6387_v16 = vmul.f32 %v5005_v41, %v6235_v53  ;;  %v8511_v47 = vrot.slane %v6265_v23, 1 }
 0x228   : > { %v6360_v6 = vadd.f32 %v1947_v19, %v1911_v18  ;;  %vm6375_vm13 = vcmp.eq.s32.totalorder %v8505_v28, 15  ;;  %v8508_v19 = vrot.slane %v6332_v25, 7  ;;  %v8509_v18 = vrot.slane %v5927_v52, 7 }
 0x229   : > { %8501 = vst [vmem:[#allocation139_spill] sm:$0xff] %v6349_v8  ;;  %8503 = vst [vmem:[#allocation72_spill] sm:$0xff] %v6371_v11  ;;  %v8512_v27 = vrot.slane %v5866_v22, 1  ;;  %v6397_v14 = vsel %vm6274_vm11, 0.0, %v6371_v11  ;;  %v6401_v52 = vmul.f32 %v4996_v35, %v6371_v11  ;;  %v8518_v39 = vrot.slane %v6093_v44, 7 }
 0x22a   : > { %v2306_v45 = vsel %vm2255_vm6, %v8509_v18, %v8508_v19  ;;  %8510 = vst [vmem:[#allocation39_spill] sm:$0xff] %v6387_v16  ;;  %v8513_v19 = vld [vmem:[#allocation73_spill] sm:$0xff]  ;;  %v8124_v22 = vrot.slane %v6397_v14, 7  ;;  %v6413_v21 = vmul.f32 %v5007_v42, %v6397_v14  ;;  %v8538_v29 = vrot.slane %v6170_v4, 7 }
 0x22b   : > { %v2076_v28 = vsel %vm2055_vm5, %v8512_v27, %v8511_v47  ;;  %v2377_v8 = vadd.f32 %v2306_v45, %v2177_v12  ;;  %v6405_v18 = vadd.f32 %v6367_v56, %v8513_v19  ;;  %v1934_v12 = vmul.f32 %v5011_v46, %v6371_v11 }
 0x22c   : > { %v6420_v27 = vmul.f32 %v5043_v59, %v6371_v11  ;;  %v6424_v19 = vmul.f32 %v5045_v60, %v6397_v14  ;;  %v1867_v16 = vsel %vm1848_vm3, %v8518_v39, %v8124_v22  ;;  %v8523_v9 = vrot.slane %v6401_v52, 1 }
 0x22d   : > { %8514 = vst [vmem:[#allocation73_spill] sm:$0xff] %v6405_v18  ;;  %v6415_v45 = vadd.f32 %v2413_v2, %v2377_v8  ;;  %v6434_v2 = vmul.f32 %v5041_v58, %v6371_v11  ;;  %v8520_v8 = vld [vmem:[#allocation74_spill] sm:$0xff]  ;;  %v1898_v43 = vmul.f32 %v5003_v40, %v1867_v16  ;;  %v6454_v22 = vmul.f32 %v5005_v41, %v6371_v11 }
 0x22e   : > { %8516 = vst [vmem:[#allocation141_spill] sm:$0xff] %v6420_v27  ;;  %8517 = vst [vmem:[#allocation142_spill] sm:$0xff] %v6424_v19  ;;  %v6438_v47 = vadd.f32 %v6367_v56, %v8520_v8  ;;  %v6450_v39 = vsel %vm2055_vm5, %v8524_v10, %v8523_v9  ;;  %v6459_v8 = vsel %vm6320_vm12, 0.0, %v6405_v18  ;;  %v8526_v9 = vld [vmem:[#allocation40_spill] sm:$0xff]  ;;  %v6499_v20 = vmul.f32 %v5041_v58, %v6405_v18 }
 0x22f   : > { %8515 = vst [vmem:[#allocation140_spill] sm:$0xff] %v6415_v45  ;;  %8519 = vst [vmem:[#allocation143_spill] sm:$0xff] %v6434_v2  ;;  %v8521_v45 = vld [vmem:[#allocation75_spill] sm:$0xff]  ;;  %v6465_v2 = vmul.f32 %v4996_v35, %v6405_v18  ;;  %v6469_v10 = vmul.f32 %v5007_v42, %v6459_v8  ;;  %v8527_v51 = vand.u32 15, %v8526_v9  ;;  %v6477_v30 = vadd.f32 %v1934_v12, %v1898_v43 }
 0x230   : > { %v6442_v24 = vadd.f32 %v6367_v56, %v8521_v45  ;;  %8525 = vst [vmem:[#allocation75_spill] sm:$0xff] %v6454_v22  ;;  %v8530_v48 = vrot.slane %v6459_v8, 7  ;;  %v6493_v43 = vmul.f32 %v5043_v59, %v6405_v18  ;;  %8533 = vst [vmem:[#allocation144_spill] sm:$0xff] %v6499_v20  ;;  %v1645_v45 = vsel %vm6375_vm13, 0.0, %v6438_v47 }
 0x231   : > { %vm6473_vm14 = vcmp.eq.s32.totalorder %v8527_v51, 15  ;;  %v1950_v51 = vmul.f32 %v5011_v46, %v6405_v18  ;;  %v8138_v9 = vrot.slane %v6465_v2, 1  ;;  %v2000_v20 = vmul.f32 %v4996_v35, %v6438_v47 }
 0x232   : > { %8522 = vst [vmem:[#allocation74_spill] sm:$0xff] %v6442_v24  ;;  %v1851_v57 = vsel %vm1848_vm3, %v8531_v63, %v8530_v48  ;;  %8532 = vst [vmem:[#allocation40_spill] sm:$0xff] %v6493_v43  ;;  %v6503_v63 = vmul.f32 %v5045_v60, %v6459_v8  ;;  %v8535_v48 = vrot.slane %v6227_v36, 1  ;;  %v1827_v11 = vrot.slane %v1645_v45, 7 }
 0x233   : > { %v1914_v12 = vmul.f32 %v5003_v40, %v1851_v57  ;;  %v6514_v57 = vmul.f32 %v5005_v41, %v6405_v18  ;;  %v2162_v19 = vadd.f32 %v2076_v28, %v5929_v61  ;;  %v2199_v37 = vmul.f32 %v5007_v42, %v1645_v45 }
 0x234   : > { %8534 = vst [vmem:[#allocation145_spill] sm:$0xff] %v6503_v63  ;;  %v6510_v16 = vsel %vm2055_vm5, %v8535_v48, %v8138_v9  ;;  %v1932_v9 = vmul.f32 %v5011_v46, %v6438_v47  ;;  %v8537_v1 = vrot.slane %v6413_v21, 7  ;;  %v8540_v61 = vrot.slane %v6210_v62, 7 }
 0x235   : > { %8536 = vst [vmem:[#allocation146_spill] sm:$0xff] %v6514_v57  ;;  %v6521_v27 = vadd.f32 %v1950_v51, %v1914_v12  ;;  %v2077_v57 = vrot.slane %v2000_v20, 1  ;;  %v8539_v51 = vrot.slane %v6093_v44, 7  ;;  %v2275_v48 = vrot.slane %v2199_v37, 7 }
 0x236   : > { %v2280_v33 = vsel %vm2255_vm6, %v8538_v29, %v8537_v1  ;;  %v1869_v28 = vsel %vm1848_vm3, %v8540_v61, %v1827_v11  ;;  %v6543_v20 = vmul.f32 %v5043_v59, %v6438_v47  ;;  %v8542_v44 = vrot.slane %v6160_v50, 1 }
 0x237   : > { %v1868_v12 = vsel %vm1848_vm3, %v1827_v11, %v8539_v51  ;;  %v1896_v43 = vmul.f32 %v5003_v40, %v1869_v28  ;;  %v2078_v1 = vsel %vm2055_vm5, %v8541_v3, %v2077_v57  ;;  %v2398_v62 = vmul.f32 %v5041_v58, %v6438_v47 }
 0x238   : > { %v2080_v29 = vsel %vm2055_vm5, %v2077_v57, %v8542_v44  ;;  %v6556_v37 = vadd.f32 %v2078_v1, %v6306_v49  ;;  %v8544_v51 = vrot.slane %v6270_v38, 7  ;;  %v8545_v23 = vrot.slane %v6170_v4, 7 }
 0x239   : > { %v1964_v57 = vadd.f32 %v1932_v9, %v1896_v43  ;;  %v6568_v44 = vmul.f32 %v5045_v60, %v1645_v45  ;;  %v1897_v11 = vmul.f32 %v5003_v40, %v1868_v12  ;;  %v1661_v38 = vsel %vm6473_vm14, 0.0, %v6442_v24  ;;  %v8550_v12 = vld [vmem:[#allocation32_spill] sm:$0xff] }
 0x23a   : > { %8543 = vst [vmem:[#allocation147_spill] sm:$0xff] %v6556_v37  ;;  %v2276_v61 = vsel %vm2255_vm6, %v8544_v51, %v2275_v48  ;;  %v6564_v3 = vsel %vm2255_vm6, %v2275_v48, %v8545_v23  ;;  %v2016_v4 = vmul.f32 %v4996_v35, %v6442_v24  ;;  %v1843_v51 = vrot.slane %v1661_v38, 7 }
 0x23b   : > { %8546 = vst [vmem:[#allocation148_spill] sm:$0xff] %v6564_v3  ;;  %v2362_v28 = vadd.f32 %v2276_v61, %v2162_v19  ;;  %v2164_v48 = vadd.f32 %v2080_v29, %v1964_v57  ;;  %v8548_v19 = vrot.slane %v6328_v32, 1  ;;  %v8549_v45 = vrot.slane %v5923_v54, 1 }
 0x23c   : > { %v2109_v43 = vrot.slane %v2016_v4, 1  ;;  %v2215_v23 = vmul.f32 %v5007_v42, %v1661_v38  ;;  %v8551_v22 = vrot.slane %v6469_v10, 7  ;;  %v8552_v50 = vrot.slane %v6222_v0, 7 }
 0x23d   : > { %v6577_v1 = vadd.f32 %v2398_v62, %v2362_v28  ;;  %v2108_v9 = vsel %vm2055_vm5, %v8549_v45, %v8548_v19  ;;  %v6591_v62 = vadd.f32 %v2280_v33, %v2164_v48  ;;  %v8554_v28 = vrot.slane %v6201_v15, 7 }
 0x23e   : > { %v2178_v61 = vadd.f32 %v2108_v9, %v8550_v12  ;;  %v2312_v29 = vsel %vm2255_vm6, %v8552_v50, %v8551_v22  ;;  %v8555_v4 = vrot.slane %v6235_v53, 7  ;;  %v1948_v9 = vmul.f32 %v5011_v46, %v6442_v24 }
 0x23f   : > { %8547 = vst [vmem:[#allocation149_spill] sm:$0xff] %v6577_v1  ;;  %8553 = vst [vmem:[#allocation32_spill] sm:$0xff] %v6591_v62  ;;  %v1852_v54 = vsel %vm1848_vm3, %v1843_v51, %v8554_v28  ;;  %v8556_v33 = vrot.slane %v6328_v32, 1  ;;  %v8557_v48 = vrot.slane %v6227_v36, 1  ;;  %v2307_v53 = vrot.slane %v2215_v23, 7 }
 0x240   : > { %v1853_v19 = vsel %vm1848_vm3, %v8555_v4, %v1843_v51  ;;  %v6616_v51 = vmul.f32 %v5043_v59, %v6442_v24  ;;  %v6619_v22 = vmul.f32 %v5045_v60, %v1661_v38  ;;  %v6623_v32 = vmul.f32 %v5005_v41, %v6438_v47 }
 0x241   : > { %v1912_v45 = vmul.f32 %v5003_v40, %v1853_v19  ;;  %v2110_v50 = vsel %vm2055_vm5, %v8556_v33, %v2109_v43  ;;  %v2112_v15 = vsel %vm2055_vm5, %v2109_v43, %v8557_v48  ;;  %v2414_v43 = vmul.f32 %v5041_v58, %v6442_v24  ;;  %v8564_v33 = vld [vmem:[#allocation81_spill] sm:$0xff] }
 0x242   : > { %v6612_v12 = vadd.f32 %v2110_v50, %v6360_v6  ;;  %8559 = vst [vmem:[#allocation151_spill] sm:$0xff] %v6616_v51  ;;  %8560 = vst [vmem:[#allocation152_spill] sm:$0xff] %v6619_v22  ;;  %v6629_v6 = vmul.f32 %v5003_v40, %v1852_v54  ;;  %v8561_v23 = vrot.slane %v6332_v25, 7  ;;  %v8562_v38 = vrot.slane %v6222_v0, 7  ;;  %v8569_v25 = vld [vmem:[#allocation82_spill] sm:$0xff] }
 0x243   : > { %v1980_v36 = vadd.f32 %v1948_v9, %v1912_v45  ;;  %v6641_v50 = vadd.f32 %v6367_v56, %v8564_v33  ;;  %v6645_v48 = vmul.f32 %v5005_v41, %v6442_v24  ;;  %v1074_v54 = vadd.s32 128, %v4984_v26 }
 0x244   : > { %8558 = vst [vmem:[#allocation150_spill] sm:$0xff] %v6612_v12  ;;  %v2308_v4 = vsel %vm2255_vm6, %v8561_v23, %v2307_v53  ;;  %v6637_v19 = vsel %vm2255_vm6, %v2307_v53, %v8562_v38  ;;  %v873_v0 = vadd.f32 %v6367_v56, %v8569_v25  ;;  %v1090_v23 = vadd.s32 256, %v4984_v26 }
 0x245   : > { %8563 = vst [vmem:[#allocation153_spill] sm:$0xff] %v6637_v19  ;;  %v2180_v45 = vadd.f32 %v2112_v15, %v1980_v36  ;;  %v2378_v9 = vadd.f32 %v2308_v4, %v2178_v61  ;;  %8565 = vst [vmem:[#allocation81_spill] sm:$0xff] %v6645_v48  ;;  %v6653_v53 = vmul.f32 %v5007_v42, %v6641_v50  ;;  %v1210_v61 = vand.u32 15, %v1074_v54 }
 0x246   : > { %v6661_v36 = vmul.f32 %v5045_v60, %v6641_v50  ;;  %v6666_v33 = vmul.f32 %v5011_v46, %v6641_v50  ;;  %v6682_v54 = vmul.f32 %v5005_v41, %v6641_v50  ;;  %v1322_v49 = vand.u32 15, %v1090_v23 }
 0x247   : > { %v6655_v38 = vadd.f32 %v2312_v29, %v2180_v45  ;;  %v6657_v15 = vadd.f32 %v2414_v43, %v2378_v9  ;;  %vm1686_vm15 = vcmp.eq.s32.totalorder %v1210_v61, 0  ;;  %v6673_v29 = vmul.f32 %v5041_v58, %v6641_v50 }
 0x248   : > { %8568 = vst [vmem:[#allocation156_spill] sm:$0xff] %v6661_v36  ;;  %v1072_v43 = vadd.s32 112, %v4984_v26  ;;  %v1965_v45 = vadd.f32 %v6192_v13, %v1897_v11  ;;  %v6678_v9 = vsel %vm1686_vm15, 0.0, %v6641_v50  ;;  %8572 = vst [vmem:[#allocation158_spill] sm:$0xff] %v6682_v54  ;;  %v6685_v25 = vmul.f32 %v5007_v42, %v873_v0  ;;  %v8573_v13 = vld [vmem:[#allocation84_spill] sm:$0xff] }
 0x249   : > { %8566 = vst [vmem:[#allocation154_spill] sm:$0xff] %v6655_v38  ;;  %8567 = vst [vmem:[#allocation155_spill] sm:$0xff] %v6657_v15  ;;  %v6689_v61 = vmul.f32 %v4996_v35, %v6678_v9  ;;  %v6695_v11 = vadd.f32 %v6367_v56, %v8573_v13  ;;  %v6699_v4 = vmul.f32 %v5043_v59, %v6678_v9  ;;  %vm1702_vm0 = vcmp.eq.s32.totalorder %v1322_v49, 0 }
 0x24a   : > { %8570 = vst [vmem:[#allocation82_spill] sm:$0xff] %v6673_v29  ;;  %8571 = vst [vmem:[#allocation157_spill] sm:$0xff] %v6678_v9  ;;  %v6702_v23 = vmul.f32 %v5041_v58, %v873_v0  ;;  %v1196_v38 = vand.u32 15, %v1072_v43  ;;  %v6705_v12 = vsel %vm1702_vm0, 0.0, %v873_v0  ;;  %v6709_v57 = vmul.f32 %v5045_v60, %v873_v0 }
 0x24b   : > { %8574 = vst [vmem:[#allocation84_spill] sm:$0xff] %v6699_v4  ;;  %v6713_v13 = vmul.f32 %v4996_v35, %v6705_v12  ;;  %v6717_v49 = vmul.f32 %v5043_v59, %v6705_v12  ;;  %v2165_v18 = vadd.f32 %v6450_v39, %v1965_v45  ;;  %v1935_v15 = vmul.f32 %v5011_v46, %v6695_v11 }
 0x24c   : > { %8575 = vst [vmem:[#allocation159_spill] sm:$0xff] %v6702_v23  ;;  %v6720_v23 = vmul.f32 %v5005_v41, %v873_v0  ;;  %vm1684_vm1 = vcmp.eq.s32.totalorder %v1196_v38, 0  ;;  %v6737_v0 = vmul.f32 %v5007_v42, %v6695_v11  ;;  %v8579_v39 = vrot.slane %v6695_v11, 7 }
 0x24d   : > { %8576 = vst [vmem:[#allocation160_spill] sm:$0xff] %v6717_v49  ;;  %v6724_v19 = vsel %vm1684_vm1, 0.0, %v6695_v11  ;;  %v8580_v45 = vrot.slane %v6397_v14, 7  ;;  %v2401_v28 = vmul.f32 %v5041_v58, %v6695_v11  ;;  %v6760_v14 = vmul.f32 %v5045_v60, %v6695_v11 }
 0x24e   : > { %8577 = vst [vmem:[#allocation161_spill] sm:$0xff] %v6720_v23  ;;  %8578 = vst [vmem:[#allocation162_spill] sm:$0xff] %v6724_v19  ;;  %v6733_v51 = vmul.f32 %v4996_v35, %v6724_v19  ;;  %v8155_v24 = vrot.slane %v6737_v0, 7  ;;  %v6753_v38 = vmul.f32 %v5043_v59, %v6724_v19  ;;  %v8584_v23 = vrot.slane %v6413_v21, 7 }
 0x24f   : > { %v1866_v63 = vsel %vm1848_vm3, %v8580_v45, %v8579_v39  ;;  %8582 = vst [vmem:[#allocation164_spill] sm:$0xff] %v6760_v14  ;;  %v8583_v39 = vld [vmem:[#allocation85_spill] sm:$0xff]  ;;  %v1088_v43 = vadd.s32 240, %v4984_v26  ;;  %v1981_v29 = vadd.f32 %v6240_v31, %v6629_v6  ;;  %v6778_v36 = vmul.f32 %v5005_v41, %v6695_v11 }
 0x250   : > { %v1899_v48 = vmul.f32 %v5003_v40, %v1866_v63  ;;  %8581 = vst [vmem:[#allocation163_spill] sm:$0xff] %v6753_v38  ;;  %v6764_v45 = vadd.f32 %v6367_v56, %v8583_v39  ;;  %v2282_v22 = vsel %vm2255_vm6, %v8584_v23, %v8155_v24  ;;  %v2489_v19 = vmul.f32 0.0, %v5043_v59 }
 0x251   : > { %v2365_v54 = vadd.f32 %v2282_v22, %v2165_v18  ;;  %8585 = vst [vmem:[#allocation85_spill] sm:$0xff] %v6778_v36  ;;  %v2181_v24 = vadd.f32 %v6510_v16, %v1981_v29  ;;  %v8587_v18 = vrot.slane %v6459_v8, 7 }
 0x252   : > { %v6766_v63 = vadd.f32 %v1935_v15, %v1899_v48  ;;  %v8156_v39 = vrot.slane %v6764_v45, 7  ;;  %v6783_v48 = vmul.f32 %v5007_v42, %v6764_v45  ;;  %v1308_v15 = vand.u32 15, %v1088_v43 }
 0x253   : > { %v1951_v23 = vmul.f32 %v5011_v46, %v6764_v45  ;;  %v6789_v31 = vadd.f32 %v2401_v28, %v2365_v54  ;;  %v2417_v21 = vmul.f32 %v5041_v58, %v6764_v45  ;;  %v6803_v16 = vmul.f32 %v5045_v60, %v6764_v45  ;;  %v8589_v28 = vld [vmem:[#allocation86_spill] sm:$0xff] }
 0x254   : > { %v1850_v22 = vsel %vm1848_vm3, %v8587_v18, %v8156_v39  ;;  %v8163_v6 = vrot.slane %v6783_v48, 7  ;;  %vm1700_vm2 = vcmp.eq.s32.totalorder %v1308_v15, 0  ;;  %v6807_v29 = vadd.f32 %v6367_v56, %v8589_v28 }
 0x255   : > { %8586 = vst [vmem:[#allocation165_spill] sm:$0xff] %v6789_v31  ;;  %v1915_v43 = vmul.f32 %v5003_v40, %v1850_v22  ;;  %8588 = vst [vmem:[#allocation166_spill] sm:$0xff] %v6803_v16  ;;  %v6810_v8 = vsel %vm1700_vm2, 0.0, %v6764_v45  ;;  %v8592_v54 = vrot.slane %v6469_v10, 7  ;;  %v1075_v15 = vadd.s32 136, %v4984_v26  ;;  %v8593_v22 = vld [vmem:[#allocation91_spill] sm:$0xff] }
 0x256   : > { %8590 = vst [vmem:[#allocation86_spill] sm:$0xff] %v6807_v29  ;;  %8591 = vst [vmem:[#allocation167_spill] sm:$0xff] %v6810_v8  ;;  %v8594_v39 = vrot.slane %v8593_v22, 7  ;;  %v8595_v31 = vld [vmem:[#allocation55_spill] sm:$0xff]  ;;  %v6827_v28 = vmul.f32 %v4996_v35, %v6810_v8  ;;  %v6831_v10 = vmul.f32 %v5043_v59, %v6810_v8  ;;  %v2006_v62 = vmul.f32 %v4996_v35, %v6807_v29 }
 0x257   : > { %v2314_v18 = vsel %vm2255_vm6, %v8592_v54, %v8163_v6  ;;  %v8596_v4 = vrot.slane %v8595_v31, 7  ;;  %v6823_v36 = vadd.f32 %v1951_v23, %v1915_v43  ;;  %v1217_v22 = vand.u32 15, %v1075_v15  ;;  %v8607_v8 = vld [vmem:[#allocation43_spill] sm:$0xff] }
 0x258   : > { %v2381_v38 = vadd.f32 %v2314_v18, %v2181_v24  ;;  %8597 = vst [vmem:[#allocation91_spill] sm:$0xff] %v6831_v10  ;;  %v6842_v23 = vmul.f32 %v5005_v41, %v6764_v45  ;;  %v1938_v18 = vmul.f32 %v5011_v46, %v6807_v29  ;;  %v2089_v15 = vrot.slane %v2006_v62, 1 }
 0x259   : > { %v2292_v9 = vsel %vm2255_vm6, %v8596_v4, %v8594_v39  ;;  %vm1543_vm7 = vcmp.eq.s32.totalorder %v1217_v22, 15  ;;  %v1091_v6 = vadd.s32 264, %v4984_v26  ;;  %v8603_v22 = vld [vmem:[#allocation54_spill] sm:$0xff]  ;;  %v6864_v54 = vmul.f32 %v5041_v58, %v6807_v29 }
 0x25a   : > { %v6837_v4 = vadd.f32 %v2417_v21, %v2381_v38  ;;  %8599 = vst [vmem:[#allocation168_spill] sm:$0xff] %v6842_v23  ;;  %v1651_v38 = vsel %vm1543_vm7, 0.0, %v6807_v29  ;;  %v8600_v21 = vld [vmem:[#allocation96_spill] sm:$0xff]  ;;  %v8601_v23 = vrot.slane %v6689_v61, 1  ;;  %v8604_v43 = vrot.slane %v8603_v22, 1 }
 0x25b   : > { %v876_v39 = vadd.f32 %v6367_v56, %v8600_v21  ;;  %v2205_v62 = vmul.f32 %v5007_v42, %v1651_v38  ;;  %8605 = vst [vmem:[#allocation54_spill] sm:$0xff] %v6864_v54  ;;  %v6868_v21 = vmul.f32 %v5043_v59, %v6807_v29  ;;  %v6872_v10 = vmul.f32 %v5005_v41, %v6807_v29  ;;  %v8619_v29 = vld [vmem:[#allocation101_spill] sm:$0xff] }
 0x25c   : > { %8598 = vst [vmem:[#allocation55_spill] sm:$0xff] %v6837_v4  ;;  %v1833_v4 = vrot.slane %v1651_v38, 7  ;;  %v6856_v24 = vsel %vm2055_vm5, %v8601_v23, %v2089_v15  ;;  %v2092_v16 = vsel %vm2055_vm5, %v2089_v15, %v8604_v43  ;;  %v1329_v23 = vand.u32 15, %v1091_v6 }
 0x25d   : > { %8602 = vst [vmem:[#allocation96_spill] sm:$0xff] %v6856_v24  ;;  %8606 = vst [vmem:[#allocation169_spill] sm:$0xff] %v6872_v10  ;;  %v8608_v24 = vrot.slane %v8607_v8, 7  ;;  %v8609_v15 = vrot.slane %v6641_v50, 7  ;;  %v2287_v54 = vrot.slane %v2205_v62, 7  ;;  %v2488_v14 = vmul.f32 %v5043_v59, %v876_v39  ;;  %v8612_v62 = vld [vmem:[#allocation59_spill] sm:$0xff] }
 0x25e   : > { %vm1559_vm8 = vcmp.eq.s32.totalorder %v1329_v23, 15  ;;  %v8610_v6 = vrot.slane %v8595_v31, 7  ;;  %v6898_v10 = vmul.f32 %v5045_v60, %v1651_v38  ;;  %v8614_v31 = vrot.slane %v6717_v49, 1 }
 0x25f   : > { %v1862_v43 = vsel %vm1848_vm3, %v1833_v4, %v8608_v24  ;;  %v1863_v22 = vsel %vm1848_vm3, %v8609_v15, %v1833_v4  ;;  %v1667_v24 = vsel %vm1559_vm8, 0.0, %v876_v39  ;;  %v2584_v1 = vrot.slane %v2488_v14, 1 }
 0x260   : > { %v1902_v3 = vmul.f32 %v5003_v40, %v1863_v22  ;;  %v1903_v37 = vmul.f32 %v5003_v40, %v1862_v43  ;;  %v6889_v8 = vsel %vm2255_vm6, %v2287_v54, %v8610_v6  ;;  %v2221_v22 = vmul.f32 %v5007_v42, %v1667_v24 }
 0x261   : > { %8611 = vst [vmem:[#allocation43_spill] sm:$0xff] %v6889_v8  ;;  %v2686_v43 = vmul.f32 %v5045_v60, %v1667_v24  ;;  %v6903_v23 = vsel %vm2055_vm5, %v8614_v31, %v2584_v1  ;;  %v2586_v6 = vrot.slane %v2489_v19, 1  ;;  %v6906_v8 = vmul.f32 0.0, %v5045_v60 }
 0x262   : > { %v1970_v4 = vadd.f32 %v1938_v18, %v1902_v3  ;;  %v6893_v15 = vadd.f32 %v8612_v62, %v1903_v37  ;;  %8615 = vst [vmem:[#allocation170_spill] sm:$0xff] %v6903_v23  ;;  %v2319_v14 = vrot.slane %v2221_v22, 7  ;;  %v2948_v18 = vrot.slane %v876_v39, 1 }
 0x263   : > { %8616 = vst [vmem:[#allocation171_spill] sm:$0xff] %v6906_v8  ;;  %v2781_v37 = vrot.slane %v2686_v43, 7  ;;  %v6915_v49 = vadd.f32 %v6367_v56, %v8619_v29  ;;  %v8620_v19 = vrot.slane %v6685_v25, 7  ;;  %v8623_v43 = vrot.slane %v6705_v12, 1 }
 0x264   : > { %8613 = vst [vmem:[#allocation59_spill] sm:$0xff] %v6893_v15  ;;  %v2170_v3 = vadd.f32 %v2092_v16, %v1970_v4  ;;  %v8617_v15 = vmov 0.0   ;;  %v8621_v4 = vrot.slane %v6709_v57, 7  ;;  %v8627_v29 = vrot.slane %v6733_v51, 1 }
 0x265   : > { %v6911_v38 = vrot.slane %v8617_v15, 1  ;;  %v6922_v16 = vsel %vm2255_vm6, %v8620_v19, %v2319_v14  ;;  %v2954_v62 = vsel %vm2951_vm4, %v8623_v43, %v2948_v18  ;;  %v1073_v14 = vadd.s32 120, %v4984_v26 }
 0x266   : > { %v6917_v31 = vadd.f32 %v2292_v9, %v2170_v3  ;;  %v6927_v22 = vsel %vm2255_vm6, %v8621_v4, %v2781_v37  ;;  %v6935_v9 = vmul.f32 %v5041_v58, %v876_v39  ;;  %v6942_v19 = vsel %vm2055_vm5, %v2584_v1, %v2586_v6 }
 0x267   : > { %8618 = vst [vmem:[#allocation172_spill] sm:$0xff] %v6911_v38  ;;  %8622 = vst [vmem:[#allocation101_spill] sm:$0xff] %v6927_v22  ;;  %v2953_v3 = vsel %vm2951_vm4, %v2948_v18, %v6911_v38  ;;  %v6945_v4 = vmul.f32 %v5005_v41, %v876_v39  ;;  %v2004_v43 = vmul.f32 %v4996_v35, %v6915_v49  ;;  %v8628_v24 = vrot.slane %v6401_v52, 1  ;;  %v8692_v22 = vld [vmem:[#allocation71_spill] sm:$0xff] }
 0x268   : > { %8624 = vst [vmem:[#allocation173_spill] sm:$0xff] %v6935_v9  ;;  %8625 = vst [vmem:[#allocation174_spill] sm:$0xff] %v6942_v19  ;;  %v8629_v9 = vrot.slane %v6906_v8, 7  ;;  %v1203_v38 = vand.u32 15, %v1073_v14  ;;  %v8631_v39 = vrot.slane %v6653_v53, 7  ;;  %v6964_v19 = vmul.f32 %v6059_v5, %v2954_v62 }
 0x269   : > { %8626 = vst [vmem:[#allocation175_spill] sm:$0xff] %v6945_v4  ;;  %v2084_v23 = vsel %vm2055_vm5, %v8628_v24, %v8627_v29  ;;  %v6967_v4 = vmul.f32 %v6059_v5, %v2953_v3  ;;  %v1936_v52 = vmul.f32 %v5011_v46, %v6915_v49  ;;  %v2085_v24 = vrot.slane %v2004_v43, 1 }
 0x26a   : > { %v6957_v18 = vsel %vm2255_vm6, %v2781_v37, %v8629_v9  ;;  %v2166_v1 = vadd.f32 %v2084_v23, %v6477_v30  ;;  %v2288_v6 = vsel %vm2255_vm6, %v8631_v39, %v2287_v54  ;;  %8632 = vst [vmem:[#allocation177_spill] sm:$0xff] %v6964_v19  ;;  %vm1541_vm9 = vcmp.eq.s32.totalorder %v1203_v38, 15  ;;  %v8634_v37 = vld [vmem:[#allocation104_spill] sm:$0xff]  ;;  %v8690_v19 = vld [vmem:[#allocation123_spill] sm:$0xff] }
 0x26b   : > { %8630 = vst [vmem:[#allocation176_spill] sm:$0xff] %v6957_v18  ;;  %8633 = vst [vmem:[#allocation178_spill] sm:$0xff] %v6967_v4  ;;  %v6973_v29 = vadd.f32 %v6367_v56, %v8634_v37  ;;  %v1089_v30 = vadd.s32 248, %v4984_v26  ;;  %v8635_v23 = vrot.slane %v6827_v28, 1  ;;  %v8636_v54 = vrot.slane %v6465_v2, 1  ;;  %v8685_v4 = vld [vmem:[#allocation100_spill] sm:$0xff] }
 0x26c   : > { %v1649_v9 = vsel %vm1541_vm9, 0.0, %v6915_v49  ;;  %v8637_v3 = vrot.slane %v6733_v51, 1  ;;  %v8638_v38 = vrot.slane %v6689_v61, 1  ;;  %v2402_v56 = vmul.f32 %v5041_v58, %v6915_v49 }
 0x26d   : > { %v2116_v62 = vsel %vm2055_vm5, %v8636_v54, %v8635_v23  ;;  %v1831_v39 = vrot.slane %v1649_v9, 7  ;;  %v2203_v2 = vmul.f32 %v5007_v42, %v1649_v9  ;;  %v6996_v23 = vmul.f32 %v5043_v59, %v6915_v49 }
 0x26e   : > { %v2086_v14 = vsel %vm2055_vm5, %v8637_v3, %v2085_v24  ;;  %v2088_v43 = vsel %vm2055_vm5, %v2085_v24, %v8638_v38  ;;  %v7000_v51 = vmul.f32 %v5005_v41, %v6915_v49  ;;  %v1315_v61 = vand.u32 15, %v1089_v30 }
 0x26f   : > { %v6991_v37 = vadd.f32 %v2086_v14, %v6766_v63  ;;  %v2020_v24 = vmul.f32 %v4996_v35, %v6973_v29  ;;  %v2182_v54 = vadd.f32 %v2116_v62, %v6521_v27  ;;  %v8639_v3 = vrot.slane %v6641_v50, 7 }
 0x270   : > { %v8640_v14 = vrot.slane %v6695_v11, 7  ;;  %v2283_v18 = vrot.slane %v2203_v2, 7  ;;  %v7014_v8 = vmul.f32 %v5045_v60, %v1649_v9  ;;  %vm1557_vm10 = vcmp.eq.s32.totalorder %v1315_v61, 15 }
 0x271   : > { %v1864_v63 = vsel %vm1848_vm3, %v1831_v39, %v8639_v3  ;;  %v2117_v27 = vrot.slane %v2020_v24, 1  ;;  %v8641_v50 = vrot.slane %v6737_v0, 7  ;;  %v8642_v3 = vrot.slane %v6653_v53, 7 }
 0x272   : > { %v1865_v38 = vsel %vm1848_vm3, %v8640_v14, %v1831_v39  ;;  %v1901_v35 = vmul.f32 %v5003_v40, %v1864_v63  ;;  %v1665_v39 = vsel %vm1557_vm10, 0.0, %v6973_v29  ;;  %v1952_v9 = vmul.f32 %v5011_v46, %v6973_v29 }
 0x273   : > { %v1900_v30 = vmul.f32 %v5003_v40, %v1865_v38  ;;  %v2284_v62 = vsel %vm2255_vm6, %v8641_v50, %v2283_v18  ;;  %v7024_v11 = vsel %vm2255_vm6, %v2283_v18, %v8642_v3  ;;  %v1847_v24 = vrot.slane %v1665_v39, 7 }
 0x274   : > { %v7030_v14 = vadd.f32 %v6666_v33, %v1901_v35  ;;  %v2366_v61 = vadd.f32 %v2284_v62, %v2166_v1  ;;  %v8643_v0 = vrot.slane %v6827_v28, 1  ;;  %v8644_v53 = vrot.slane %v6713_v13, 1  ;;  %v8646_v1 = vld [vmem:[#allocation26_spill] sm:$0xff]  ;;  %v8647_v62 = vld [vmem:[#allocation29_spill] sm:$0xff] }
 0x275   : > { %v1968_v2 = vadd.f32 %v1936_v52, %v1900_v30  ;;  %v2219_v38 = vmul.f32 %v5007_v42, %v1665_v39  ;;  %v7041_v50 = vmul.f32 %v5043_v59, %v6973_v29  ;;  %v8645_v33 = vrot.slane %v6764_v45, 7 }
 0x276   : > { %v2118_v63 = vsel %vm2055_vm5, %v8643_v0, %v2117_v27  ;;  %v2120_v18 = vsel %vm2055_vm5, %v2117_v27, %v8644_v53  ;;  %v7043_v52 = vadd.f32 %v2402_v56, %v2366_v61  ;;  %v1880_v13 = vsel %vm1848_vm3, %v1847_v24, %v8646_v1  ;;  %v8675_v56 = vld [vmem:[#allocation87_spill] sm:$0xff]  ;;  %v8679_v27 = vld [vmem:[#allocation88_spill] sm:$0xff] }
 0x277   : > { %v2168_v46 = vadd.f32 %v2088_v43, %v1968_v2  ;;  %v1849_v28 = vsel %vm1848_vm3, %v8645_v33, %v1847_v24  ;;  %v1885_v30 = vmul.f32 %v5003_v40, %v1880_v13  ;;  %v7055_v35 = vadd.f32 %v2118_v63, %v6823_v36 }
 0x278   : > { %v1916_v42 = vmul.f32 %v5003_v40, %v1849_v28  ;;  %v2315_v59 = vrot.slane %v2219_v38, 7  ;;  %v8648_v61 = vrot.slane %v6783_v48, 7  ;;  %v8649_v40 = vrot.slane %v6685_v25, 7  ;;  %v8651_v38 = vld [vmem:[#allocation63_spill] sm:$0xff]  ;;  %v8653_v25 = vld [vmem:[#allocation28_spill] sm:$0xff] }
 0x279   : > { %v7057_v43 = vadd.f32 %v2288_v6, %v2168_v46  ;;  %v1953_v3 = vadd.f32 %v8647_v62, %v1885_v30  ;;  %v2418_v0 = vmul.f32 %v5041_v58, %v6973_v29  ;;  %v8650_v53 = vrot.slane %v5716_v55, 1  ;;  %v7089_v58 = vld [vmem:[%s7980_s6] ss:$0 sm:$0xff] }
 0x27a   : > { %v1984_v2 = vadd.f32 %v1952_v9, %v1916_v42  ;;  %v2316_v24 = vsel %vm2255_vm6, %v8648_v61, %v2315_v59  ;;  %v7069_v36 = vsel %vm2255_vm6, %v2315_v59, %v8649_v40  ;;  %v8652_v46 = vrot.slane %v8651_v38, 1  ;;  %v8656_v30 = vld [vmem:[#allocation42_spill] sm:$0xff]  ;;  %v8661_v61 = vld [vmem:[#allocation92_spill] sm:$0xff] }
 0x27b   : > { %v2382_v6 = vadd.f32 %v2316_v24, %v2182_v54  ;;  %v7081_v33 = vmul.f32 %v5045_v60, %v1665_v39  ;;  %v8654_v28 = vrot.slane %v8653_v25, 1  ;;  %v8657_v42 = vrot.slane %v8656_v30, 1  ;;  %v8658_v39 = vld [vmem:[#allocation46_spill] sm:$0xff]  ;;  %v8668_v25 = vld [vmem:[#allocation51_spill] sm:$0xff]  ;;  %v8680_v30 = vld [vmem:[#allocation132_spill] sm:$0xff] }
 0x27c   : > { %v2981_v48 = vsel %vm2951_vm4, %v8652_v46, %v8650_v53  ;;  %v2184_v9 = vadd.f32 %v2120_v18, %v1984_v2  ;;  %v8655_v13 = vmov %v8652_v46  ;;  %v3022_v18 = vadd.f32 %v6127_v17, %v8658_v39  ;;  %v8665_v46 = vld [vmem:[#allocation102_spill] sm:$0xff] }
 0x27d   : > { %v2153_v1 = vadd.f32 %v8654_v28, %v1953_v3  ;;  %v2989_v54 = vmul.f32 %v6059_v5, %v2981_v48  ;;  %v7091_v55 = vadd.f32 %v2418_v0, %v2382_v6  ;;  %v2982_v60 = vsel %vm2951_vm4, %v8657_v42, %v8655_v13  ;;  %v8660_v3 = vld [vmem:[#allocation61_spill] sm:$0xff]  ;;  %v8670_v42 = vld [vmem:[#allocation58_spill] sm:$0xff] }
 0x27e   : > { %v3062_v59 = vadd.f32 %v7089_v58, %v6113_v7  ;;  %v7104_v62 = vadd.f32 %v6922_v16, %v2184_v9  ;;  %v8662_v40 = vrot.slane %v6078_v34, 1  ;;  %v8663_v6 = vld [vmem:[#allocation113_spill] sm:$0xff]  ;;  %v7115_v38 = vmul.f32 %v5005_v41, %v6973_v29 }
 0x27f   : > { %v2353_v2 = vadd.f32 %v8660_v3, %v2153_v1  ;;  %v3021_v24 = vadd.f32 %v2989_v54, %v8661_v61  ;;  %v8664_v0 = vrot.slane %v8663_v6, 1  ;;  %v3061_v17 = vadd.f32 %v7089_v58, %v3022_v18  ;;  %v8669_v54 = vld [vmem:[#allocation30_spill] sm:$0xff]  ;;  %v8671_v18 = vld [vmem:[#allocation103_spill] sm:$0xff] }
 0x280   : > { %8659 = vst [vmem:[#allocation104_spill] sm:$0xff] %v7104_v62  ;;  %v3094_v7 = vmul.f32 0.044715, %v3062_v59  ;;  %v8666_v16 = vrot.slane %v8665_v46, 1  ;;  %v8667_v48 = vmov %v8662_v40  ;;  %v2988_v3 = vmul.f32 %v6059_v5, %v2982_v60 }
 0x281   : > { %v2533_v53 = vsel %vm2055_vm5, %v8664_v0, %v8662_v40  ;;  %v2421_v28 = vadd.f32 %v8668_v25, %v2353_v2  ;;  %v3060_v1 = vadd.f32 %v7089_v58, %v3021_v24  ;;  %v3093_v61 = vmul.f32 0.044715, %v3061_v17  ;;  %v8673_v0 = vld [vmem:[#allocation122_spill] sm:$0xff]  ;;  %v8676_v24 = vld [vmem:[#allocation117_spill] sm:$0xff] }
 0x282   : > { %v2535_v9 = vsel %vm2055_vm5, %v8667_v48, %v8666_v16  ;;  %v2624_v13 = vadd.f32 %v2533_v53, %v8669_v54  ;;  %v3126_v40 = vmul.f32 %v3094_v7, %v3062_v59  ;;  %v8672_v6 = vrot.slane %v8671_v18, 7 }
 0x283   : > { %v2625_v39 = vadd.f32 %v2535_v9, %v8670_v42  ;;  %v8674_v63 = vrot.slane %v8673_v0, 7  ;;  %v2620_v16 = vadd.f32 %v8675_v56, %v2421_v28  ;;  %v3092_v48 = vmul.f32 0.044715, %v3060_v1 }
 0x284   : > { %v7134_v2 = vmul.f32 0.5, %v3062_v59  ;;  %v8677_v25 = vrot.slane %v8676_v24, 7  ;;  %v8678_v53 = vmov %v8672_v6  ;;  %v3125_v60 = vmul.f32 %v3093_v61, %v3061_v17 }
 0x285   : > { %v2732_v34 = vsel %vm2255_vm6, %v8674_v63, %v8672_v6  ;;  %v3158_v54 = vmul.f32 %v3126_v40, %v3062_v59  ;;  %v2819_v45 = vadd.f32 %v8679_v27, %v2620_v16  ;;  %v3124_v0 = vmul.f32 %v3092_v48, %v3060_v1  ;;  %v8682_v6 = vld [vmem:[#allocation31_spill] sm:$0xff]  ;;  %v8688_v27 = vld [vmem:[#allocation57_spill] sm:$0xff]  ;;  %v8689_v48 = vld [vmem:[#allocation44_spill] sm:$0xff] }
 0x286   : > { %v2734_v9 = vsel %vm2255_vm6, %v8678_v53, %v8677_v25  ;;  %v2823_v7 = vadd.f32 %v2732_v34, %v2624_v13  ;;  %v8681_v63 = vrot.slane %v8680_v30, 1  ;;  %v8683_v56 = vrot.slane %v8682_v6, 1 }
 0x287   : > { %v2824_v42 = vadd.f32 %v2734_v9, %v2625_v39  ;;  %v8686_v18 = vrot.slane %v8685_v4, 1  ;;  %v3157_v40 = vmul.f32 %v3125_v60, %v3061_v17  ;;  %v3190_v13 = vadd.f32 %v3158_v54, %v3062_v59  ;;  %v8687_v39 = vld [vmem:[#allocation106_spill] sm:$0xff]  ;;  %v8691_v4 = vld [vmem:[#allocation124_spill] sm:$0xff] }
 0x288   : > { %v2977_v28 = vsel %vm2951_vm4, %v8683_v56, %v8681_v63  ;;  %v8684_v41 = vmov %v8683_v56  ;;  %v2891_v34 = vadd.f32 %v8687_v39, %v2823_v7  ;;  %v2887_v25 = vadd.f32 %v8689_v48, %v2819_v45  ;;  %v8694_v45 = vld [vmem:[#allocation105_spill] sm:$0xff]  ;;  %v8695_v39 = vld [vmem:[#allocation116_spill] sm:$0xff]  ;;  %v8701_v48 = vld [vmem:[#allocation135_spill] sm:$0xff] }
 0x289   : > { %v2978_v61 = vsel %vm2951_vm4, %v8686_v18, %v8684_v41  ;;  %v2892_v16 = vadd.f32 %v8688_v27, %v2824_v42  ;;  %v3156_v53 = vmul.f32 %v3124_v0, %v3060_v1  ;;  %v2993_v63 = vmul.f32 %v6059_v5, %v2977_v28  ;;  %v8693_v41 = vld [vmem:[#allocation118_spill] sm:$0xff] }
 0x28a   : > { %v2992_v9 = vmul.f32 %v6059_v5, %v2978_v61  ;;  %v3189_v56 = vadd.f32 %v3157_v40, %v3061_v17  ;;  %v3222_v6 = vmul.f32 0.7978846, %v3190_v13  ;;  %v2359_v62 = vadd.f32 %v8691_v4, %v8690_v19 }
 0x28b   : > { %v2428_v60 = vadd.f32 %v8693_v41, %v8692_v22  ;;  %v3020_v59 = vadd.f32 %v2988_v3, %v2887_v25  ;;  %v3188_v54 = vadd.f32 %v3156_v53, %v3060_v1  ;;  %v3025_v18 = vadd.f32 %v2993_v63, %v2892_v16  ;;  %v8698_v3 = vld [vmem:[#allocation38_spill] sm:$0xff] }
 0x28c   : > { %v3024_v7 = vadd.f32 %v2992_v9, %v2891_v34  ;;  %v3221_v42 = vmul.f32 0.7978846, %v3189_v56  ;;  %4252 = vtanh.f32 %v3222_v6  ;;  %v2427_v0 = vadd.f32 %v8694_v45, %v2359_v62 }
 0x28d   : > { %v8696_v61 = vrot.slane %v8695_v39, 1  ;;  %v8697_v5 = vrot.slane %v8665_v46, 1  ;;  %v3059_v40 = vadd.f32 %v7089_v58, %v3020_v59  ;;  %v3220_v19 = vmul.f32 0.7978846, %v3188_v54 }
 0x28e   : > { %v3063_v13 = vadd.f32 %v7089_v58, %v3024_v7  ;;  %v3064_v22 = vadd.f32 %v7089_v58, %v3025_v18  ;;  %4254 = vtanh.f32 %v3221_v42  ;;  %v8699_v34 = vrot.slane %v8698_v3, 1 }
 0x28f   : > { %v2537_v28 = vsel %vm2055_vm5, %v8697_v5, %v8696_v61  ;;  %v8700_v27 = vmov %v8696_v61  ;;  %v8702_v25 = vrot.slane %v8701_v48, 7  ;;  %v8703_v46 = vrot.slane %v8676_v24, 7  ;;  %v8706_v61 = vld [vmem:[#allocation125_spill] sm:$0xff]  ;;  %v7207_v48 = vld [vmem:[%s7979_s5 + $0x8] ss:$0 sm:$0xff] }
 0x290   : > { %v2539_v62 = vsel %vm2055_vm5, %v8700_v27, %v8699_v34  ;;  %v2626_v16 = vadd.f32 %v2537_v28, %v2427_v0  ;;  %v3091_v9 = vmul.f32 0.044715, %v3059_v40  ;;  %4256 = vtanh.f32 %v3220_v19 }
 0x291   : > { %v2736_v53 = vsel %vm2255_vm6, %v8703_v46, %v8702_v25  ;;  %v3253_v63 = vmul.f32 0.5, %v3061_v17  ;;  %v3095_v56 = vmul.f32 0.044715, %v3063_v13  ;;  %v7182_v6 = vmul.f32 0.5, %v3059_v40 }
 0x292   : > { %v7184_v4 = vmul.f32 0.5, %v3060_v1  ;;  %v3096_v41 = vmul.f32 0.044715, %v3064_v22  ;;  %v2627_v59 = vadd.f32 %v2539_v62, %v2428_v60  ;;  %v3123_v54 = vmul.f32 %v3091_v9, %v3059_v40  ;;  %v8711_v62 = vld [vmem:[#allocation137_spill] sm:$0xff] }
 0x293   : > { %v3127_v7 = vmul.f32 %v3095_v56, %v3063_v13  ;;  %v8704_v18 = vrot.slane %v6568_v44, 7  ;;  %v8705_v42 = vmov %v8702_v25  ;;  %v2825_v45 = vadd.f32 %v2736_v53, %v2626_v16 }
 0x294   : > { %v3128_v0 = vmul.f32 %v3096_v41, %v3064_v22  ;;  %v8707_v17 = vrot.slane %v8706_v61, 1  ;;  %v8708_v5 = vrot.slane %v6438_v47, 1  ;;  %v8710_v28 = vrot.slane %v8680_v30, 1 }
 0x295   : > { %v2738_v24 = vsel %vm2255_vm6, %v8705_v42, %v8704_v18  ;;  %v3155_v34 = vmul.f32 %v3123_v54, %v3059_v40  ;;  %v3159_v27 = vmul.f32 %v3127_v7, %v3063_v13  ;;  %v2893_v16 = vadd.f32 %v8711_v62, %v2825_v45  ;;  %v8714_v7 = vld [vmem:[#allocation128_spill] sm:$0xff]  ;;  %v8719_v62 = vld [vmem:[#allocation129_spill] sm:$0xff] }
 0x296   : > { %v2826_v39 = vadd.f32 %v2738_v24, %v2627_v59  ;;  %v2975_v1 = vsel %vm2951_vm4, %v8708_v5, %v8707_v17  ;;  %v8709_v60 = vmov %v8708_v5  ;;  %v3160_v46 = vmul.f32 %v3128_v0, %v3064_v22  ;;  %v4253_v45 = vpop.eup %4252  ;;  %v8718_v5 = vld [vmem:[#allocation149_spill] sm:$0xff] }
 0x297   : > { %v2976_v19 = vsel %vm2951_vm4, %v8710_v28, %v8709_v60  ;;  %v2995_v47 = vmul.f32 %v7207_v48, %v2975_v1  ;;  %v8712_v30 = vrot.slane %v6543_v20, 1  ;;  %v8713_v9 = vrot.slane %v8698_v3, 1 }
 0x298   : > { %v2994_v25 = vmul.f32 %v7207_v48, %v2976_v19  ;;  %v2894_v53 = vadd.f32 %v6623_v32, %v2826_v39  ;;  %v3187_v41 = vadd.f32 %v3155_v34, %v3059_v40  ;;  %v3191_v59 = vadd.f32 %v3159_v27, %v3063_v13  ;;  %v8717_v39 = vld [vmem:[#allocation139_spill] sm:$0xff]  ;;  %v4255_v19 = vpop.eup %4254 }
 0x299   : > { %v2541_v56 = vsel %vm2055_vm5, %v8713_v9, %v8712_v30  ;;  %v8715_v18 = vrot.slane %v8714_v7, 1  ;;  %v8716_v42 = vmov %v8712_v30  ;;  %v3192_v0 = vadd.f32 %v3160_v46, %v3064_v22  ;;  %v8722_v46 = vld [vmem:[#allocation142_spill] sm:$0xff] }
 0x29a   : > { %v3026_v54 = vadd.f32 %v2994_v25, %v2893_v16  ;;  %v3027_v32 = vadd.f32 %v2995_v47, %v2894_v53  ;;  %v2628_v17 = vadd.f32 %v2541_v56, %v8717_v39  ;;  %v3219_v60 = vmul.f32 0.7978846, %v3187_v41  ;;  %v4257_v9 = vpop.eup %4256 }
 0x29b   : > { %v2543_v24 = vsel %vm2055_vm5, %v8716_v42, %v8715_v18  ;;  %v3318_v3 = vadd.f32 1.0, %v4253_v45  ;;  %v3223_v28 = vmul.f32 0.7978846, %v3191_v59  ;;  %v3224_v34 = vmul.f32 0.7978846, %v3192_v0 }
 0x29c   : > { %v2629_v1 = vadd.f32 %v2543_v24, %v8718_v5  ;;  %v3065_v40 = vadd.f32 %v7089_v58, %v3026_v54  ;;  %v3066_v27 = vadd.f32 %v7089_v58, %v3027_v32  ;;  %v8720_v20 = vrot.slane %v8719_v62, 7 }
 0x29d   : > { %v8721_v16 = vrot.slane %v6568_v44, 7  ;;  %v8723_v53 = vrot.slane %v8722_v46, 7  ;;  %4258 = vtanh.f32 %v3219_v60  ;;  %v3317_v56 = vadd.f32 1.0, %v4255_v19 }
 0x29e   : > { %v8724_v47 = vmov %v8720_v20  ;;  %v7237_v41 = vmul.f32 %v3318_v3, %v7134_v2  ;;  %v3097_v59 = vmul.f32 0.044715, %v3065_v40  ;;  %v3255_v54 = vmul.f32 0.5, %v3063_v13  ;;  %v8725_v3 = vld [vmem:[#allocation162_spill] sm:$0xff]  ;;  %v8727_v13 = vld [vmem:[#allocation72_spill] sm:$0xff] }
 0x29f   : > { %v2740_v25 = vsel %vm2255_vm6, %v8721_v16, %v8720_v20  ;;  %v2742_v30 = vsel %vm2255_vm6, %v8724_v47, %v8723_v53  ;;  %v3256_v18 = vmul.f32 0.5, %v3064_v22  ;;  %4260 = vtanh.f32 %v3223_v28  ;;  %v8732_v16 = vld [vmem:[#allocation75_spill] sm:$0xff] }
 0x2a0   : > { %v3098_v42 = vmul.f32 0.044715, %v3066_v27  ;;  %v3316_v44 = vadd.f32 1.0, %v4257_v9  ;;  %v7239_v24 = vmul.f32 %v3317_v56, %v3253_v63  ;;  %4262 = vtanh.f32 %v3224_v34  ;;  %v8733_v9 = vld [vmem:[#allocation147_spill] sm:$0xff]  ;;  %v8734_v56 = vld [vmem:[#allocation148_spill] sm:$0xff] }
 0x2a1   : > { %v3129_v45 = vmul.f32 %v3097_v59, %v3065_v40  ;;  %v7241_v32 = vmul.f32 0.5, %v3065_v40  ;;  %v2827_v39 = vadd.f32 %v2740_v25, %v2628_v17  ;;  %v2828_v5 = vadd.f32 %v2742_v30, %v2629_v1  ;;  %v8731_v1 = vld [vmem:[#allocation67_spill] sm:$0xff]  ;;  %v8735_v59 = vld [vmem:[#allocation32_spill] sm:$0xff] }
 0x2a2   : > { %v3130_v0 = vmul.f32 %v3098_v42, %v3066_v27  ;;  %v3380_v60 = vpack.c.bf16 %v7237_v41, %v7239_v24  ;;  %v8726_v19 = vrot.slane %v8725_v3, 1  ;;  %v8728_v22 = vrot.slane %v8727_v13, 1  ;;  %v8736_v42 = vld [vmem:[#allocation143_spill] sm:$0xff] }
 0x2a3   : > { %v3161_v2 = vmul.f32 %v3129_v45, %v3065_v40  ;;  %v8730_v34 = vrot.slane %v8706_v61, 1  ;;  %v2895_v20 = vadd.f32 %v8731_v1, %v2827_v39  ;;  %v2896_v25 = vadd.f32 %v8732_v16, %v2828_v5  ;;  %v8740_v5 = vld [vmem:[#allocation163_spill] sm:$0xff] }
 0x2a4   : > { %v2973_v28 = vsel %vm2951_vm4, %v8728_v22, %v8726_v19  ;;  %v8729_v63 = vmov %v8728_v22  ;;  %v3162_v17 = vmul.f32 %v3130_v0, %v3066_v27  ;;  %v2363_v41 = vadd.f32 %v8734_v56, %v8733_v9  ;;  %v8737_v19 = vld [vmem:[#allocation141_spill] sm:$0xff] }
 0x2a5   : > { %v2974_v62 = vsel %vm2951_vm4, %v8730_v34, %v8729_v63  ;;  %v3193_v47 = vadd.f32 %v3161_v2, %v3065_v40  ;;  %v2997_v30 = vmul.f32 %v7207_v48, %v2973_v28  ;;  %v2432_v24 = vadd.f32 %v8736_v42, %v8735_v59  ;;  %v8743_v34 = vld [vmem:[#allocation130_spill] sm:$0xff] }
 0x2a6   : > { %v2996_v53 = vmul.f32 %v7207_v48, %v2974_v62  ;;  %v3194_v61 = vadd.f32 %v3162_v17, %v3066_v27  ;;  %v8738_v13 = vrot.slane %v8737_v19, 1  ;;  %v8739_v0 = vrot.slane %v8714_v7, 1 }
 0x2a7   : > { %v8741_v22 = vrot.slane %v8740_v5, 1  ;;  %v3225_v28 = vmul.f32 0.7978846, %v3193_v47  ;;  %v3029_v63 = vadd.f32 %v2997_v30, %v2896_v25  ;;  %v2431_v62 = vadd.f32 %v8743_v34, %v2363_v41  ;;  %v4259_v25 = vpop.eup %4258 }
 0x2a8   : > { %v3028_v45 = vadd.f32 %v2996_v53, %v2895_v20  ;;  %v2545_v39 = vsel %vm2055_vm5, %v8739_v0, %v8738_v13  ;;  %v8742_v40 = vmov %v8738_v13  ;;  %v3226_v16 = vmul.f32 0.7978846, %v3194_v61  ;;  %v8744_v20 = vld [vmem:[#allocation164_spill] sm:$0xff] }
 0x2a9   : > { %v2547_v2 = vsel %vm2055_vm5, %v8742_v40, %v8741_v22  ;;  %v8745_v53 = vrot.slane %v8744_v20, 7  ;;  %v8746_v7 = vrot.slane %v8722_v46, 7  ;;  %v8747_v56 = vrot.slane %v7014_v8, 7 }
 0x2aa   : > { %v2631_v1 = vadd.f32 %v2547_v2, %v2432_v24  ;;  %v7277_v17 = vadd.f32 %v7089_v58, %v3028_v45  ;;  %4264 = vtanh.f32 %v3225_v28  ;;  %v3068_v30 = vadd.f32 %v7089_v58, %v3029_v63  ;;  %v4261_v24 = vpop.eup %4260 }
 0x2ab   : > { %v2744_v9 = vsel %vm2255_vm6, %v8746_v7, %v8745_v53  ;;  %v8748_v59 = vmov %v8745_v53  ;;  %v2630_v41 = vadd.f32 %v2545_v39, %v2431_v62  ;;  %v3315_v61 = vadd.f32 1.0, %v4259_v25  ;;  %v4263_v19 = vpop.eup %4262 }
 0x2ac   : > { %v2746_v47 = vsel %vm2255_vm6, %v8748_v59, %v8747_v56  ;;  %v3258_v45 = vmul.f32 0.5, %v3066_v27  ;;  %4266 = vtanh.f32 %v3226_v16  ;;  %v3099_v46 = vmul.f32 0.044715, %v7277_v17  ;;  %v8750_v16 = vld [vmem:[#allocation157_spill] sm:$0xff] }
 0x2ad   : > { %v2830_v42 = vadd.f32 %v2746_v47, %v2631_v1  ;;  %v3348_v13 = vmul.f32 %v3316_v44, %v7184_v4  ;;  %v3319_v0 = vadd.f32 1.0, %v4261_v24  ;;  %v3100_v22 = vmul.f32 0.044715, %v3068_v30  ;;  %v8749_v1 = vld [vmem:[#allocation85_spill] sm:$0xff]  ;;  %v8757_v24 = vld [vmem:[#allocation84_spill] sm:$0xff] }
 0x2ae   : > { %v2829_v40 = vadd.f32 %v2744_v9, %v2630_v41  ;;  %v3347_v2 = vmul.f32 %v3315_v61, %v7182_v6  ;;  %v3320_v34 = vadd.f32 1.0, %v4263_v19  ;;  %v3131_v28 = vmul.f32 %v3099_v46, %v7277_v17  ;;  %v8760_v19 = vld [vmem:[#allocation165_spill] sm:$0xff] }
 0x2af   : > { %v2898_v39 = vadd.f32 %v7000_v51, %v2830_v42  ;;  %v3351_v63 = vmul.f32 %v3319_v0, %v3255_v54  ;;  %v3132_v62 = vmul.f32 %v3100_v22, %v3068_v30  ;;  %v8751_v20 = vrot.slane %v8750_v16, 1 }
 0x2b0   : > { %v2897_v27 = vadd.f32 %v8749_v1, %v2829_v40  ;;  %v8752_v53 = vrot.slane %v6915_v49, 1  ;;  %v3379_v44 = vpack.c.bf16 %v3348_v13, %v3347_v2  ;;  %v3352_v7 = vmul.f32 %v3320_v34, %v3256_v18  ;;  %v8761_v34 = vld [vmem:[#allocation156_spill] sm:$0xff] }
 0x2b1   : > { %v3163_v6 = vmul.f32 %v3131_v28, %v7277_v17  ;;  %v8754_v56 = vrot.slane %v8725_v3, 1  ;;  %v3164_v54 = vmul.f32 %v3132_v62, %v3068_v30  ;;  %v8755_v25 = vrot.slane %v6996_v23, 1 }
 0x2b2   : > { %v2971_v4 = vsel %vm2951_vm4, %v8752_v53, %v8751_v20  ;;  %v8753_v9 = vmov %v8752_v53  ;;  %v8756_v41 = vrot.slane %v8740_v5, 1  ;;  %4071 = vmatprep.mubr.bf16.mxu0 %v3379_v44  ;;  %v3381_v42 = vpack.c.bf16 %v3352_v7, %v3351_v63 }
 0x2b3   : > { %v2972_v51 = vsel %vm2951_vm4, %v8754_v56, %v8753_v9  ;;  %v2999_v47 = vmul.f32 %v7207_v48, %v2971_v4  ;;  %v3195_v49 = vadd.f32 %v3163_v6, %v7277_v17  ;;  %v8758_v3 = vrot.slane %v8757_v24, 1  ;;  %4072 = vmatmul.mubr.bf16.vlgmr.msra.gmra.mrb[16].mxu0 %v3380_v60  ;;  %v8766_v60 = vld [vmem:[#allocation50_spill] sm:$0xff] }
 0x2b4   : > { %v2998_v59 = vmul.f32 %v7207_v48, %v2972_v51  ;;  %v2549_v18 = vsel %vm2055_vm5, %v8756_v41, %v8755_v25  ;;  %v8759_v61 = vmov %v8755_v25  ;;  %v3196_v0 = vadd.f32 %v3164_v54, %v3068_v30  ;;  %4075 = vmatprep.mubr.bf16.mxu0 %v3381_v42  ;;  %v4265_v4 = vpop.eup %4264 }
 0x2b5   : > { %v2551_v46 = vsel %vm2055_vm5, %v8759_v61, %v8758_v3  ;;  %v2632_v13 = vadd.f32 %v2549_v18, %v8760_v19  ;;  %v3031_v40 = vadd.f32 %v2999_v47, %v2898_v39  ;;  %v3227_v2 = vmul.f32 0.7978846, %v3195_v49  ;;  %v8772_v61 = vld [vmem:[#allocation158_spill] sm:$0xff] }
 0x2b6   : > { %v3030_v22 = vadd.f32 %v2998_v59, %v2897_v27  ;;  %v2633_v5 = vadd.f32 %v2551_v46, %v7043_v52  ;;  %v8762_v28 = vrot.slane %v8761_v34, 7  ;;  %v8763_v63 = vrot.slane %v7014_v8, 7  ;;  %v8768_v27 = vld [vmem:[#allocation86_spill] sm:$0xff]  ;;  %v4267_v9 = vpop.eup %4266 }
 0x2b7   : > { %v8764_v23 = vrot.slane %v6898_v10, 7  ;;  %v8767_v53 = vrot.slane %v8766_v60, 1  ;;  %v8769_v39 = vrot.slane %v8768_v27, 1  ;;  %v3228_v44 = vmul.f32 0.7978846, %v3196_v0  ;;  %v8774_v34 = vld [vmem:[#allocation54_spill] sm:$0xff] }
 0x2b8   : > { %v2748_v62 = vsel %vm2255_vm6, %v8763_v63, %v8762_v28  ;;  %v8765_v1 = vmov %v8762_v28  ;;  %v3069_v7 = vadd.f32 %v7089_v58, %v3030_v22  ;;  %v3070_v8 = vadd.f32 %v7089_v58, %v3031_v40  ;;  %v8773_v22 = vld [vmem:[#allocation169_spill] sm:$0xff]  ;;  %v8778_v27 = vld [vmem:[#allocation56_spill] sm:$0xff] }
 0x2b9   : > { %v2750_v20 = vsel %vm2255_vm6, %v8765_v1, %v8764_v23  ;;  %v2969_v52 = vsel %vm2951_vm4, %v8769_v39, %v8767_v53  ;;  %v2831_v6 = vadd.f32 %v2748_v62, %v2632_v13  ;;  %v3321_v56 = vadd.f32 1.0, %v4265_v4 }
 0x2ba   : > { %4268 = vtanh.f32 %v3227_v2  ;;  %v2832_v51 = vadd.f32 %v2750_v20, %v2633_v5  ;;  %v8770_v54 = vmov %v8769_v39  ;;  %v8771_v59 = vrot.slane %v8750_v16, 1  ;;  %v8777_v20 = vld [vmem:[#allocation82_spill] sm:$0xff] }
 0x2bb   : > { %v3322_v25 = vadd.f32 1.0, %v4267_v9  ;;  %4270 = vtanh.f32 %v3228_v44  ;;  %v3101_v41 = vmul.f32 0.044715, %v3069_v7  ;;  %v3102_v18 = vmul.f32 0.044715, %v3070_v8  ;;  %v8781_v44 = vld [vmem:[#allocation60_spill] sm:$0xff] }
 0x2bc   : > { %v2970_v47 = vsel %vm2951_vm4, %v8771_v59, %v8770_v54  ;;  %v3353_v42 = vmul.f32 %v3321_v56, %v7241_v32  ;;  %v3259_v49 = vmul.f32 0.5, %v7277_v17  ;;  %v3260_v3 = vmul.f32 0.5, %v3068_v30  ;;  %v8784_v59 = vld [vmem:[#allocation94_spill] sm:$0xff] }
 0x2bd   : > { %v2899_v46 = vadd.f32 %v8772_v61, %v2831_v6  ;;  %v3354_v19 = vmul.f32 %v3322_v25, %v3258_v45  ;;  %v3133_v13 = vmul.f32 %v3101_v41, %v3069_v7  ;;  %v3134_v0 = vmul.f32 %v3102_v18, %v3070_v8  ;;  %v8787_v61 = vld [vmem:[#allocation41_spill] sm:$0xff] }
 0x2be   : > { %v2900_v40 = vadd.f32 %v8773_v22, %v2832_v51  ;;  %v3000_v16 = vmul.f32 %v7207_v48, %v2970_v47  ;;  %v3001_v5 = vmul.f32 %v7207_v48, %v2969_v52  ;;  %v2367_v2 = vadd.f32 %v7024_v11, %v6991_v37 }
 0x2bf   : > { %v2436_v32 = vadd.f32 %v8774_v34, %v7057_v43  ;;  %v3382_v28 = vpack.c.bf16 %v3354_v19, %v3353_v42  ;;  %v3165_v17 = vmul.f32 %v3133_v13, %v3069_v7  ;;  %v3166_v30 = vmul.f32 %v3134_v0, %v3070_v8  ;;  %v8789_v19 = vld [vmem:[#allocation89_spill] sm:$0xff] }
 0x2c0   : > { %v8775_v63 = vrot.slane %v6868_v21, 1  ;;  %v8776_v45 = vrot.slane %v8757_v24, 1  ;;  %v3032_v23 = vadd.f32 %v3000_v16, %v2899_v46  ;;  %v3033_v1 = vadd.f32 %v3001_v5, %v2900_v40 }
 0x2c1   : > { %v2435_v53 = vadd.f32 %v8777_v20, %v2367_v2  ;;  %v8779_v39 = vrot.slane %v8778_v27, 1  ;;  %4076 = vmatmul.mubr.bf16.gmra.mrb[20].mxu0 %v3382_v28  ;;  %v3197_v43 = vadd.f32 %v3165_v17, %v3069_v7  ;;  %v3198_v52 = vadd.f32 %v3166_v30, %v3070_v8  ;;  %v8791_v28 = vld [vmem:[#allocation99_spill] sm:$0xff] }
 0x2c2   : > { %v2553_v62 = vsel %vm2055_vm5, %v8776_v45, %v8775_v63  ;;  %v8780_v37 = vmov %v8775_v63  ;;  %v8782_v6 = vrot.slane %v8781_v44, 7  ;;  %v8783_v24 = vrot.slane %v6898_v10, 7 }
 0x2c3   : > { %v2555_v11 = vsel %vm2055_vm5, %v8780_v37, %v8779_v39  ;;  %v3071_v56 = vadd.f32 %v7089_v58, %v3032_v23  ;;  %v3072_v51 = vadd.f32 %v7089_v58, %v3033_v1  ;;  %v2634_v54 = vadd.f32 %v2553_v62, %v2435_v53  ;;  %v8792_v23 = vld [vmem:[#allocation65_spill] sm:$0xff]  ;;  %v4250_v39 = vld [vmem:[%s4919_s21] sm:$0xff]   ;;  %s3899_s21 = sshll.u32 %s8956_s14, 12 }
 0x2c4   : > { %v2635_v4 = vadd.f32 %v2555_v11, %v2436_v32  ;;  %v2752_v9 = vsel %vm2255_vm6, %v8783_v24, %v8782_v6  ;;  %v8785_v47 = vrot.slane %v8784_v59, 7  ;;  %v8786_v21 = vmov %v8782_v6  ;;  %v4269_v0 = vpop.eup %4268  ;;  %v8796_v6 = vld [vmem:[#allocation98_spill] sm:$0xff]  ;;  %s7919_s22 = scalar_lea.hbm %s8958_s1, %s3899_s21 }
 0x2c5   : > { %v3229_v41 = vmul.f32 0.7978846, %v3197_v43  ;;  %v3230_v18 = vmul.f32 0.7978846, %v3198_v52  ;;  %v8788_v46 = vrot.slane %v8787_v61, 1  ;;  %v8790_v10 = vrot.slane %v8789_v19, 1  ;;  %v4271_v2 = vpop.eup %4270 }
 0x2c6   : > { %v2754_v25 = vsel %vm2255_vm6, %v8786_v21, %v8785_v47  ;;  %v7387_v22 = vmul.f32 0.5, %v3069_v7  ;;  %v7389_v40 = vmul.f32 0.5, %v3070_v8  ;;  %v3103_v16 = vmul.f32 0.044715, %v3071_v56  ;;  %v8797_v21 = vld [vmem:[#allocation43_spill] sm:$0xff] }
 0x2c7   : > { %v2834_v42 = vadd.f32 %v2754_v25, %v2635_v4  ;;  %v2967_v13 = vsel %vm2951_vm4, %v8790_v10, %v8788_v46  ;;  %v3104_v5 = vmul.f32 0.044715, %v3072_v51  ;;  %v3323_v34 = vadd.f32 1.0, %v4269_v0 }
 0x2c8   : > { %4272 = vtanh.f32 %v3229_v41  ;;  %v2833_v32 = vadd.f32 %v2752_v9, %v2634_v54  ;;  %v3324_v30 = vadd.f32 1.0, %v4271_v2  ;;  %v3135_v63 = vmul.f32 %v3103_v16, %v3071_v56  ;;  %v8798_v41 = vld [vmem:[#allocation93_spill] sm:$0xff]  ;;  %v4318_v2 = vld [vmem:[#allocation9] sm:$0xff]  }
 0x2c9   : > { %v2902_v17 = vadd.f32 %v8791_v28, %v2834_v42  ;;  %4274 = vtanh.f32 %v3230_v18  ;;  %v3136_v45 = vmul.f32 %v3104_v5, %v3072_v51  ;;  %v3355_v62 = vmul.f32 %v3323_v34, %v3259_v49  ;;  %v8795_v49 = vld [vmem:[#allocation96_spill] sm:$0xff] }
 0x2ca   : > { %v2901_v1 = vadd.f32 %v8792_v23, %v2833_v32  ;;  %v8793_v7 = vmov %v8790_v10  ;;  %v8794_v8 = vrot.slane %v8766_v60, 1  ;;  %v3003_v53 = vmul.f32 %v7207_v48, %v2967_v13  ;;  %v8804_v32 = vld [vmem:[#allocation62_spill] sm:$0xff] }
 0x2cb   : > { %v3356_v37 = vmul.f32 %v3324_v30, %v3260_v3  ;;  %v3167_v11 = vmul.f32 %v3135_v63, %v3071_v56  ;;  %v3168_v43 = vmul.f32 %v3136_v45, %v3072_v51  ;;  %v2169_v44 = vadd.f32 %v8795_v49, %v7030_v14  ;;  %v8808_v23 = vld [vmem:[#allocation78_spill] sm:$0xff] }
 0x2cc   : > { %v2968_v20 = vsel %vm2951_vm4, %v8794_v8, %v8793_v7  ;;  %v3035_v4 = vadd.f32 %v3003_v53, %v2902_v17  ;;  %v2438_v24 = vadd.f32 %v8796_v6, %v6917_v31  ;;  %vm4574_vm3 = vmmov 0   ;;  %v8801_v31 = vld [vmem:[#allocation45_spill] sm:$0xff]  ;;  %v8805_v17 = vld [vmem:[#allocation48_spill] sm:$0xff] }
 0x2cd   : > { %v3002_v52 = vmul.f32 %v7207_v48, %v2968_v20  ;;  %v3383_v9 = vpack.c.bf16 %v3356_v37, %v3355_v62  ;;  %v3199_v60 = vadd.f32 %v3167_v11, %v3071_v56  ;;  %v3200_v54 = vadd.f32 %v3168_v43, %v3072_v51  ;;  %4031 = vmatprep.mubr.msk.bf16.mxu1 %vm4574_vm3, %v8617_v15  ;;  %v8811_v43 = vld [vmem:[#allocation114_spill] sm:$0xff] }
 0x2ce   : > { %v7409_v3 = vadd.f32 %v7089_v58, %v3035_v4  ;;  %v2369_v25 = vadd.f32 %v8797_v21, %v2169_v44  ;;  %v8799_v18 = vrot.slane %v8798_v41, 1  ;;  %v8800_v14 = vrot.slane %v8778_v27, 1  ;;  %4032 = vmatmul.mubr.bf16.vlgmr.msra.gmra.mrb[16].mxu1 %v4250_v39  ;;  %v8813_v4 = vld [vmem:[#allocation64_spill] sm:$0xff] }
 0x2cf   : > { %v3034_v47 = vadd.f32 %v3002_v52, %v2901_v1  ;;  %v8802_v46 = vrot.slane %v8801_v31, 1  ;;  %4079 = vmatprep.mubr.bf16.mxu0 %v3383_v9  ;;  %v3231_v13 = vmul.f32 0.7978846, %v3199_v60  ;;  %v3232_v0 = vmul.f32 0.7978846, %v3200_v54  ;;  %4036 = vmatpush3.bf16.msra.mxu1 %v4318_v2  ;;  %v4319_v60 = vld [vmem:[#allocation9 + $0x8] sm:$0xff]  }
 0x2d0   : > { %v2557_v42 = vsel %vm2055_vm5, %v8800_v14, %v8799_v18  ;;  %v8803_v19 = vmov %v8799_v18  ;;  %v7425_v34 = vmul.f32 0.5, %v3071_v56  ;;  %v3106_v27 = vmul.f32 0.044715, %v7409_v3  ;;  %4037 = vmatprep.subr.bf16.mxu1 %v8617_v15  ;;  %4051 = vmatprep.mubr.msk.bf16.mxu1 %vm4574_vm3, %v8617_v15 }
 0x2d1   : > { %v2559_v10 = vsel %vm2055_vm5, %v8803_v19, %v8802_v46  ;;  %v7423_v16 = vadd.f32 %v7089_v58, %v3034_v47  ;;  %v2437_v28 = vadd.f32 %v8804_v32, %v2369_v25  ;;  %v8806_v30 = vrot.slane %v8805_v17, 7  ;;  %v8817_v25 = vld [vmem:[#allocation90_spill] sm:$0xff] }
 0x2d2   : > { %v2637_v5 = vadd.f32 %v2559_v10, %v2438_v24  ;;  %v8807_v63 = vrot.slane %v8784_v59, 7  ;;  %v7437_v62 = vmul.f32 0.5, %v3072_v51  ;;  %4276 = vtanh.f32 %v3231_v13  ;;  %v4273_v20 = vpop.eup %4272  ;;  %v8818_v10 = vld [vmem:[#allocation49_spill] sm:$0xff] }
 0x2d3   : > { %v3105_v56 = vmul.f32 0.044715, %v7423_v16  ;;  %v8809_v1 = vrot.slane %v8808_v23, 7  ;;  %v8810_v7 = vmov %v8806_v30  ;;  %4278 = vtanh.f32 %v3232_v0  ;;  %v4275_v37 = vpop.eup %4274  ;;  %4038 = vmatpush3.bf16.msra.mxu1 %v4319_v60  ;;  %v8819_v0 = vld [vmem:[#allocation59_spill] sm:$0xff] }
 0x2d4   : > { %v2756_v45 = vsel %vm2255_vm6, %v8807_v63, %v8806_v30  ;;  %v3138_v59 = vmul.f32 %v3106_v27, %v7409_v3  ;;  %v2636_v53 = vadd.f32 %v2557_v42, %v2437_v28  ;;  %v3325_v11 = vadd.f32 1.0, %v4273_v20  ;;  %4039 = vmatprep.subr.bf16.mxu1 %v8617_v15  ;;  %v8821_v28 = vld [vmem:[#allocation108_spill] sm:$0xff]  ;;  %v8823_v30 = vld [vmem:[#allocation77_spill] sm:$0xff] }
 0x2d5   : > { %v2758_v8 = vsel %vm2255_vm6, %v8810_v7, %v8809_v1  ;;  %v3137_v51 = vmul.f32 %v3105_v56, %v7423_v16  ;;  %v8812_v52 = vrot.slane %v8811_v43, 1  ;;  %v8814_v49 = vrot.slane %v8813_v4, 1  ;;  %v8826_v20 = vld [vmem:[#allocation97_spill] sm:$0xff] }
 0x2d6   : > { %v2836_v39 = vadd.f32 %v2758_v8, %v2637_v5  ;;  %v8816_v24 = vrot.slane %v8787_v61, 1  ;;  %v3326_v54 = vadd.f32 1.0, %v4275_v37  ;;  %v3170_v47 = vmul.f32 %v3138_v59, %v7409_v3  ;;  %v8820_v5 = vld [vmem:[#allocation95_spill] sm:$0xff]  ;;  %v8827_v37 = vld [vmem:[#allocation68_spill] sm:$0xff] }
 0x2d7   : > { %v2965_v44 = vsel %vm2951_vm4, %v8814_v49, %v8812_v52  ;;  %v8815_v6 = vmov %v8814_v49  ;;  %v2835_v21 = vadd.f32 %v2756_v45, %v2636_v53  ;;  %v3357_v18 = vmul.f32 %v3325_v11, %v7387_v22  ;;  %v8822_v22 = vld [vmem:[#allocation76_spill] sm:$0xff]  ;;  %v8830_v52 = vld [vmem:[#allocation79_spill] sm:$0xff] }
 0x2d8   : > { %v2966_v9 = vsel %vm2951_vm4, %v8816_v24, %v8815_v6  ;;  %v2904_v41 = vadd.f32 %v8817_v25, %v2836_v39  ;;  %v3169_v14 = vmul.f32 %v3137_v51, %v7423_v16  ;;  %v3005_v61 = vmul.f32 %v7207_v48, %v2965_v44  ;;  %v8833_v24 = vld [vmem:[#allocation47_spill] sm:$0xff]  ;;  %v8834_v25 = vld [vmem:[#allocation66_spill] sm:$0xff] }
 0x2d9   : > { %v3004_v42 = vmul.f32 %v7207_v48, %v2966_v9  ;;  %v3358_v46 = vmul.f32 %v3326_v54, %v7389_v40  ;;  %v3202_v19 = vadd.f32 %v3170_v47, %v7409_v3  ;;  %v2903_v13 = vadd.f32 %v8818_v10, %v2835_v21  ;;  %v4320_v40 = vld [vmem:[#allocation9 + $0x10] sm:$0xff]  }
 0x2da   : > { %v2171_v2 = vadd.f32 %v8820_v5, %v8819_v0  ;;  %v3201_v27 = vadd.f32 %v3169_v14, %v7423_v16  ;;  %v3037_v32 = vadd.f32 %v3005_v61, %v2904_v41  ;;  %v2440_v17 = vadd.f32 %v8822_v22, %v8821_v28  ;;  %4040 = vmatpush3.bf16.msra.mxu1 %v4320_v40  ;;  %v4321_v14 = vld [vmem:[#allocation9 + $0x18] sm:$0xff]   ;;  %v8837_v5 = vld [vmem:[#allocation107_spill] sm:$0xff] }
 0x2db   : > { %v8824_v63 = vrot.slane %v8823_v30, 1  ;;  %v8825_v45 = vrot.slane %v8801_v31, 1  ;;  %v3384_v1 = vpack.c.bf16 %v3358_v46, %v3357_v18  ;;  %v3234_v7 = vmul.f32 0.7978846, %v3202_v19  ;;  %4041 = vmatprep.subr.bf16.mxu1 %v8617_v15 }
 0x2dc   : > { %v3036_v8 = vadd.f32 %v3004_v42, %v2903_v13  ;;  %v2371_v59 = vadd.f32 %v8826_v20, %v2171_v2  ;;  %v3233_v53 = vmul.f32 0.7978846, %v3201_v27  ;;  %v7482_v39 = vadd.f32 %v7089_v58, %v3037_v32  ;;  %v4277_v54 = vpop.eup %4276  ;;  %v8839_v27 = vld [vmem:[#allocation33_spill] sm:$0xff]  ;;  %v4322_v20 = vld [vmem:[#allocation9 + $0x20] sm:$0xff]  }
 0x2dd   : > { %v2561_v56 = vsel %vm2055_vm5, %v8825_v45, %v8824_v63  ;;  %v8828_v11 = vrot.slane %v8827_v37, 1  ;;  %v8829_v51 = vmov %v8824_v63  ;;  %v8831_v4 = vrot.slane %v8830_v52, 7  ;;  %4080 = vmatmul.mubr.bf16.gmra.mrb[24].mxu0 %v3384_v1  ;;  %v4279_v42 = vpop.eup %4278  ;;  %v8843_v1 = vld [vmem:[#allocation127_spill] sm:$0xff] }
 0x2de   : > { %v8832_v49 = vrot.slane %v8808_v23, 7  ;;  %4280 = vtanh.f32 %v3234_v7  ;;  %v7495_v6 = vadd.f32 %v7089_v58, %v3036_v8  ;;  %v2439_v9 = vadd.f32 %v8833_v24, %v2371_v59  ;;  %4042 = vmatpush3.bf16.msra.mxu1 %v4321_v14  ;;  %v8844_v59 = vld [vmem:[#allocation52_spill] sm:$0xff] }
 0x2df   : > { %v2563_v31 = vsel %vm2055_vm5, %v8829_v51, %v8828_v11  ;;  %v7499_v47 = vmul.f32 0.5, %v7409_v3  ;;  %4282 = vtanh.f32 %v3233_v53  ;;  %v3108_v21 = vmul.f32 0.044715, %v7482_v39  ;;  %4043 = vmatprep.subr.bf16.mxu1 %v8617_v15 }
 0x2e0   : > { %v2760_v44 = vsel %vm2255_vm6, %v8832_v49, %v8831_v4  ;;  %v2639_v60 = vadd.f32 %v2563_v31, %v2440_v17  ;;  %v8835_v41 = vrot.slane %v8834_v25, 7  ;;  %v8836_v23 = vmov %v8831_v4  ;;  %v8848_v49 = vld [vmem:[#allocation110_spill] sm:$0xff] }
 0x2e1   : > { %v3327_v61 = vadd.f32 1.0, %v4277_v54  ;;  %v3265_v46 = vmul.f32 0.5, %v7423_v16  ;;  %v3107_v19 = vmul.f32 0.044715, %v7495_v6  ;;  %v2638_v10 = vadd.f32 %v2561_v56, %v2439_v9 }
 0x2e2   : > { %v2762_v18 = vsel %vm2255_vm6, %v8836_v23, %v8835_v41  ;;  %v3328_v3 = vadd.f32 1.0, %v4279_v42  ;;  %v3140_v13 = vmul.f32 %v3108_v21, %v7482_v39  ;;  %v8838_v2 = vrot.slane %v8837_v5, 1  ;;  %4044 = vmatpush3.bf16.msra.mxu1 %v4322_v20  ;;  %v8853_v42 = vld [vmem:[#allocation111_spill] sm:$0xff] }
 0x2e3   : > { %v2838_v0 = vadd.f32 %v2762_v18, %v2639_v60  ;;  %v8840_v32 = vrot.slane %v8839_v27, 1  ;;  %v3359_v22 = vmul.f32 %v3327_v61, %v7425_v34  ;;  %v3139_v16 = vmul.f32 %v3107_v19, %v7495_v6  ;;  %4045 = vmatprep.subr.bf16.mxu1 %v8617_v15  ;;  %v8851_v60 = vld [vmem:[#allocation115_spill] sm:$0xff]  ;;  %v8859_v27 = vld [vmem:[#allocation136_spill] sm:$0xff] }
 0x2e4   : > { %v2837_v17 = vadd.f32 %v2760_v44, %v2638_v10  ;;  %v8842_v63 = vrot.slane %v8811_v43, 1  ;;  %v3360_v56 = vmul.f32 %v3328_v3, %v7437_v62  ;;  %v3172_v40 = vmul.f32 %v3140_v13, %v7482_v39  ;;  %v8845_v43 = vld [vmem:[#allocation80_spill] sm:$0xff]  ;;  %v8856_v3 = vld [vmem:[#allocation121_spill] sm:$0xff] }
 0x2e5   : > { %v2963_v28 = vsel %vm2951_vm4, %v8840_v32, %v8838_v2  ;;  %v8841_v30 = vmov %v8840_v32  ;;  %v2906_v7 = vadd.f32 %v8843_v1, %v2838_v0  ;;  %v3171_v34 = vmul.f32 %v3139_v16, %v7495_v6 }
 0x2e6   : > { %v2964_v45 = vsel %vm2951_vm4, %v8842_v63, %v8841_v30  ;;  %v2905_v53 = vadd.f32 %v8844_v59, %v2837_v17  ;;  %v3007_v11 = vmul.f32 %v7207_v48, %v2963_v28  ;;  %v8846_v51 = vrot.slane %v8845_v43, 1  ;;  %v8861_v28 = vld [vmem:[#allocation53_spill] sm:$0xff]  ;;  %v4323_v17 = vld [vmem:[#allocation9 + $0x28] sm:$0xff]  }
 0x2e7   : > { %v3006_v8 = vmul.f32 %v7207_v48, %v2964_v45  ;;  %v8847_v31 = vrot.slane %v8827_v37, 1  ;;  %v3385_v52 = vpack.c.bf16 %v3360_v56, %v3359_v22  ;;  %v3204_v4 = vadd.f32 %v3172_v40, %v7482_v39  ;;  %v8852_v37 = vld [vmem:[#allocation126_spill] sm:$0xff]  ;;  %4046 = vmatpush3.bf16.msra.mxu1 %v4323_v17 }
 0x2e8   : > { %v8849_v44 = vrot.slane %v8848_v49, 1  ;;  %v8850_v24 = vmov %v8846_v51  ;;  %v3203_v21 = vadd.f32 %v3171_v34, %v7495_v6  ;;  %v3039_v23 = vadd.f32 %v3007_v11, %v2906_v7  ;;  %v4281_v30 = vpop.eup %4280  ;;  %4047 = vmatprep.subr.bf16.mxu1 %v8617_v15 }
 0x2e9   : > { %v2565_v62 = vsel %vm2055_vm5, %v8847_v31, %v8846_v51  ;;  %v3038_v41 = vadd.f32 %v3006_v8, %v2905_v53  ;;  %4083 = vmatprep.mubr.bf16.mxu0 %v3385_v52  ;;  %v3236_v14 = vmul.f32 0.7978846, %v3204_v4  ;;  %v8854_v61 = vrot.slane %v8853_v42, 7  ;;  %v4283_v40 = vpop.eup %4282  ;;  %v4324_v4 = vld [vmem:[#allocation9 + $0x30] sm:$0xff]  }
 0x2ea   : > { %v2567_v9 = vsel %vm2055_vm5, %v8850_v24, %v8849_v44  ;;  %v2640_v54 = vadd.f32 %v2565_v62, %v8851_v60  ;;  %v8855_v19 = vrot.slane %v8834_v25, 7  ;;  %v8857_v13 = vrot.slane %v8856_v3, 7  ;;  %v8865_v62 = vld [vmem:[#allocation112_spill] sm:$0xff] }
 0x2eb   : > { %v2641_v18 = vadd.f32 %v2567_v9, %v8852_v37  ;;  %v8858_v0 = vmov %v8854_v61  ;;  %v8860_v32 = vrot.slane %v8859_v27, 1  ;;  %v8862_v22 = vrot.slane %v8861_v28, 1  ;;  %4048 = vmatpush3.bf16.msra.mxu1 %v4324_v4  ;;  %v8866_v9 = vld [vmem:[#allocation83_spill] sm:$0xff]  ;;  %v8869_v37 = vld [vmem:[#allocation36_spill] sm:$0xff]  ;;  %v8874_v28 = vld [vmem:[#allocation109_spill] sm:$0xff] }
 0x2ec   : > { %v2764_v10 = vsel %vm2255_vm6, %v8855_v19, %v8854_v61  ;;  %v2766_v2 = vsel %vm2255_vm6, %v8858_v0, %v8857_v13  ;;  %v3235_v63 = vmul.f32 0.7978846, %v3203_v21  ;;  %v7564_v25 = vadd.f32 %v7089_v58, %v3038_v41  ;;  %4049 = vmatprep.subr.bf16.mxu1 %v8617_v15  ;;  %v8867_v41 = vld [vmem:[#allocation34_spill] sm:$0xff]  ;;  %v8871_v19 = vld [vmem:[#allocation119_spill] sm:$0xff]  ;;  %v4251_v0 = vld [vmem:[%s4925_s29] sm:$0xff]   ;;  %s3675_s29 = sshll.u32 %s7854_s13, 4  ;;  %s7921_s29 = int_to_ptr.vmem [resolvable:$true] %s3675_s29 }
 0x2ed   : > { %v2961_v16 = vsel %vm2951_vm4, %v8862_v22, %v8860_v32  ;;  %v7567_v45 = vadd.f32 %v7089_v58, %v3039_v23  ;;  %v2839_v56 = vadd.f32 %v2764_v10, %v2640_v54  ;;  %v3330_v1 = vadd.f32 1.0, %v4281_v30  ;;  %s4474_s12 = scalar_lea.vmem %s7921_s29, 4096  ;;  %p4481_p1 = scmp.lt.s32.totalorder %s7921_s29, %s4479_s27 }
 0x2ee   : > { %4284 = vtanh.f32 %v3236_v14  ;;  %v2840_v7 = vadd.f32 %v2766_v2, %v2641_v18  ;;  %v8863_v8 = vmov %v8862_v22  ;;  %v8864_v20 = vrot.slane %v8837_v5, 1  ;;  %v8870_v18 = vld [vmem:[#allocation120_spill] sm:$0xff]  ;;  %p4475_p2 = scmp.ne.s32.totalorder %s7921_s29, %s4474_s12  ;;  %p4482_p13 = scmp.lt.s32.totalorder %s4480_s20, %s4474_s12 }
 0x2ef   : > { %v3329_v59 = vadd.f32 1.0, %v4283_v40  ;;  %4286 = vtanh.f32 %v3235_v63  ;;  %v3109_v53 = vmul.f32 0.044715, %v7564_v25  ;;  %v3110_v11 = vmul.f32 0.044715, %v7567_v45 }
 0x2f0   : > { %v2962_v34 = vsel %vm2951_vm4, %v8864_v20, %v8863_v8  ;;  %v2777_v43 = vrot.slane %v7081_v33, 7  ;;  %v2946_v51 = vrot.slane %v6973_v29, 1  ;;  %v3362_v31 = vmul.f32 %v3330_v1, %v7499_v47  ;;  %v8868_v47 = vld [vmem:[#allocation35_spill] sm:$0xff]  ;;  %p4476_p0 = pnand %p4475_p2, %p8959_p11  ;;  %p4483_p5 = por %p4482_p13, %p4481_p1 }
 0x2f1   : > { %v2907_v52 = vadd.f32 %v8865_v62, %v2839_v56  ;;  %v3361_v5 = vmul.f32 %v3329_v59, %v3265_v46  ;;  %v3141_v44 = vmul.f32 %v3109_v53, %v7564_v25  ;;  %v3142_v24 = vmul.f32 %v3110_v11, %v7567_v45  ;;  %v4325_v56 = vld [vmem:[#allocation9 + $0x38] sm:$0xff]  }
 0x2f2   : > { %v2908_v60 = vadd.f32 %v8866_v9, %v2840_v7  ;;  %v3008_v54 = vmul.f32 %v7207_v48, %v2962_v34  ;;  %v3009_v21 = vmul.f32 %v7207_v48, %v2961_v16  ;;  %v2375_v23 = vadd.f32 %v8868_v47, %v8867_v41  ;;  %v8875_v16 = vld [vmem:[#allocation37_spill] sm:$0xff]  ;;  %4050 = vmatpush3.bf16.msra.mxu1 %v4325_v56  ;;  %v8878_v7 = vld [vmem:[#allocation138_spill] sm:$0xff]  ;;  %p4477_p8 = pneg %p4476_p0 }
 0x2f3   : > { %v2444_v14 = vadd.f32 %v8870_v18, %v8869_v37  ;;  %v3386_v42 = vpack.c.bf16 %v3362_v31, %v3361_v5  ;;  %v3173_v46 = vmul.f32 %v3141_v44, %v7564_v25  ;;  %v3174_v61 = vmul.f32 %v3142_v24, %v7567_v45  ;;  %v8881_v31 = vld [vmem:[#allocation152_spill] sm:$0xff]  ;;  %v8884_v9 = vld [vmem:[#allocation69_spill] sm:$0xff] }
 0x2f4   : > { %v8872_v10 = vrot.slane %v8871_v19, 1  ;;  %v8873_v13 = vrot.slane %v8848_v49, 1  ;;  %v3040_v2 = vadd.f32 %v3008_v54, %v2907_v52  ;;  %v3041_v32 = vadd.f32 %v3009_v21, %v2908_v60  ;;  %v8886_v60 = vld [vmem:[#allocation74_spill] sm:$0xff]  ;;  %p4484_p9 = pnand %p4483_p5, %p4477_p8 }
 0x2f5   : > { %v2443_v22 = vadd.f32 %v8874_v28, %v2375_v23  ;;  %v8876_v17 = vrot.slane %v8875_v16, 1  ;;  %4084 = vmatmul.mubr.bf16.gmra.mrb[28].mxu0 %v3386_v42  ;;  %v3205_v40 = vadd.f32 %v3173_v46, %v7564_v25  ;;  %v3206_v49 = vadd.f32 %v3174_v61, %v7567_v45  ;;  %4052 = vmatmul.mubr.bf16.vlgmr.msra.gmra.mrb[20].mxu1 %v4251_v0  ;;  %v8888_v61 = vld [vmem:[#allocation81_spill] sm:$0xff] }
 0x2f6   : > { %v2569_v15 = vsel %vm2055_vm5, %v8873_v13, %v8872_v10  ;;  %v8877_v30 = vmov %v8872_v10  ;;  %v8879_v8 = vrot.slane %v8878_v7, 7  ;;  %v8880_v20 = vrot.slane %v8856_v3, 7 }
 0x2f7   : > { %v2571_v63 = vsel %vm2055_vm5, %v8877_v30, %v8876_v17  ;;  %v7614_v59 = vadd.f32 %v7089_v58, %v3040_v2  ;;  %v7617_v53 = vadd.f32 %v7089_v58, %v3041_v32  ;;  %v2642_v11 = vadd.f32 %v2569_v15, %v2443_v22 }
 0x2f8   : > { %v2643_v1 = vadd.f32 %v2571_v63, %v2444_v14  ;;  %v2768_v34 = vsel %vm2255_vm6, %v8880_v20, %v8879_v8  ;;  %v8882_v62 = vrot.slane %v8881_v31, 7  ;;  %v8883_v52 = vmov %v8879_v8  ;;  %v4285_v41 = vpop.eup %4284 }
 0x2f9   : > { %v3237_v5 = vmul.f32 0.7978846, %v3205_v40  ;;  %v3238_v44 = vmul.f32 0.7978846, %v3206_v49  ;;  %v8885_v3 = vrot.slane %v8884_v9, 1  ;;  %v8887_v54 = vrot.slane %v8886_v60, 1  ;;  %v4287_v14 = vpop.eup %4286 }
 0x2fa   : > { %v2770_v4 = vsel %vm2255_vm6, %v8883_v52, %v8882_v62  ;;  %v3267_v47 = vmul.f32 0.5, %v7495_v6  ;;  %v3268_v23 = vmul.f32 0.5, %v7482_v39  ;;  %v3111_v37 = vmul.f32 0.044715, %v7614_v59  ;;  %v8889_v6 = vld [vmem:[#allocation39_spill] sm:$0xff]  ;;  %v8898_v62 = vld [vmem:[#allocation70_spill] sm:$0xff] }
 0x2fb   : > { %v2842_v24 = vadd.f32 %v2770_v4, %v2643_v1  ;;  %v2959_v21 = vsel %vm2951_vm4, %v8887_v54, %v8885_v3  ;;  %v3112_v18 = vmul.f32 0.044715, %v7617_v53  ;;  %v3332_v42 = vadd.f32 1.0, %v4285_v41  ;;  %v8892_v49 = vld [vmem:[#allocation151_spill] sm:$0xff] }
 0x2fc   : > { %4288 = vtanh.f32 %v3237_v5  ;;  %v2841_v46 = vadd.f32 %v2768_v34, %v2642_v11  ;;  %v3331_v10 = vadd.f32 1.0, %v4287_v14  ;;  %v3143_v13 = vmul.f32 %v3111_v37, %v7614_v59  ;;  %v8902_v41 = vld [vmem:[#allocation155_spill] sm:$0xff] }
 0x2fd   : > { %v2910_v19 = vadd.f32 %v8888_v61, %v2842_v24  ;;  %4290 = vtanh.f32 %v3238_v44  ;;  %v3144_v15 = vmul.f32 %v3112_v18, %v7617_v53  ;;  %v3364_v0 = vmul.f32 %v3332_v42, %v3268_v23  ;;  %v8903_v23 = vld [vmem:[#allocation145_spill] sm:$0xff]  ;;  %v8906_v61 = vld [vmem:[#allocation167_spill] sm:$0xff] }
 0x2fe   : > { %v2909_v2 = vadd.f32 %v8889_v6, %v2841_v46  ;;  %v8890_v39 = vmov %v8887_v54  ;;  %v8891_v32 = vrot.slane %v8859_v27, 1  ;;  %v3011_v22 = vmul.f32 %v7207_v48, %v2959_v21  ;;  %v8895_v27 = vld [vmem:[#allocation131_spill] sm:$0xff]  ;;  %v8901_v54 = vld [vmem:[#allocation140_spill] sm:$0xff] }
 0x2ff   : > { %v3363_v17 = vmul.f32 %v3331_v10, %v3267_v47  ;;  %v3175_v30 = vmul.f32 %v3143_v13, %v7614_v59  ;;  %v3176_v63 = vmul.f32 %v3144_v15, %v7617_v53  ;;  %v8893_v1 = vrot.slane %v8892_v49, 1  ;;  %v8908_v10 = vld [vmem:[#allocation73_spill] sm:$0xff]  ;;  %v8913_v49 = vld [vmem:[#allocation146_spill] sm:$0xff] }
 0x300   : > { %v2960_v28 = vsel %vm2951_vm4, %v8891_v32, %v8890_v39  ;;  %v3043_v40 = vadd.f32 %v3011_v22, %v2910_v19  ;;  %v8894_v7 = vrot.slane %v8875_v16, 1  ;;  %v8896_v20 = vrot.slane %v8895_v27, 1 }
 0x301   : > { %v3010_v56 = vmul.f32 %v7207_v48, %v2960_v28  ;;  %v8897_v34 = vmov %v8893_v1  ;;  %v8899_v52 = vrot.slane %v8898_v62, 7  ;;  %v8900_v4 = vrot.slane %v8881_v31, 7  ;;  %v8914_v62 = vld [vmem:[#allocation150_spill] sm:$0xff] }
 0x302   : > { %v2573_v8 = vsel %vm2055_vm5, %v8894_v7, %v8893_v1  ;;  %v2575_v11 = vsel %vm2055_vm5, %v8897_v34, %v8896_v20  ;;  %v3387_v44 = vpack.c.bf16 %v3364_v0, %v3363_v17  ;;  %v3207_v24 = vadd.f32 %v3175_v30, %v7614_v59 }
 0x303   : > { %v2772_v5 = vsel %vm2255_vm6, %v8900_v4, %v8899_v52  ;;  %v3208_v3 = vadd.f32 %v3176_v63, %v7617_v53  ;;  %v3042_v16 = vadd.f32 %v3010_v56, %v2909_v2  ;;  %v7666_v60 = vadd.f32 %v7089_v58, %v3043_v40  ;;  %v8912_v56 = vld [vmem:[#allocation134_spill] sm:$0xff] }
 0x304   : > { %v2644_v21 = vadd.f32 %v2573_v8, %v8901_v54  ;;  %v2645_v47 = vadd.f32 %v2575_v11, %v8902_v41  ;;  %v8904_v37 = vrot.slane %v8903_v23, 7  ;;  %v8905_v18 = vmov %v8899_v52  ;;  %4087 = vmatprep.mubr.bf16.mxu0 %v3387_v44  ;;  %v8915_v52 = vld [vmem:[#allocation153_spill] sm:$0xff]  ;;  %v8917_v44 = vld [vmem:[#allocation144_spill] sm:$0xff] }
 0x305   : > { %v3239_v14 = vmul.f32 0.7978846, %v3207_v24  ;;  %v3240_v42 = vmul.f32 0.7978846, %v3208_v3  ;;  %v7676_v46 = vadd.f32 %v7089_v58, %v3042_v16  ;;  %v8907_v19 = vrot.slane %v8906_v61, 1 }
 0x306   : > { %v2774_v31 = vsel %vm2255_vm6, %v8905_v18, %v8904_v37  ;;  %v8909_v13 = vrot.slane %v8908_v10, 1  ;;  %v3269_v0 = vmul.f32 0.5, %v7564_v25  ;;  %v3114_v6 = vmul.f32 0.044715, %v7666_v60  ;;  %v4289_v63 = vpop.eup %4288  ;;  %v8918_v37 = vld [vmem:[#allocation133_spill] sm:$0xff] }
 0x307   : > { %v2843_v2 = vadd.f32 %v2772_v5, %v2644_v21  ;;  %v2844_v39 = vadd.f32 %v2774_v31, %v2645_v47  ;;  %v3270_v32 = vmul.f32 0.5, %v7567_v45  ;;  %4292 = vtanh.f32 %v3239_v14  ;;  %v4291_v7 = vpop.eup %4290  ;;  %v8916_v5 = vld [vmem:[#allocation154_spill] sm:$0xff]  ;;  %v8919_v31 = vld [vmem:[#allocation40_spill] sm:$0xff] }
 0x308   : > { %v2957_v15 = vsel %vm2951_vm4, %v8909_v13, %v8907_v19  ;;  %v3113_v28 = vmul.f32 0.044715, %v7676_v46  ;;  %v8910_v22 = vmov %v8909_v13  ;;  %v8911_v17 = vrot.slane %v8884_v9, 1 }
 0x309   : > { %4294 = vtanh.f32 %v3240_v42  ;;  %v3146_v25 = vmul.f32 %v3114_v6, %v7666_v60  ;;  %v2911_v40 = vadd.f32 %v8912_v56, %v2843_v2  ;;  %v2912_v1 = vadd.f32 %v8913_v49, %v2844_v39 }
 0x30a   : > { %v2958_v30 = vsel %vm2951_vm4, %v8911_v17, %v8910_v22  ;;  %v3333_v45 = vadd.f32 1.0, %v4289_v63  ;;  %v3145_v8 = vmul.f32 %v3113_v28, %v7676_v46  ;;  %v3013_v34 = vmul.f32 %v7207_v48, %v2957_v15 }
 0x30b   : > { %v3012_v20 = vmul.f32 %v7207_v48, %v2958_v30  ;;  %v3334_v9 = vadd.f32 1.0, %v4291_v7  ;;  %v3178_v11 = vmul.f32 %v3146_v25, %v7666_v60  ;;  %v2379_v4 = vadd.f32 %v8915_v52, %v8914_v62  ;;  %v8925_v25 = vld [vmem:[#allocation166_spill] sm:$0xff] }
 0x30c   : > { %v2448_v24 = vadd.f32 %v8917_v44, %v8916_v5  ;;  %v3365_v3 = vmul.f32 %v3333_v45, %v3269_v0  ;;  %v3177_v16 = vmul.f32 %v3145_v8, %v7676_v46  ;;  %v3045_v21 = vadd.f32 %v3013_v34, %v2912_v1  ;;  %v8922_v0 = vld [vmem:[#allocation91_spill] sm:$0xff] }
 0x30d   : > { %v3044_v54 = vadd.f32 %v3012_v20, %v2911_v40  ;;  %v3366_v41 = vmul.f32 %v3334_v9, %v3270_v32  ;;  %v3210_v47 = vadd.f32 %v3178_v11, %v7666_v60  ;;  %v2447_v18 = vadd.f32 %v8918_v37, %v2379_v4 }
 0x30e   : > { %v8920_v14 = vrot.slane %v8919_v31, 1  ;;  %v8921_v42 = vrot.slane %v8895_v27, 1  ;;  %v3209_v10 = vadd.f32 %v3177_v16, %v7676_v46  ;;  %v7718_v15 = vadd.f32 %v7089_v58, %v3045_v21 }
 0x30f   : > { %v7715_v13 = vadd.f32 %v7089_v58, %v3044_v54  ;;  %v8923_v6 = vrot.slane %v8922_v0, 1  ;;  %v3388_v32 = vpack.c.bf16 %v3366_v41, %v3365_v3  ;;  %v3242_v28 = vmul.f32 0.7978846, %v3210_v47  ;;  %v8931_v3 = vld [vmem:[#allocation168_spill] sm:$0xff]  ;;  %v7776_v0 = vld [vmem:[%s7980_s6] ss:$0 sm:$0xff] }
 0x310   : > { %v2577_v19 = vsel %vm2055_vm5, %v8921_v42, %v8920_v14  ;;  %v8924_v2 = vmov %v8920_v14  ;;  %v3241_v17 = vmul.f32 0.7978846, %v3209_v10  ;;  %v3116_v63 = vmul.f32 0.044715, %v7718_v15  ;;  %v8934_v42 = vld [vmem:[#allocation160_spill] sm:$0xff] }
 0x311   : > { %v2579_v39 = vsel %vm2055_vm5, %v8924_v2, %v8923_v6  ;;  %v2646_v22 = vadd.f32 %v2577_v19, %v2447_v18  ;;  %v3115_v30 = vmul.f32 0.044715, %v7715_v13  ;;  %v8926_v56 = vrot.slane %v8925_v25, 7  ;;  %4088 = vmatmul.mubr.bf16.gmra.mrb[32].mxu0 %v3388_v32  ;;  %v4293_v8 = vpop.eup %4292 }
 0x312   : > { %v2647_v27 = vadd.f32 %v2579_v39, %v2448_v24  ;;  %v8927_v58 = vrot.slane %v8903_v23, 7  ;;  %v3271_v49 = vmul.f32 0.5, %v7614_v59  ;;  %v3272_v1 = vmul.f32 0.5, %v7617_v53 }
 0x313   : > { %4296 = vtanh.f32 %v3242_v28  ;;  %v8928_v7 = vmov %v8926_v56  ;;  %v3147_v20 = vmul.f32 %v3115_v30, %v7715_v13  ;;  %v3148_v23 = vmul.f32 %v3116_v63, %v7718_v15  ;;  %v4295_v9 = vpop.eup %4294  ;;  %v8939_v63 = vld [vmem:[#allocation101_spill] sm:$0xff] }
 0x314   : > { %v2776_v40 = vsel %vm2255_vm6, %v8927_v58, %v8926_v56  ;;  %v2778_v45 = vsel %vm2255_vm6, %v8928_v7, %v2777_v43  ;;  %4298 = vtanh.f32 %v3241_v17  ;;  %v3335_v11 = vadd.f32 1.0, %v4293_v8  ;;  %v8940_v56 = vld [vmem:[#allocation104_spill] sm:$0xff]  ;;  %v8941_v58 = vld [vmem:[#allocation173_spill] sm:$0xff]  ;;  %v8943_v8 = vld [vmem:[#allocation175_spill] sm:$0xff] }
 0x315   : > { %v2845_v34 = vadd.f32 %v2776_v40, %v2646_v22  ;;  %v2846_v62 = vadd.f32 %v2778_v45, %v2647_v27  ;;  %v8929_v59 = vrot.slane %v6705_v12, 1  ;;  %v8930_v52 = vrot.slane %v8906_v61, 1 }
 0x316   : > { %v3336_v5 = vadd.f32 1.0, %v4295_v9  ;;  %v3179_v44 = vmul.f32 %v3147_v20, %v7715_v13  ;;  %v3180_v24 = vmul.f32 %v3148_v23, %v7718_v15  ;;  %v3367_v12 = vmul.f32 %v3335_v11, %v3271_v49  ;;  %v8944_v11 = vld [vmem:[#allocation159_spill] sm:$0xff] }
 0x317   : > { %v2955_v53 = vsel %vm2951_vm4, %v2946_v51, %v8929_v59  ;;  %v2956_v4 = vsel %vm2951_vm4, %v8930_v52, %v2946_v51  ;;  %v2913_v16 = vadd.f32 %v8931_v3, %v2845_v34  ;;  %v2914_v54 = vadd.f32 %v7115_v38, %v2846_v62  ;;  %v8945_v59 = vld [vmem:[#allocation177_spill] sm:$0xff]  ;;  %v8946_v52 = vld [vmem:[#allocation178_spill] sm:$0xff] }
 0x318   : > { %v3014_v21 = vmul.f32 %v7207_v48, %v2956_v4  ;;  %v3015_v41 = vmul.f32 %v7207_v48, %v2955_v53  ;;  %v3368_v29 = vmul.f32 %v3336_v5, %v3272_v1  ;;  %v3211_v61 = vadd.f32 %v3179_v44, %v7715_v13  ;;  %v8937_v48 = vld [vmem:[#allocation55_spill] sm:$0xff]  ;;  %v8947_v5 = vld [vmem:[#allocation174_spill] sm:$0xff] }
 0x319   : > { %v3212_v47 = vadd.f32 %v3180_v24, %v7718_v15  ;;  %v8932_v51 = vrot.slane %v7041_v50, 1  ;;  %v8933_v37 = vmov %v8923_v6  ;;  %v8935_v19 = vrot.slane %v8934_v42, 1 }
 0x31a   : > { %v3046_v31 = vadd.f32 %v3014_v21, %v2913_v16  ;;  %v3047_v14 = vadd.f32 %v3015_v41, %v2914_v54  ;;  %v3389_v2 = vpack.c.bf16 %v3368_v29, %v3367_v12  ;;  %v3243_v39 = vmul.f32 0.7978846, %v3211_v61  ;;  %v8948_v16 = vld [vmem:[#allocation170_spill] sm:$0xff]  ;;  %v8949_v41 = vld [vmem:[#allocation171_spill] sm:$0xff] }
 0x31b   : > { %v2581_v18 = vsel %vm2055_vm5, %v8933_v37, %v8932_v51  ;;  %v8936_v38 = vmov %v8932_v51  ;;  %v3244_v32 = vmul.f32 0.7978846, %v3212_v47  ;;  %v8938_v50 = vrot.slane %v6709_v57, 7  ;;  %v8951_v47 = vld [vmem:[#allocation27_spill] sm:$0xff] }
 0x31c   : > { %v2583_v10 = vsel %vm2055_vm5, %v8936_v38, %v8935_v19  ;;  %v2648_v6 = vadd.f32 %v2581_v18, %v8937_v48  ;;  %v7779_v22 = vadd.f32 %v7776_v0, %v3046_v31  ;;  %v7782_v27 = vadd.f32 %v7776_v0, %v3047_v14  ;;  %4091 = vmatprep.mubr.bf16.mxu0 %v3389_v2  ;;  %v8952_v14 = vld [vmem:[#allocation176_spill] sm:$0xff] }
 0x31d   : > { %v2649_v28 = vadd.f32 %v2583_v10, %v7091_v55  ;;  %v2780_v17 = vsel %vm2255_vm6, %v2777_v43, %v8938_v50  ;;  %v2383_v55 = vadd.f32 %v7069_v36, %v7055_v35  ;;  %4300 = vtanh.f32 %v3243_v39  ;;  %v4297_v49 = vpop.eup %4296  ;;  %v8942_v36 = vld [vmem:[#allocation161_spill] sm:$0xff] }
 0x31e   : > { %v2847_v30 = vadd.f32 %v2780_v17, %v2648_v6  ;;  %v2452_v40 = vadd.f32 %v8941_v58, %v8940_v56  ;;  %v3274_v1 = vmul.f32 0.5, %v7666_v60  ;;  %4302 = vtanh.f32 %v3244_v32  ;;  %v4299_v43 = vpop.eup %4298  ;;  %v8953_v17 = vld [vmem:[#allocation42_spill] sm:$0xff] }
 0x31f   : > { %v2848_v25 = vadd.f32 %v8939_v63, %v2649_v28  ;;  %v3117_v57 = vmul.f32 0.044715, %v7779_v22  ;;  %v3118_v33 = vmul.f32 0.044715, %v7782_v27  ;;  %v3273_v7 = vmul.f32 0.5, %v7676_v46 }
 0x320   : > { %v3338_v35 = vadd.f32 1.0, %v4297_v49  ;;  %v2915_v45 = vadd.f32 %v8942_v36, %v2847_v30  ;;  %v3337_v23 = vadd.f32 1.0, %v4299_v43  ;;  %v2451_v60 = vadd.f32 %v8944_v11, %v2383_v55  ;;  %v8955_v30 = vld [vmem:[#allocation172_spill] sm:$0xff]  ;;  %v4327_v63 = vld [vmem:[%s7979_s5 + $0x8] ss:$0 sm:$0xff] }
 0x321   : > { %v2916_v20 = vadd.f32 %v8943_v8, %v2848_v25  ;;  %v3149_v34 = vmul.f32 %v3117_v57, %v7779_v22  ;;  %v3150_v9 = vmul.f32 %v3118_v33, %v7782_v27  ;;  %v2651_v44 = vadd.f32 %v8947_v5, %v2452_v40 }
 0x322   : > { %v3370_v62 = vmul.f32 %v3338_v35, %v3274_v1  ;;  %v3048_v53 = vadd.f32 %v8945_v59, %v2915_v45  ;;  %v3369_v46 = vmul.f32 %v3337_v23, %v3273_v7  ;;  %v2650_v12 = vadd.f32 %v8948_v16, %v2451_v60 }
 0x323   : > { %v3049_v4 = vadd.f32 %v8946_v52, %v2916_v20  ;;  %v3181_v24 = vmul.f32 %v3149_v34, %v7779_v22  ;;  %v3182_v3 = vmul.f32 %v3150_v9, %v7782_v27  ;;  %v8950_v29 = vrot.slane %v8949_v41, 7 }
 0x324   : > { %v7810_v54 = vadd.f32 %v7776_v0, %v3048_v53  ;;  %v2885_v51 = vmul.f32 0.0, %v8951_v47  ;;  %v3390_v37 = vpack.c.bf16 %v3370_v62, %v3369_v46  ;;  %v2849_v42 = vadd.f32 %v8952_v14, %v2650_v12 }
 0x325   : > { %v7813_v21 = vadd.f32 %v7776_v0, %v3049_v4  ;;  %v2850_v61 = vadd.f32 %v8950_v29, %v2651_v44  ;;  %v3213_v18 = vadd.f32 %v3181_v24, %v7779_v22  ;;  %v3214_v31 = vadd.f32 %v3182_v3, %v7782_v27 }
 0x326   : > { %v3275_v19 = vmul.f32 0.5, %v7715_v13  ;;  %v3119_v38 = vmul.f32 0.044715, %v7810_v54  ;;  %4092 = vmatmul.mubr.bf16.gmra.mrb[36].mxu0 %v3390_v37  ;;  %v2917_v2 = vadd.f32 %v2885_v51, %v2849_v42  ;;  %v8954_v55 = vrot.slane %v8953_v17, 1 }
 0x327   : > { %v3120_v10 = vmul.f32 0.044715, %v7813_v21  ;;  %v3245_v48 = vmul.f32 0.7978846, %v3213_v18  ;;  %v3246_v6 = vmul.f32 0.7978846, %v3214_v31  ;;  %v2918_v39 = vadd.f32 %v2885_v51, %v2850_v61  ;;  %v4301_v32 = vpop.eup %4300 }
 0x328   : > { %v3151_v28 = vmul.f32 %v3119_v38, %v7810_v54  ;;  %v2983_v13 = vsel %vm2951_vm4, %v8955_v30, %v8954_v55  ;;  %v3018_v25 = vmul.f32 %v4327_v63, %v8955_v30  ;;  %v4303_v56 = vpop.eup %4302  ;;  %v3276_v58 = vmul.f32 0.5, %v7718_v15 }
 0x329   : > { %v3152_v50 = vmul.f32 %v3120_v10, %v7813_v21  ;;  %v3339_v40 = vadd.f32 1.0, %v4301_v32  ;;  %4304 = vtanh.f32 %v3245_v48  ;;  %v3019_v49 = vmul.f32 %v4327_v63, %v2983_v13 }
 0x32a   : > { %v3340_v1 = vadd.f32 1.0, %v4303_v56  ;;  %4306 = vtanh.f32 %v3246_v6  ;;  %v3183_v57 = vmul.f32 %v3151_v28, %v7810_v54  ;;  %v3050_v26 = vadd.f32 %v3018_v25, %v2917_v2 }
 0x32b   : > { %v3184_v33 = vmul.f32 %v3152_v50, %v7813_v21  ;;  %v3051_v43 = vadd.f32 %v3019_v49, %v2918_v39  ;;  %v3371_v7 = vmul.f32 %v3339_v40, %v3275_v19  ;;  %v3277_v5 = vmul.f32 0.5, %v7779_v22 }
 0x32c   : > { %v3372_v35 = vmul.f32 %v3340_v1, %v3276_v58  ;;  %v3215_v36 = vadd.f32 %v3183_v57, %v7810_v54  ;;  %v3089_v8 = vadd.f32 %v7776_v0, %v3050_v26  ;;  %v3278_v46 = vmul.f32 0.5, %v7782_v27 }
 0x32d   : > { %v3216_v45 = vadd.f32 %v3184_v33, %v7813_v21  ;;  %v3090_v15 = vadd.f32 %v7776_v0, %v3051_v43  ;;  %v3279_v18 = vmul.f32 0.5, %v7810_v54  ;;  %v3280_v22 = vmul.f32 0.5, %v7813_v21  ;;  %v7850_v54 = vld [vmem:[%s7982_s8] ss:$0 sm:$0xff] }
 0x32e   : > { %v3391_v20 = vpack.c.bf16 %v3372_v35, %v3371_v7  ;;  %v3247_v23 = vmul.f32 0.7978846, %v3215_v36  ;;  %v3121_v9 = vmul.f32 0.044715, %v3089_v8  ;;  %v3281_v48 = vmul.f32 0.5, %v3089_v8 }
 0x32f   : > { %v3248_v34 = vmul.f32 0.7978846, %v3216_v45  ;;  %v3122_v11 = vmul.f32 0.044715, %v3090_v15  ;;  %v3282_v6 = vmul.f32 0.5, %v3090_v15 }
 0x330   : > { %4095 = vmatprep.mubr.bf16.mxu0 %v3391_v20  ;;  %4308 = vtanh.f32 %v3247_v23  ;;  %v3153_v60 = vmul.f32 %v3121_v9, %v3089_v8 }
 0x331   : > { %4310 = vtanh.f32 %v3248_v34  ;;  %v3154_v62 = vmul.f32 %v3122_v11, %v3090_v15 }
 0x332   : > { %v3185_v53 = vmul.f32 %v3153_v60, %v3089_v8 }
 0x333   : > { %v4305_v59 = vpop.eup %4304  ;;  %v3186_v52 = vmul.f32 %v3154_v62, %v3090_v15 }
 0x334   : > { %v4307_v4 = vpop.eup %4306  ;;  %v3341_v44 = vadd.f32 1.0, %v4305_v59  ;;  %v3217_v24 = vadd.f32 %v3185_v53, %v3089_v8 }
 0x335   : > { %v3342_v0 = vadd.f32 1.0, %v4307_v4  ;;  %v3218_v3 = vadd.f32 %v3186_v52, %v3090_v15 }
 0x336   : > { %v3373_v16 = vmul.f32 %v3341_v44, %v3277_v5  ;;  %v3249_v41 = vmul.f32 0.7978846, %v3217_v24 }
 0x337   : > { %v3374_v12 = vmul.f32 %v3342_v0, %v3278_v46  ;;  %v3250_v29 = vmul.f32 0.7978846, %v3218_v3 }
 0x338   : > { %4312 = vtanh.f32 %v3249_v41 }
 0x339   : > { %v3392_v61 = vpack.c.bf16 %v3374_v12, %v3373_v16  ;;  %4314 = vtanh.f32 %v3250_v29 }
 0x33a   : > { %v4309_v47 = vpop.eup %4308 }
 0x33b   : > { %v4311_v51 = vpop.eup %4310  ;;  %4096 = vmatmul.mubr.bf16.gmra.mrb[40].mxu0 %v3392_v61  ;;  %v3343_v37 = vadd.f32 1.0, %v4309_v47 }
 0x33c   : > { %v3344_v27 = vadd.f32 1.0, %v4311_v51 }
 0x33d   : > { %v3375_v31 = vmul.f32 %v3343_v37, %v3279_v18 }
 0x33e   : > { %v3376_v14 = vmul.f32 %v3344_v27, %v3280_v22 }
 0x340   : > { %v3393_v42 = vpack.c.bf16 %v3376_v14, %v3375_v31 }
 0x342   : > { %4099 = vmatprep.mubr.bf16.mxu0 %v3393_v42  ;;  %v4313_v19 = vpop.eup %4312 }
 0x343   : > { %v4315_v38 = vpop.eup %4314  ;;  %v3345_v10 = vadd.f32 1.0, %v4313_v19 }
 0x344   : > { %v3346_v2 = vadd.f32 1.0, %v4315_v38 }
 0x345   : > { %v3377_v39 = vmul.f32 %v3345_v10, %v3281_v48 }
 0x346   : > { %v3378_v32 = vmul.f32 %v3346_v2, %v3282_v6 }
 0x348   : > { %v3394_v28 = vpack.c.bf16 %v3378_v32, %v3377_v39 }
 0x34a   : > { %4100 = vmatmul.mubr.bf16.gmra.mrb[44].mxu0 %v3394_v28 }
 0x386   : > { %v4073_v21 = vpop.f32.mrb[16].mxu0 }
 0x387   : > { %v3509_v50 = vadd.f32 %v4073_v21, %v7850_v54  ;;  %v3500_v17 = vpop.f32.mrb[17].mxu0 }
 0x388   : > { %v3501_v55 = vadd.f32 %v7850_v54, %v3500_v17  ;;  %v4074_v30 = vpop.f32.mrb[18].mxu0 }
 0x389   : > { %3629 = vst [vmem:[%s7854_s13 + $0x10] sm:$0xff] %v3509_v50  ;;  %v3512_v13 = vadd.f32 %v4074_v30, %v7850_v54  ;;  %v3503_v63 = vpop.f32.mrb[19].mxu0 }
 0x38a   : > { %3627 = vst [vmem:[%s7854_s13] sm:$0xff] %v3501_v55  ;;  %v3504_v25 = vadd.f32 %v7850_v54, %v3503_v63 }
 0x38b   : > { %3630 = vst [vmem:[%s7854_s13 + $0x18] sm:$0xff] %v3512_v13 }
 0x38c   : > { %3628 = vst [vmem:[%s7854_s13 + $0x8] sm:$0xff] %v3504_v25 }
 0x394   : > { %v4077_v56 = vpop.f32.mrb[20].mxu0 }
 0x395   : > { %v3525_v58 = vadd.f32 %v4077_v56, %v7850_v54  ;;  %v3516_v40 = vpop.f32.mrb[21].mxu0 }
 0x396   : > { %v3517_v49 = vadd.f32 %v7850_v54, %v3516_v40  ;;  %v4078_v1 = vpop.f32.mrb[22].mxu0 }
 0x397   : > { %3633 = vst [vmem:[%s7854_s13 + $0x30] sm:$0xff] %v3525_v58  ;;  %v3528_v57 = vadd.f32 %v4078_v1, %v7850_v54  ;;  %v3519_v33 = vpop.f32.mrb[23].mxu0 }
 0x398   : > { %3631 = vst [vmem:[%s7854_s13 + $0x20] sm:$0xff] %v3517_v49  ;;  %v3520_v26 = vadd.f32 %v7850_v54, %v3519_v33 }
 0x399   : > { %3634 = vst [vmem:[%s7854_s13 + $0x38] sm:$0xff] %v3528_v57 }
 0x39a   : > { %3632 = vst [vmem:[%s7854_s13 + $0x28] sm:$0xff] %v3520_v26 }
 0x3a1   : > { %v953_v43 = vpop.f32.mrb[16].mxu1 }
 0x3a2   : > { %v4033_v7 = vpop.f32.mrb[17].mxu1 }
 0x3a3   : > { %v956_v35 = vpop.f32.mrb[18].mxu1 }
 0x3a4   : > { %v4034_v36 = vpop.f32.mrb[19].mxu1 }
 0x3b0   : > { %v4081_v45 = vpop.f32.mrb[24].mxu0 }
 0x3b1   : > { %v3541_v8 = vadd.f32 %v4081_v45, %v7850_v54  ;;  %v3532_v15 = vpop.f32.mrb[25].mxu0 }
 0x3b2   : > { %v3533_v20 = vadd.f32 %v7850_v54, %v3532_v15  ;;  %v4082_v23 = vpop.f32.mrb[26].mxu0 }
 0x3b3   : > { %3637 = vst [vmem:[%s7854_s13 + $0x50] sm:$0xff] %v3541_v8  ;;  %v3544_v34 = vadd.f32 %v4082_v23, %v7850_v54  ;;  %v3535_v9 = vpop.f32.mrb[27].mxu0 }
 0x3b4   : > { %3635 = vst [vmem:[%s7854_s13 + $0x40] sm:$0xff] %v3533_v20  ;;  %v3536_v11 = vadd.f32 %v7850_v54, %v3535_v9 }
 0x3b5   : > { %3638 = vst [vmem:[%s7854_s13 + $0x58] sm:$0xff] %v3544_v34 }
 0x3b6   : > { %3636 = vst [vmem:[%s7854_s13 + $0x48] sm:$0xff] %v3536_v11 }
 0x3c8   : > { %v4085_v60 = vpop.f32.mrb[28].mxu0  ;;  %v1002_v4 = vpop.f32.mrb[20].mxu1 }
 0x3c9   : > { %v3557_v62 = vadd.f32 %v4085_v60, %v7850_v54  ;;  %v3548_v59 = vpop.f32.mrb[29].mxu0  ;;  %v4053_v46 = vpop.f32.mrb[21].mxu1 }
 0x3ca   : > { %v3549_v53 = vadd.f32 %v7850_v54, %v3548_v59  ;;  %v4086_v52 = vpop.f32.mrb[30].mxu0  ;;  %v1005_v24 = vpop.f32.mrb[22].mxu1 }
 0x3cb   : > { %3641 = vst [vmem:[%s7854_s13 + $0x70] sm:$0xff] %v3557_v62  ;;  %v3560_v5 = vadd.f32 %v4086_v52, %v7850_v54  ;;  %v3551_v44 = vpop.f32.mrb[31].mxu0  ;;  %v4054_v3 = vpop.f32.mrb[23].mxu1 }
 0x3cc   : > { %3639 = vst [vmem:[%s7854_s13 + $0x60] sm:$0xff] %v3549_v53  ;;  %v3552_v0 = vadd.f32 %v7850_v54, %v3551_v44 }
 0x3cd   : > { %3642 = vst [vmem:[%s7854_s13 + $0x78] sm:$0xff] %v3560_v5 }
 0x3ce   : > { %3640 = vst [vmem:[%s7854_s13 + $0x68] sm:$0xff] %v3552_v0 }
 0x3e4   : > { %v4089_v16 = vpop.f32.mrb[32].mxu0 }
 0x3e5   : > { %v3573_v12 = vadd.f32 %v4089_v16, %v7850_v54  ;;  %v3564_v41 = vpop.f32.mrb[33].mxu0 }
 0x3e6   : > { %v3565_v29 = vadd.f32 %v7850_v54, %v3564_v41  ;;  %v4090_v61 = vpop.f32.mrb[34].mxu0 }
 0x3e7   : > { %3645 = vst [vmem:[%s7854_s13 + $0x90] sm:$0xff] %v3573_v12  ;;  %v3576_v47 = vadd.f32 %v4090_v61, %v7850_v54  ;;  %v3567_v51 = vpop.f32.mrb[35].mxu0 }
 0x3e8   : > { %3643 = vst [vmem:[%s7854_s13 + $0x80] sm:$0xff] %v3565_v29  ;;  %v3568_v37 = vadd.f32 %v7850_v54, %v3567_v51 }
 0x3e9   : > { %3646 = vst [vmem:[%s7854_s13 + $0x98] sm:$0xff] %v3576_v47 }
 0x3ea   : > { %3644 = vst [vmem:[%s7854_s13 + $0x88] sm:$0xff] %v3568_v37 }
 0x3f9   : > { %v4093_v18 = vpop.f32.mrb[36].mxu0 }
 0x3fa   : > { %v3589_v22 = vadd.f32 %v4093_v18, %v7850_v54  ;;  %v3580_v27 = vpop.f32.mrb[37].mxu0 }
 0x3fb   : > { %v3581_v31 = vadd.f32 %v7850_v54, %v3580_v27  ;;  %v4094_v14 = vpop.f32.mrb[38].mxu0 }
 0x3fc   : > { %3649 = vst [vmem:[%s7854_s13 + $0xb0] sm:$0xff] %v3589_v22  ;;  %v3592_v42 = vadd.f32 %v4094_v14, %v7850_v54  ;;  %v3583_v19 = vpop.f32.mrb[39].mxu0 }
 0x3fd   : > { %3647 = vst [vmem:[%s7854_s13 + $0xa0] sm:$0xff] %v3581_v31  ;;  %v3584_v38 = vadd.f32 %v7850_v54, %v3583_v19 }
 0x3fe   : > { %3650 = vst [vmem:[%s7854_s13 + $0xb8] sm:$0xff] %v3592_v42 }
 0x3ff   : > { %3648 = vst [vmem:[%s7854_s13 + $0xa8] sm:$0xff] %v3584_v38 }
 0x40e   : > { %v4097_v10 = vpop.f32.mrb[40].mxu0 }
 0x40f   : > { %v3605_v48 = vadd.f32 %v4097_v10, %v7850_v54  ;;  %v3596_v6 = vpop.f32.mrb[41].mxu0 }
 0x410   : > { %v3597_v2 = vadd.f32 %v7850_v54, %v3596_v6  ;;  %v4098_v39 = vpop.f32.mrb[42].mxu0 }
 0x411   : > { %3653 = vst [vmem:[%s7854_s13 + $0xd0] sm:$0xff] %v3605_v48  ;;  %v3608_v32 = vadd.f32 %v4098_v39, %v7850_v54  ;;  %v3599_v28 = vpop.f32.mrb[43].mxu0 }
 0x412   : > { %3651 = vst [vmem:[%s7854_s13 + $0xc0] sm:$0xff] %v3597_v2  ;;  %v3600_v21 = vadd.f32 %v7850_v54, %v3599_v28 }
 0x413   : > { %3654 = vst [vmem:[%s7854_s13 + $0xd8] sm:$0xff] %v3608_v32 }
 0x414   : > { %3652 = vst [vmem:[%s7854_s13 + $0xc8] sm:$0xff] %v3600_v21 }
 0x41d   : > { %v4101_v50 = vpop.f32.mrb[44].mxu0 }
 0x41e   : > { %v3621_v17 = vadd.f32 %v4101_v50, %v7850_v54  ;;  %v3612_v55 = vpop.f32.mrb[45].mxu0 }
 0x41f   : > { %v3613_v30 = vadd.f32 %v7850_v54, %v3612_v55  ;;  %v4102_v13 = vpop.f32.mrb[46].mxu0 }
 0x420   : > { %3657 = vst [vmem:[%s7854_s13 + $0xf0] sm:$0xff] %v3621_v17  ;;  %v3624_v63 = vadd.f32 %v4102_v13, %v7850_v54  ;;  %v3615_v25 = vpop.f32.mrb[47].mxu0 }
 0x421   : > { %3655 = vst [vmem:[%s7854_s13 + $0xe0] sm:$0xff] %v3613_v30  ;;  %v3616_v56 = vadd.f32 %v7850_v54, %v3615_v25 }
 0x422   : > { %3658 = vst [vmem:[%s7854_s13 + $0xf8] sm:$0xff] %v3624_v63 }
 0x423   : > { %3656 = vst [vmem:[%s7854_s13 + $0xe8] sm:$0xff] %v3616_v56 }
 0x424   : > { %4487 = shalt.err (!%p4484_p9)
}
 0x425   : > { %s4488_s24 = scalar_lea.hbm %s7919_s22, 4096  ;;  %s4492_s11 = scalar_lea.hbm %s8958_s1, 8192 }
 0x426   : > { %p4489_p6 = scmp.ne.s32.totalorder %s7919_s22, %s4488_s24  ;;  %p4493_p3 = scmp.lt.u32.totalorder %s7919_s22, %s8958_s1 }
 0x427   : > { %p4494_p7 = scmp.lt.u32.totalorder %s4492_s11, %s4488_s24  ;;  %p4496_p2 = scmp.lt.u32.totalorder %s4488_s24, %s7919_s22 }
 0x428   : > { %p4490_p4 = pnand %p4489_p6, %p8959_p11 }
 0x429   : > { %p4495_p12 = por %p4494_p7, %p4493_p3 }
 0x42a   : > { %p4491_p10 = pneg %p4490_p4 }
 0x42b   : > { %p4497_p0 = por %p4496_p2, %p4495_p12 }
 0x42d   : > { %p4498_p8 = pnand %p4497_p0, %p4491_p10 }
 0x42f   : > { %4501 = shalt.err (!%p4498_p8)
}
 0x430   : > { %s4576_s3 = smov 128   ;;  %s4577_s25 = smov 8  }
 0x431   : > { %4133 = dma.vmem_to_hbm [thread:$0]  (%p8959_p11), %s7921_s29, 4096, %s7919_s22, %s3660_s7, %s4576_s3, %s4576_s3, %s4577_s25  }
 0x432 PF: > { %s8960_s9 = sld [smem:[#allocation17_spill]]  ;;  %s8961_s13 = sld [smem:[#allocation23_spill]] }
 0x433   : > { %s8962_s14 = sld [smem:[#allocation21_spill]] }
 0x438   : > { %s3690_s21 = sand.u32 1, %s8960_s9   ;;  %p8963_p1 = scmp.ne.s32.totalorder %s8961_s13, 0 }
 0x439   : > { %p8964_p13 = scmp.ge.s32.totalorder %s8962_s14, 2  ;;  %s3691_s18 = scalar_lea.sflag [#allocation5], %s3690_s21 }
 0x43b   : > { %p4153_p5 = pnand %p8964_p13, %p8963_p1 }
 0x43d   : > { %4539 = dma.done.wait (!%p4153_p5), %s3691_s18, 4096  }
 0x43e   : > { %4541 = vsyncadd (!%p4153_p5), %s3691_s18, 4294963200  ;;  %s29_s14 = sadd.s32 1, %s8962_s14   ;;  %s8965_s26 = sld [smem:[#allocation18_spill]] }
 0x43f   : > { %p26_p9 = scmp.ge.s32.totalorder %s29_s14, 4   ;;  %s8966_s11 = sld [smem:[#allocation25_spill]] }
 0x440   : > { %s8967_s12 = sld [smem:[#allocation20_spill]]  ;;  %s8968_s13 = sld [smem:[#allocation24_spill]] }
 0x441   : > { %s8969_s30 = smov %s4548_s10  ;;  %28 = sbr.rel (!%p26_p9) target bundleno = 14 (0xe), region = 133 }
 0x444   : > { %s8970_s10 = smov %s8965_s26 }
 0x448   :  { %3696 = vsyncpa [#allocation4], 1 }
 0x449   :  { %3698 = vsyncpa [#allocation4 + $0x1], 1 }
 0x44a   :  { %3699 = vsyncpa [#allocation7], 1 }
 0x44b   :  { %3701 = vsyncpa [#allocation7 + $0x1], 1 }
 0x44c   :  { %3702 = vsyncpa [#allocation10], 1 }
 0x44d   :  { %3703 = vsyncpa [#allocation5], 1 }
 0x44e   :  { %3705 = vsyncpa [#allocation5 + $0x1], 1 }

</bundles_post_ra>
